<compile_context>
chip_gen: v6e
topology: v6e:2x2x1
jax: 0.10.0
libtpu: 0.0.40
codegen_flags: <defaults>
</compile_context>

<pallas_src>
import functools

import jax
import jax.numpy as jnp
from jax.experimental import pallas as pl
from jax.experimental.pallas import tpu as pltpu


def linear_attention_kernel(x_ref, wqkv_ref, wout_ref, bout_ref, gamma_ref,
                            beta_ref, hmask_ref, o_ref, *, heads, c_head, eps,
                            mxu_bf16, batch_tile):
    c_hid = heads * c_head
    scale = c_head ** (-0.5)
    mm_dtype = jnp.bfloat16 if mxu_bf16 else jnp.float32
    approx = mxu_bf16   # fast path: approximate EUP reciprocal for softmax

    # Loop-invariant operands, loaded once per grid step.
    wqkv = wqkv_ref[...].astype(mm_dtype)    # (3*c_hid, C_in)
    wout = wout_ref[...].astype(mm_dtype)    # (C_in, c_hid)
    bout = bout_ref[...]                     # (C_in, 1)
    gamma = gamma_ref[...]                   # (C_in, 1)
    beta = beta_ref[...]                     # (C_in, 1)
    hmask = hmask_ref[...]                   # (c_hid, c_hid) block-diag 0/1

    # Static unroll over the batch slices of this block; each slice is fully
    # independent (reads x_ref[b], writes o_ref[b]).
    for b in range(batch_tile):
        x = x_ref[b].astype(mm_dtype)        # (C_in, N), N on the lane axis
        n = x.shape[-1]

        # to_qkv: 1x1 conv (no bias) == channel matmul; stays lane-dense.
        qkv = jnp.dot(wqkv, x, preferred_element_type=jnp.float32)  # (3c_hid,N)
        q = qkv[0 * c_hid:1 * c_hid, :]
        k = qkv[1 * c_hid:2 * c_hid, :]
        v = qkv[2 * c_hid:3 * c_hid, :]

        # q: softmax over the head-channel axis (PyTorch dim=-2), per head.
        qh = q.reshape(heads, c_head, n)
        qm = jnp.max(qh, axis=1, keepdims=True)
        qe = jnp.exp(qh - qm)
        qs = jnp.sum(qe, axis=1, keepdims=True)
        inv_qs = pl.reciprocal(qs, approx=True) if approx else 1.0 / qs
        qn = (qe * (scale * inv_qs)).reshape(c_hid, n)   # scale folded in

        # k: softmax over the spatial (lane) axis (PyTorch dim=-1), per row.
        km = jnp.max(k, axis=1, keepdims=True)
        ke = jnp.exp(k - km)
        ks = jnp.sum(ke, axis=1, keepdims=True)
        inv_ks = pl.reciprocal(ks, approx=True) if approx else 1.0 / ks
        kn = ke * inv_ks

        # Context for all heads in one full-width MXU matmul.  k is transposed
        # ONCE here so the matmul is in natural (M,K)x(K,N) orientation:
        #   ct[e, d] = sum_n v[e, n] * kn[d, n]
        kt = jnp.transpose(kn).astype(mm_dtype)                      # (N, c_hid)
        ct = jnp.dot(v.astype(mm_dtype), kt,
                     preferred_element_type=jnp.float32)             # (c_hid, c_hid)
        ct = ct * hmask          # zero cross-head blocks (post-accumulation)

        #   out[e, n] = sum_d ct[e, d] * qn[d, n]
        out = jnp.dot(ct.astype(mm_dtype), qn.astype(mm_dtype),
                      preferred_element_type=jnp.float32)            # (c_hid, N)

        # to_out[0]: 1x1 conv with bias.
        proj = jnp.dot(wout, out.astype(mm_dtype),
                       preferred_element_type=jnp.float32) + bout    # (C_in, N)

        # to_out[1]: GroupNorm(1, C) — shifted two-pass mean / variance
        # (avoids E[x^2] - mu^2 cancellation).
        inv_cnt = 1.0 / (proj.shape[0] * proj.shape[1])
        mu = jnp.sum(proj) * inv_cnt
        cent = proj - mu
        var = jnp.sum(cent * cent) * inv_cnt
        y = cent * jax.lax.rsqrt(var + eps)
        o_ref[b] = (y * gamma + beta).astype(o_ref.dtype)


def _pick_batch_tile(batch, c_in, n, c_hid, max_tile=8):
    """Largest batch tile (divisor of `batch`, <= max_tile) whose per-step
    working set stays under a conservative VMEM budget, while keeping the grid
    at >= 2 steps so both v7x TensorCores (megacore) get work."""
    work = (5 * c_hid + 2 * c_in) * n * 4          # f32 intermediates / slice
    io = 2 * 2 * c_in * n * 4                      # in+out blocks, dbl-buffered
    budget = 24 * 1024 * 1024
    bt = max(1, min(max_tile, budget // max(1, work + io)))
    if batch >= 2:
        bt = min(bt, max(1, batch // 2))           # keep grid >= 2 (megacore)
    bt = min(bt, batch)
    while batch % bt:
        bt -= 1
    return bt


def linear_attention(x_nchw, params, *, heads=4, c_head=32, eps=1e-5,
                     mxu_bf16=True, max_batch_tile=8):
    B, C_in, H, W = x_nchw.shape
    N = H * W            # keep N a multiple of 128 for lane-dense stores
    c_hid = heads * c_head

    x = x_nchw.reshape(B, C_in, N)               # free reshape, no transpose
    wqkv = params["w_qkv"]                       # (3*c_hid, C_in)  (O, I)
    wout = params["w_out"]                       # (C_in, c_hid)    (O, I)
    bout = params["b_out"].reshape(C_in, 1)
    gamma = params["gn_gamma"].reshape(C_in, 1)
    beta = params["gn_beta"].reshape(C_in, 1)

    # Block-diagonal head mask, hoisted out of the kernel (loop-invariant).
    hid = jnp.arange(c_hid) // c_head
    hmask = (hid[:, None] == hid[None, :]).astype(jnp.float32)

    bt = _pick_batch_tile(B, C_in, N, c_hid, max_batch_tile)
    grid = (B // bt,)

    io_bytes = 2 * 2 * bt * C_in * N * 4
    work_bytes = bt * (5 * c_hid + 2 * C_in) * N * 4
    wt_bytes = (4 * c_hid * C_in + c_hid * c_hid + 3 * C_in) * 4
    vmem_limit = int(min(48 * 2 ** 20,
                         max(16 * 2 ** 20,
                             2 * (io_bytes + work_bytes + wt_bytes))))

    cost = pl.CostEstimate(
        flops=int(2 * B * N * (3 * c_hid * C_in + 2 * c_hid * c_hid
                               + C_in * c_hid)),
        transcendentals=int(2 * B * c_hid * N),
        bytes_accessed=int(2 * B * C_in * N * 4 + wt_bytes),
    )

    kernel = functools.partial(linear_attention_kernel, heads=heads,
                               c_head=c_head, eps=eps, mxu_bf16=mxu_bf16,
                               batch_tile=bt)
    out = pl.pallas_call(
        kernel,
        out_shape=jax.ShapeDtypeStruct((B, C_in, N), jnp.float32),
        grid_spec=pltpu.PrefetchScalarGridSpec(
            num_scalar_prefetch=0,
            grid=grid,                            # batch-tile axis: parallel
            in_specs=[
                pl.BlockSpec((bt, C_in, N), lambda i: (i, 0, 0)),
                pl.BlockSpec((3 * c_hid, C_in), lambda i: (0, 0)),
                pl.BlockSpec((C_in, c_hid), lambda i: (0, 0)),
                pl.BlockSpec((C_in, 1), lambda i: (0, 0)),
                pl.BlockSpec((C_in, 1), lambda i: (0, 0)),
                pl.BlockSpec((C_in, 1), lambda i: (0, 0)),
                pl.BlockSpec((c_hid, c_hid), lambda i: (0, 0)),
            ],
            out_specs=pl.BlockSpec((bt, C_in, N), lambda i: (i, 0, 0)),
        ),
        compiler_params=pltpu.CompilerParams(
            dimension_semantics=("parallel",),
            vmem_limit_bytes=vmem_limit,
        ),
        cost_estimate=cost,
    )(x, wqkv, wout, bout, gamma, beta, hmask)

    return out.reshape(B, C_in, H, W)            # free reshape back to NCHW


def linear_attention_reference(x, params, *, heads=4, c_head=32, eps=1e-5):
    """Pure-JAX replica of the PyTorch forward (NCHW), for verification."""
    B, C, H, W = x.shape
    c_hid = heads * c_head
    qkv = jnp.einsum("oi,bihw->bohw", params["w_qkv"], x)
    q, k, v = jnp.split(qkv, 3, axis=1)
    r = lambda t: t.reshape(B, heads, c_head, H * W)
    q, k, v = r(q), r(k), r(v)
    q = jax.nn.softmax(q, axis=2) * c_head ** (-0.5)
    k = jax.nn.softmax(k, axis=3)
    context = jnp.einsum("bhdn,bhen->bhde", k, v)
    out = jnp.einsum("bhde,bhdn->bhen", context, q)
    out = out.reshape(B, c_hid, H, W)
    out = jnp.einsum("oi,bihw->bohw", params["w_out"], out) \
        + params["b_out"][None, :, None, None]
    mu = out.mean(axis=(1, 2, 3), keepdims=True)
    var = ((out - mu) ** 2).mean(axis=(1, 2, 3), keepdims=True)
    y = (out - mu) / jnp.sqrt(var + eps)
    return y * params["gn_gamma"][None, :, None, None] \
        + params["gn_beta"][None, :, None, None]


if __name__ == "__main__":
    B, C_in, H, W = 4, 4, 16, 16       # N = 256 (multiple of 128: lane-dense)
    heads, c_head = 4, 32
    c_hid = heads * c_head

    key = jax.random.PRNGKey(0)
    k1, k2, k3, kx = jax.random.split(key, 4)
    params = {
        # to_qkv: Conv2d(c_in, 3*c_hid, 1, bias=False) weight (O, I)
        "w_qkv": jax.random.normal(k1, (3 * c_hid, C_in), jnp.float32) * (C_in ** -0.5),
        # to_out[0]: Conv2d(c_hid, c_in, 1) weight (O, I) + bias (O,)
        "w_out": jax.random.normal(k2, (C_in, c_hid), jnp.float32) * (c_hid ** -0.5),
        "b_out": jax.random.normal(k3, (C_in,), jnp.float32) * 0.1,
        # GroupNorm(1, c_in) affine params (PyTorch defaults: ones / zeros)
        "gn_gamma": jnp.ones((C_in,), jnp.float32),
        "gn_beta": jnp.zeros((C_in,), jnp.float32),
    }

    x = jax.random.normal(kx, (B, C_in, H, W), jnp.float32)

    ref = linear_attention_reference(x, params, heads=heads, c_head=c_head)

    # Default fast path: bf16 MXU operands, f32 accumulation, approx recip.
    out = linear_attention(x, params, heads=heads, c_head=c_head)
    out = jax.block_until_ready(out)
    assert out.shape == ref.shape == (B, C_in, H, W)
    err_fast = jnp.max(jnp.abs(out - ref))
    assert jnp.allclose(out, ref, atol=5e-2, rtol=5e-2), \
        f"bf16 path max abs err {err_fast}"

    # Exact f32 path: bit-tight comparison against the f32 reference.
    out_f32 = linear_attention(x, params, heads=heads, c_head=c_head,
                               mxu_bf16=False)
    out_f32 = jax.block_until_ready(out_f32)
    err_f32 = jnp.max(jnp.abs(out_f32 - ref))
    assert jnp.allclose(out_f32, ref, atol=1e-4, rtol=1e-4), \
        f"f32 path max abs err {err_f32}"

    print("KERNEL_OK")
</pallas_src>

<mosaic_0001>
module attributes {stable_mosaic.version = 11 : i64} {
  func.func @linear_attention_kernel(%arg0: i32, %arg1: memref<2x4x256xf32, #tpu.memory_space<vmem>>, %arg2: memref<384x4xf32, #tpu.memory_space<vmem>>, %arg3: memref<4x128xf32, #tpu.memory_space<vmem>>, %arg4: memref<4x1xf32, #tpu.memory_space<vmem>>, %arg5: memref<4x1xf32, #tpu.memory_space<vmem>>, %arg6: memref<4x1xf32, #tpu.memory_space<vmem>>, %arg7: memref<128x128xf32, #tpu.memory_space<vmem>>, %arg8: memref<2x4x256xf32, #tpu.memory_space<vmem>>) attributes {dimension_semantics = [#tpu.dimension_semantics<parallel>], iteration_bounds = array<i64: 2>, scalar_prefetch = 0 : i64, scratch_operands = 0 : i64, tpu.core_type = #tpu.core_type<tc>, window_params = [{transform_indices = @transform_0, window_bounds = array<i64: 2, 4, 256>}, {pipeline_mode = #tpu.pipeline_mode<synchronous>, transform_indices = @transform_1, window_bounds = array<i64: 384, 4>}, {pipeline_mode = #tpu.pipeline_mode<synchronous>, transform_indices = @transform_2, window_bounds = array<i64: 4, 128>}, {pipeline_mode = #tpu.pipeline_mode<synchronous>, transform_indices = @transform_3, window_bounds = array<i64: 4, 1>}, {pipeline_mode = #tpu.pipeline_mode<synchronous>, transform_indices = @transform_4, window_bounds = array<i64: 4, 1>}, {pipeline_mode = #tpu.pipeline_mode<synchronous>, transform_indices = @transform_5, window_bounds = array<i64: 4, 1>}, {pipeline_mode = #tpu.pipeline_mode<synchronous>, transform_indices = @transform_6, window_bounds = array<i64: 128, 128>}, {transform_indices = @transform_7, window_bounds = array<i64: 2, 4, 256>}]} {
    %c0 = arith.constant 0 : index
    %c0_0 = arith.constant 0 : index
    %0 = vector.load %arg2[%c0, %c0_0] : memref<384x4xf32, #tpu.memory_space<vmem>>, vector<384x4xf32>
    %1 = arith.truncf %0 : vector<384x4xf32> to vector<384x4xbf16>
    %c0_1 = arith.constant 0 : index
    %c0_2 = arith.constant 0 : index
    %2 = vector.load %arg3[%c0_1, %c0_2] : memref<4x128xf32, #tpu.memory_space<vmem>>, vector<4x128xf32>
    %3 = arith.truncf %2 : vector<4x128xf32> to vector<4x128xbf16>
    %c0_3 = arith.constant 0 : index
    %c0_4 = arith.constant 0 : index
    %4 = vector.load %arg4[%c0_3, %c0_4] : memref<4x1xf32, #tpu.memory_space<vmem>>, vector<4x1xf32>
    %c0_5 = arith.constant 0 : index
    %c0_6 = arith.constant 0 : index
    %5 = vector.load %arg5[%c0_5, %c0_6] : memref<4x1xf32, #tpu.memory_space<vmem>>, vector<4x1xf32>
    %c0_7 = arith.constant 0 : index
    %c0_8 = arith.constant 0 : index
    %6 = vector.load %arg6[%c0_7, %c0_8] : memref<4x1xf32, #tpu.memory_space<vmem>>, vector<4x1xf32>
    %c0_9 = arith.constant 0 : index
    %c0_10 = arith.constant 0 : index
    %7 = vector.load %arg7[%c0_9, %c0_10] : memref<128x128xf32, #tpu.memory_space<vmem>>, vector<128x128xf32>
    %c0_11 = arith.constant 0 : index
    %c0_12 = arith.constant 0 : index
    %c0_13 = arith.constant 0 : index
    %8 = vector.load %arg1[%c0_11, %c0_12, %c0_13] : memref<2x4x256xf32, #tpu.memory_space<vmem>>, vector<1x4x256xf32>
    %9 = vector.shape_cast %8 : vector<1x4x256xf32> to vector<4x256xf32>
    %10 = arith.truncf %9 : vector<4x256xf32> to vector<4x256xbf16>
    %cst = arith.constant dense<0.000000e+00> : vector<384x256xf32>
    %11 = tpu.matmul %1, %10, %cst {dimension_numbers = #tpu.dot_dimension_numbers<[1], [0], [0], [1], [0, 0, 1, 1], [], []>} : vector<384x4xbf16>, vector<4x256xbf16>, vector<384x256xf32> -> vector<384x256xf32>
    %12 = vector.extract_strided_slice %11 {offsets = [0, 0], sizes = [128, 256], strides = [1, 1]} : vector<384x256xf32> to vector<128x256xf32>
    %13 = vector.extract_strided_slice %11 {offsets = [128, 0], sizes = [128, 256], strides = [1, 1]} : vector<384x256xf32> to vector<128x256xf32>
    %14 = vector.extract_strided_slice %11 {offsets = [256, 0], sizes = [128, 256], strides = [1, 1]} : vector<384x256xf32> to vector<128x256xf32>
    %15 = vector.shape_cast %12 : vector<128x256xf32> to vector<4x32x256xf32>
    %cst_14 = arith.constant dense<0xFF800000> : vector<4x256xf32>
    %16 = vector.multi_reduction <maximumf>, %15, %cst_14 [1] : vector<4x32x256xf32> to vector<4x256xf32>
    %17 = vector.shape_cast %16 : vector<4x256xf32> to vector<4x1x256xf32>
    %18 = vector.broadcast %17 : vector<4x1x256xf32> to vector<4x32x256xf32>
    %19 = arith.subf %15, %18 : vector<4x32x256xf32>
    %20 = math.exp %19 : vector<4x32x256xf32>
    %cst_15 = arith.constant dense<0.000000e+00> : vector<4x256xf32>
    %21 = vector.multi_reduction <add>, %20, %cst_15 [1] : vector<4x32x256xf32> to vector<4x256xf32>
    %22 = vector.shape_cast %21 : vector<4x256xf32> to vector<4x1x256xf32>
    %23 = tpu.reciprocal %22 {approx = true} : vector<4x1x256xf32> -> vector<4x1x256xf32>
    %cst_16 = arith.constant 0.176776692 : f32
    %24 = vector.broadcast %cst_16 : f32 to vector<4x1x256xf32>
    %25 = arith.mulf %24, %23 : vector<4x1x256xf32>
    %26 = vector.broadcast %25 : vector<4x1x256xf32> to vector<4x32x256xf32>
    %27 = arith.mulf %20, %26 : vector<4x32x256xf32>
    %28 = vector.shape_cast %27 : vector<4x32x256xf32> to vector<128x256xf32>
    %cst_17 = arith.constant dense<0xFF800000> : vector<128xf32>
    %29 = vector.multi_reduction <maximumf>, %13, %cst_17 [1] : vector<128x256xf32> to vector<128xf32>
    %30 = vector.shape_cast %29 : vector<128xf32> to vector<128x1xf32>
    %31 = vector.broadcast %30 : vector<128x1xf32> to vector<128x256xf32>
    %32 = arith.subf %13, %31 : vector<128x256xf32>
    %33 = math.exp %32 : vector<128x256xf32>
    %cst_18 = arith.constant dense<0.000000e+00> : vector<128xf32>
    %34 = vector.multi_reduction <add>, %33, %cst_18 [1] : vector<128x256xf32> to vector<128xf32>
    %35 = vector.shape_cast %34 : vector<128xf32> to vector<128x1xf32>
    %36 = tpu.reciprocal %35 {approx = true} : vector<128x1xf32> -> vector<128x1xf32>
    %37 = vector.broadcast %36 : vector<128x1xf32> to vector<128x256xf32>
    %38 = arith.mulf %33, %37 : vector<128x256xf32>
    %39 = tpu.transpose %38, [1, 0] : vector<128x256xf32> -> vector<256x128xf32>
    %40 = arith.truncf %39 : vector<256x128xf32> to vector<256x128xbf16>
    %41 = arith.truncf %14 : vector<128x256xf32> to vector<128x256xbf16>
    %cst_19 = arith.constant dense<0.000000e+00> : vector<128x128xf32>
    %42 = tpu.matmul %41, %40, %cst_19 {dimension_numbers = #tpu.dot_dimension_numbers<[1], [0], [0], [1], [0, 0, 1, 1], [], []>} : vector<128x256xbf16>, vector<256x128xbf16>, vector<128x128xf32> -> vector<128x128xf32>
    %43 = arith.mulf %42, %7 : vector<128x128xf32>
    %44 = arith.truncf %43 : vector<128x128xf32> to vector<128x128xbf16>
    %45 = arith.truncf %28 : vector<128x256xf32> to vector<128x256xbf16>
    %cst_20 = arith.constant dense<0.000000e+00> : vector<128x256xf32>
    %46 = tpu.matmul %44, %45, %cst_20 {dimension_numbers = #tpu.dot_dimension_numbers<[1], [0], [0], [1], [0, 0, 1, 1], [], []>} : vector<128x128xbf16>, vector<128x256xbf16>, vector<128x256xf32> -> vector<128x256xf32>
    %47 = arith.truncf %46 : vector<128x256xf32> to vector<128x256xbf16>
    %cst_21 = arith.constant dense<0.000000e+00> : vector<4x256xf32>
    %48 = tpu.matmul %3, %47, %cst_21 {dimension_numbers = #tpu.dot_dimension_numbers<[1], [0], [0], [1], [0, 0, 1, 1], [], []>} : vector<4x128xbf16>, vector<128x256xbf16>, vector<4x256xf32> -> vector<4x256xf32>
    %49 = vector.broadcast %4 : vector<4x1xf32> to vector<4x256xf32>
    %50 = arith.addf %48, %49 : vector<4x256xf32>
    %51 = vector.shape_cast %50 : vector<4x256xf32> to vector<1x4x256xf32>
    %cst_22 = arith.constant dense<0.000000e+00> : vector<1xf32>
    %52 = vector.multi_reduction <add>, %51, %cst_22 [1, 2] : vector<1x4x256xf32> to vector<1xf32>
    %53 = vector.shape_cast %52 : vector<1xf32> to vector<1x1x1xf32>
    %54 = vector.extract %53[0, 0, 0] : f32 from vector<1x1x1xf32>
    %cst_23 = arith.constant 9.765625E-4 : f32
    %55 = arith.mulf %54, %cst_23 : f32
    %56 = vector.broadcast %55 : f32 to vector<4x256xf32>
    %57 = arith.subf %50, %56 : vector<4x256xf32>
    %58 = arith.mulf %57, %57 : vector<4x256xf32>
    %59 = vector.shape_cast %58 : vector<4x256xf32> to vector<1x4x256xf32>
    %cst_24 = arith.constant dense<0.000000e+00> : vector<1xf32>
    %60 = vector.multi_reduction <add>, %59, %cst_24 [1, 2] : vector<1x4x256xf32> to vector<1xf32>
    %61 = vector.shape_cast %60 : vector<1xf32> to vector<1x1x1xf32>
    %62 = vector.extract %61[0, 0, 0] : f32 from vector<1x1x1xf32>
    %cst_25 = arith.constant 9.765625E-4 : f32
    %63 = arith.mulf %62, %cst_25 : f32
    %cst_26 = arith.constant 9.99999974E-6 : f32
    %64 = arith.addf %63, %cst_26 : f32
    %65 = math.rsqrt %64 : f32
    %66 = vector.broadcast %65 : f32 to vector<4x256xf32>
    %67 = arith.mulf %57, %66 : vector<4x256xf32>
    %68 = vector.broadcast %5 : vector<4x1xf32> to vector<4x256xf32>
    %69 = arith.mulf %67, %68 : vector<4x256xf32>
    %70 = vector.broadcast %6 : vector<4x1xf32> to vector<4x256xf32>
    %71 = arith.addf %69, %70 : vector<4x256xf32>
    %c0_27 = arith.constant 0 : index
    %c0_28 = arith.constant 0 : index
    %c0_29 = arith.constant 0 : index
    %72 = vector.load %arg8[%c0_27, %c0_28, %c0_29] : memref<2x4x256xf32, #tpu.memory_space<vmem>>, vector<1x4x256xf32>
    %73 = vector.shape_cast %72 : vector<1x4x256xf32> to vector<4x256xf32>
    %74 = vector.shape_cast %71 : vector<4x256xf32> to vector<1x4x256xf32>
    tpu.vector_store %arg8[%c0_27, %c0_28, %c0_29], %74 {strides = array<i32>} : memref<2x4x256xf32, #tpu.memory_space<vmem>>, vector<1x4x256xf32>,
    %c1 = arith.constant 1 : index
    %c0_30 = arith.constant 0 : index
    %c0_31 = arith.constant 0 : index
    %75 = vector.load %arg1[%c1, %c0_30, %c0_31] : memref<2x4x256xf32, #tpu.memory_space<vmem>>, vector<1x4x256xf32>
    %76 = vector.shape_cast %75 : vector<1x4x256xf32> to vector<4x256xf32>
    %77 = arith.truncf %76 : vector<4x256xf32> to vector<4x256xbf16>
    %cst_32 = arith.constant dense<0.000000e+00> : vector<384x256xf32>
    %78 = tpu.matmul %1, %77, %cst_32 {dimension_numbers = #tpu.dot_dimension_numbers<[1], [0], [0], [1], [0, 0, 1, 1], [], []>} : vector<384x4xbf16>, vector<4x256xbf16>, vector<384x256xf32> -> vector<384x256xf32>
    %79 = vector.extract_strided_slice %78 {offsets = [0, 0], sizes = [128, 256], strides = [1, 1]} : vector<384x256xf32> to vector<128x256xf32>
    %80 = vector.extract_strided_slice %78 {offsets = [128, 0], sizes = [128, 256], strides = [1, 1]} : vector<384x256xf32> to vector<128x256xf32>
    %81 = vector.extract_strided_slice %78 {offsets = [256, 0], sizes = [128, 256], strides = [1, 1]} : vector<384x256xf32> to vector<128x256xf32>
    %82 = vector.shape_cast %79 : vector<128x256xf32> to vector<4x32x256xf32>
    %cst_33 = arith.constant dense<0xFF800000> : vector<4x256xf32>
    %83 = vector.multi_reduction <maximumf>, %82, %cst_33 [1] : vector<4x32x256xf32> to vector<4x256xf32>
    %84 = vector.shape_cast %83 : vector<4x256xf32> to vector<4x1x256xf32>
    %85 = vector.broadcast %84 : vector<4x1x256xf32> to vector<4x32x256xf32>
    %86 = arith.subf %82, %85 : vector<4x32x256xf32>
    %87 = math.exp %86 : vector<4x32x256xf32>
    %cst_34 = arith.constant dense<0.000000e+00> : vector<4x256xf32>
    %88 = vector.multi_reduction <add>, %87, %cst_34 [1] : vector<4x32x256xf32> to vector<4x256xf32>
    %89 = vector.shape_cast %88 : vector<4x256xf32> to vector<4x1x256xf32>
    %90 = tpu.reciprocal %89 {approx = true} : vector<4x1x256xf32> -> vector<4x1x256xf32>
    %cst_35 = arith.constant 0.176776692 : f32
    %91 = vector.broadcast %cst_35 : f32 to vector<4x1x256xf32>
    %92 = arith.mulf %91, %90 : vector<4x1x256xf32>
    %93 = vector.broadcast %92 : vector<4x1x256xf32> to vector<4x32x256xf32>
    %94 = arith.mulf %87, %93 : vector<4x32x256xf32>
    %95 = vector.shape_cast %94 : vector<4x32x256xf32> to vector<128x256xf32>
    %cst_36 = arith.constant dense<0xFF800000> : vector<128xf32>
    %96 = vector.multi_reduction <maximumf>, %80, %cst_36 [1] : vector<128x256xf32> to vector<128xf32>
    %97 = vector.shape_cast %96 : vector<128xf32> to vector<128x1xf32>
    %98 = vector.broadcast %97 : vector<128x1xf32> to vector<128x256xf32>
    %99 = arith.subf %80, %98 : vector<128x256xf32>
    %100 = math.exp %99 : vector<128x256xf32>
    %cst_37 = arith.constant dense<0.000000e+00> : vector<128xf32>
    %101 = vector.multi_reduction <add>, %100, %cst_37 [1] : vector<128x256xf32> to vector<128xf32>
    %102 = vector.shape_cast %101 : vector<128xf32> to vector<128x1xf32>
    %103 = tpu.reciprocal %102 {approx = true} : vector<128x1xf32> -> vector<128x1xf32>
    %104 = vector.broadcast %103 : vector<128x1xf32> to vector<128x256xf32>
    %105 = arith.mulf %100, %104 : vector<128x256xf32>
    %106 = tpu.transpose %105, [1, 0] : vector<128x256xf32> -> vector<256x128xf32>
    %107 = arith.truncf %106 : vector<256x128xf32> to vector<256x128xbf16>
    %108 = arith.truncf %81 : vector<128x256xf32> to vector<128x256xbf16>
    %cst_38 = arith.constant dense<0.000000e+00> : vector<128x128xf32>
    %109 = tpu.matmul %108, %107, %cst_38 {dimension_numbers = #tpu.dot_dimension_numbers<[1], [0], [0], [1], [0, 0, 1, 1], [], []>} : vector<128x256xbf16>, vector<256x128xbf16>, vector<128x128xf32> -> vector<128x128xf32>
    %110 = arith.mulf %109, %7 : vector<128x128xf32>
    %111 = arith.truncf %110 : vector<128x128xf32> to vector<128x128xbf16>
    %112 = arith.truncf %95 : vector<128x256xf32> to vector<128x256xbf16>
    %cst_39 = arith.constant dense<0.000000e+00> : vector<128x256xf32>
    %113 = tpu.matmul %111, %112, %cst_39 {dimension_numbers = #tpu.dot_dimension_numbers<[1], [0], [0], [1], [0, 0, 1, 1], [], []>} : vector<128x128xbf16>, vector<128x256xbf16>, vector<128x256xf32> -> vector<128x256xf32>
    %114 = arith.truncf %113 : vector<128x256xf32> to vector<128x256xbf16>
    %cst_40 = arith.constant dense<0.000000e+00> : vector<4x256xf32>
    %115 = tpu.matmul %3, %114, %cst_40 {dimension_numbers = #tpu.dot_dimension_numbers<[1], [0], [0], [1], [0, 0, 1, 1], [], []>} : vector<4x128xbf16>, vector<128x256xbf16>, vector<4x256xf32> -> vector<4x256xf32>
    %116 = vector.broadcast %4 : vector<4x1xf32> to vector<4x256xf32>
    %117 = arith.addf %115, %116 : vector<4x256xf32>
    %118 = vector.shape_cast %117 : vector<4x256xf32> to vector<1x4x256xf32>
    %cst_41 = arith.constant dense<0.000000e+00> : vector<1xf32>
    %119 = vector.multi_reduction <add>, %118, %cst_41 [1, 2] : vector<1x4x256xf32> to vector<1xf32>
    %120 = vector.shape_cast %119 : vector<1xf32> to vector<1x1x1xf32>
    %121 = vector.extract %120[0, 0, 0] : f32 from vector<1x1x1xf32>
    %cst_42 = arith.constant 9.765625E-4 : f32
    %122 = arith.mulf %121, %cst_42 : f32
    %123 = vector.broadcast %122 : f32 to vector<4x256xf32>
    %124 = arith.subf %117, %123 : vector<4x256xf32>
    %125 = arith.mulf %124, %124 : vector<4x256xf32>
    %126 = vector.shape_cast %125 : vector<4x256xf32> to vector<1x4x256xf32>
    %cst_43 = arith.constant dense<0.000000e+00> : vector<1xf32>
    %127 = vector.multi_reduction <add>, %126, %cst_43 [1, 2] : vector<1x4x256xf32> to vector<1xf32>
    %128 = vector.shape_cast %127 : vector<1xf32> to vector<1x1x1xf32>
    %129 = vector.extract %128[0, 0, 0] : f32 from vector<1x1x1xf32>
    %cst_44 = arith.constant 9.765625E-4 : f32
    %130 = arith.mulf %129, %cst_44 : f32
    %cst_45 = arith.constant 9.99999974E-6 : f32
    %131 = arith.addf %130, %cst_45 : f32
    %132 = math.rsqrt %131 : f32
    %133 = vector.broadcast %132 : f32 to vector<4x256xf32>
    %134 = arith.mulf %124, %133 : vector<4x256xf32>
    %135 = vector.broadcast %5 : vector<4x1xf32> to vector<4x256xf32>
    %136 = arith.mulf %134, %135 : vector<4x256xf32>
    %137 = vector.broadcast %6 : vector<4x1xf32> to vector<4x256xf32>
    %138 = arith.addf %136, %137 : vector<4x256xf32>
    %c1_46 = arith.constant 1 : index
    %c0_47 = arith.constant 0 : index
    %c0_48 = arith.constant 0 : index
    %139 = vector.load %arg8[%c1_46, %c0_47, %c0_48] : memref<2x4x256xf32, #tpu.memory_space<vmem>>, vector<1x4x256xf32>
    %140 = vector.shape_cast %139 : vector<1x4x256xf32> to vector<4x256xf32>
    %141 = vector.shape_cast %138 : vector<4x256xf32> to vector<1x4x256xf32>
    tpu.vector_store %arg8[%c1_46, %c0_47, %c0_48], %141 {strides = array<i32>} : memref<2x4x256xf32, #tpu.memory_space<vmem>>, vector<1x4x256xf32>,
    return
  }
  func.func @transform_0(%arg0: i32) -> (i32, i32, i32) {
    %c0_i32 = arith.constant 0 : i32
    %c0_i32_0 = arith.constant 0 : i32
    %c0_i32_1 = arith.constant 0 : i32
    return %arg0, %c0_i32, %c0_i32_0 : i32, i32, i32
  }
  func.func @transform_1(%arg0: i32) -> (i32, i32) {
    %c0_i32 = arith.constant 0 : i32
    %c0_i32_0 = arith.constant 0 : i32
    %c0_i32_1 = arith.constant 0 : i32
    return %c0_i32, %c0_i32_0 : i32, i32
  }
  func.func @transform_2(%arg0: i32) -> (i32, i32) {
    %c0_i32 = arith.constant 0 : i32
    %c0_i32_0 = arith.constant 0 : i32
    %c0_i32_1 = arith.constant 0 : i32
    return %c0_i32, %c0_i32_0 : i32, i32
  }
  func.func @transform_3(%arg0: i32) -> (i32, i32) {
    %c0_i32 = arith.constant 0 : i32
    %c0_i32_0 = arith.constant 0 : i32
    %c0_i32_1 = arith.constant 0 : i32
    return %c0_i32, %c0_i32_0 : i32, i32
  }
  func.func @transform_4(%arg0: i32) -> (i32, i32) {
    %c0_i32 = arith.constant 0 : i32
    %c0_i32_0 = arith.constant 0 : i32
    %c0_i32_1 = arith.constant 0 : i32
    return %c0_i32, %c0_i32_0 : i32, i32
  }
  func.func @transform_5(%arg0: i32) -> (i32, i32) {
    %c0_i32 = arith.constant 0 : i32
    %c0_i32_0 = arith.constant 0 : i32
    %c0_i32_1 = arith.constant 0 : i32
    return %c0_i32, %c0_i32_0 : i32, i32
  }
  func.func @transform_6(%arg0: i32) -> (i32, i32) {
    %c0_i32 = arith.constant 0 : i32
    %c0_i32_0 = arith.constant 0 : i32
    %c0_i32_1 = arith.constant 0 : i32
    return %c0_i32, %c0_i32_0 : i32, i32
  }
  func.func @transform_7(%arg0: i32) -> (i32, i32, i32) {
    %c0_i32 = arith.constant 0 : i32
    %c0_i32_0 = arith.constant 0 : i32
    %c0_i32_1 = arith.constant 0 : i32
    return %arg0, %c0_i32, %c0_i32_0 : i32, i32, i32
  }
}

</mosaic_0001>

<bundles_post_ra>
// kernel: tpu_custom_call.1
= control target key start
LH: loop header
LB: loop body
LE: loop exit
PB: predicated region body
PF: predicated region fallthrough
CT: control target
= control target key end

     0   :  { %12 = vsyncpa [#allocation3], 0  ;;  %s6046_s0 = inlined_call_operand.vmem [shape: f32[4,4,256], index: 0, kind: input, shape index: {}]   ;;  %s6047_s1 = inlined_call_operand.vmem [shape: f32[384,4], index: 1, kind: input, shape index: {}]   ;;  %s6048_s2 = inlined_call_operand.vmem [shape: f32[4,128], index: 2, kind: input, shape index: {}]   ;;  %s6049_s3 = inlined_call_operand.vmem [shape: f32[4,1], index: 3, kind: input, shape index: {}]   ;;  %s6050_s4 = inlined_call_operand.vmem [shape: f32[4,1], index: 4, kind: input, shape index: {}]   ;;  %s6051_s5 = inlined_call_operand.vmem [shape: f32[4,1], index: 5, kind: input, shape index: {}]   ;;  %s6052_s6 = inlined_call_operand.vmem [shape: f32[128,128], index: 6, kind: input, shape index: {}]   ;;  %s6053_s7 = inlined_call_operand.hbm [shape: f32[4,4,256], index: 7, kind: output, shape index: {}]  }
   0x1   :  { %14 = vsyncpa [#allocation3 + $0x1], 0  ;;  %s4029_s24 = smov 0   ;;  %s4031_s25 = smov 0  }
   0x2   :  { %s4033_s26 = smov 0   ;;  %s4035_s27 = smov 0  }
   0x3 LB: > { %s4050_s28 = sadd.s32 4294967295, %s3983_s27   ;;  %s3072_s29 = sadd.s32 4294967294, %s3983_s27   ;;  %s3983_s27 = sphi %s4035_s27, %s6266_s27   ;;  %s3979_s26 = sphi %s4033_s26, %s6265_s26   ;;  %s3975_s25 = sphi %s4031_s25, %s6264_s25   ;;  %s3971_s24 = sphi %s4029_s24, %s6263_s24  }
   0x4   : > { %s4054_s30 = sadd.s32 1, %s3983_s27   ;;  %s179_s8 = sadd.s32 1, %s3979_s26 }
   0x5   : > { %s176_s9 = ssub.s32 %s3983_s27, %s4054_s30  ;;  %p189_p0 = scmp.ne.s32.totalorder %s3979_s26, %s3975_s25 }
   0x6   : > { %p177_p1 = scmp.eq.s32.totalorder %s176_s9, 0  ;;  %p190_p2 = scmp.eq.s32.totalorder %s4050_s28, 1 }
   0x7   : > { %p195_p3 = scmp.ne.s32.totalorder %s3975_s25, %s3971_s24  ;;  %p196_p4 = scmp.eq.s32.totalorder %s3072_s29, 1 }
   0x8   : > { %s4065_s10 = scalar_select %p177_p1, %s3979_s26, %s179_s8  }
   0x9   : > { %p4067_p5 = por %p190_p2, %p189_p0  ;;  %p4071_p6 = por %p196_p4, %p195_p3 }
   0xa   : > { %p3075_p7 = scmp.ge.s32.totalorder %s3983_s27, 1  ;;  %p242_p8 = scmp.lt.s32.totalorder %s3983_s27, 3 }
   0xc   : > { %p243_p9 = pnand %p3075_p7, %p242_p8 }
   0xe   : > { %246 = sbr.rel (%p243_p9) target bundleno = 3328 (0xd00), region = 48 }
  0x13   : > { %s3077_s13 = sshll.u32 %s4050_s28, 1  ;;  %v6054_v0 = vmov 0   ;;  %vm456_vm0 = vcmask 1041408   ;;  %v284_v4 = vld [vmem:[%s6047_s1] sm:$0xff]  ;;  %v285_v5 = vld [vmem:[%s6047_s1 + $0x8] sm:$0xff]  ;;  %vm383_vm1 = vcmask 31744  }
  0x14   : > { %p276_p10 = scmp.lt.s32.totalorder %s3077_s13, 3  ;;  %495 = vmatprep.mubr.bf16.mxu0 %v6054_v0  ;;  %v4093_v8 = vpack.c.bf16 %v285_v5, %v284_v4  ;;  %v286_v9 = vld [vmem:[%s6047_s1 + $0x10] sm:$0xff]  ;;  %v287_v10 = vld [vmem:[%s6047_s1 + $0x18] sm:$0xff]  ;;  %v288_v12 = vld [vmem:[%s6047_s1 + $0x20] sm:$0xff]  ;;  %vm1672_vm2 = vcmask 1043456   ;;  %s272_s21 = sand.u32 1, %s3975_s25  }
  0x15   : > { %v4104_v11 = vpack.c.bf16 %v287_v10, %v286_v9  ;;  %v289_v13 = vld [vmem:[%s6047_s1 + $0x28] sm:$0xff]  ;;  %v290_v15 = vld [vmem:[%s6047_s1 + $0x30] sm:$0xff]  ;;  %v291_v16 = vld [vmem:[%s6047_s1 + $0x38] sm:$0xff]  ;;  %s3076_s22 = sshll.u32 %s272_s21, 4 }
  0x16   : > { %s6268_s13 = smov (!%p276_p10, %s3077_s13), 3  ;;  %6116 = vst [vmem:[#allocation5_spill] sm:$0xff] %v4093_v8  ;;  %v4115_v14 = vpack.c.bf16 %v289_v13, %v288_v12  ;;  %v4126_v17 = vpack.c.bf16 %v291_v16, %v290_v15  ;;  %v292_v18 = vld [vmem:[%s6047_s1 + $0x40] sm:$0xff]  ;;  %v293_v19 = vld [vmem:[%s6047_s1 + $0x48] sm:$0xff]  ;;  %v294_v21 = vld [vmem:[%s6047_s1 + $0x50] sm:$0xff]  ;;  %s274_s23 = scalar_lea.vmem [#allocation2], %s3076_s22 }
  0x17   : > { %s3138_s14 = sshll.u32 %s6268_s13, 3  ;;  %6117 = vst [vmem:[#allocation6_spill] sm:$0xff] %v4104_v11  ;;  %v4137_v20 = vpack.c.bf16 %v293_v19, %v292_v18  ;;  %v295_v22 = vld [vmem:[%s6047_s1 + $0x58] sm:$0xff]  ;;  %v296_v24 = vld [vmem:[%s6047_s1 + $0x60] sm:$0xff]  ;;  %v297_v25 = vld [vmem:[%s6047_s1 + $0x68] sm:$0xff]  ;;  %s3010_s15 = sshll.u32 %s274_s23, 4  ;;  %s6002_s15 = int_to_ptr.vmem [resolvable:$true] %s3010_s15 }
  0x18   : > { %s4082_s17 = scalar_lea.vmem %s6046_s0, %s3138_s14  ;;  %6118 = vst [vmem:[#allocation7_spill] sm:$0xff] %v4115_v14  ;;  %6119 = vst [vmem:[#allocation8_spill] sm:$0xff] %v4126_v17  ;;  %v4148_v23 = vpack.c.bf16 %v295_v22, %v294_v21  ;;  %v4159_v26 = vpack.c.bf16 %v297_v25, %v296_v24  ;;  %v298_v27 = vld [vmem:[%s6047_s1 + $0x70] sm:$0xff]  ;;  %v299_v28 = vld [vmem:[%s6047_s1 + $0x78] sm:$0xff]  ;;  %s3140_s14 = sshll.u32 %s4050_s28, 8 }
  0x19   : > { %v377_v1 = vld [vmem:[%s4082_s17] sm:$0xff]  ;;  %6120 = vst [vmem:[#allocation9_spill] sm:$0xff] %v4137_v20  ;;  %v4170_v29 = vpack.c.bf16 %v299_v28, %v298_v27  ;;  %v301_v31 = vld [vmem:[%s6047_s1 + $0x88] sm:$0xff]  ;;  %v302_v33 = vld [vmem:[%s6047_s1 + $0x90] sm:$0xff]  ;;  %s3986_s28 = smov [#allocation2]  }
  0x1a   : > { %v379_v2 = vcombine.high %v377_v1, %v377_v1  ;;  %v381_v3 = vpack.c.bf16 %v377_v1, %v377_v1  ;;  %6121 = vst [vmem:[#allocation10_spill] sm:$0xff] %v4148_v23  ;;  %6122 = vst [vmem:[#allocation11_spill] sm:$0xff] %v4159_v26  ;;  %v300_v30 = vld [vmem:[%s6047_s1 + $0x80] sm:$0xff]  ;;  %v303_v34 = vld [vmem:[%s6047_s1 + $0x98] sm:$0xff]  ;;  %s3927_s22 = sshll.u32 %s3986_s28, 4  ;;  %s3928_s22 = int_to_ptr.vmem [resolvable:$false] %s3927_s22 }
  0x1b   : > { %6123 = vst [vmem:[#allocation12_spill] sm:$0xff] %v4170_v29  ;;  %v4181_v32 = vpack.c.bf16 %v301_v31, %v300_v30  ;;  %v4192_v35 = vpack.c.bf16 %v303_v34, %v302_v33  ;;  %v304_v36 = vld [vmem:[%s6047_s1 + $0xa0] sm:$0xff]  ;;  %v305_v37 = vld [vmem:[%s6047_s1 + $0xa8] sm:$0xff]  ;;  %v306_v39 = vld [vmem:[%s6047_s1 + $0xb0] sm:$0xff]  ;;  %p3930_p0 = scmp.lt.s32.totalorder %s6002_s15, %s3928_s22 }
  0x1c   : > { %v382_v6 = vpack.c.bf16 %v379_v2, %v379_v2  ;;  %v458_v7 = vsel %vm456_vm0, %v381_v3, 0  ;;  %v4203_v38 = vpack.c.bf16 %v305_v37, %v304_v36  ;;  %v307_v40 = vld [vmem:[%s6047_s1 + $0xb8] sm:$0xff]  ;;  %v308_v42 = vld [vmem:[%s6047_s1 + $0xc0] sm:$0xff]  ;;  %v309_v43 = vld [vmem:[%s6047_s1 + $0xc8] sm:$0xff] }
  0x1d   : > { %6124 = vst [vmem:[#allocation13_spill] sm:$0xff] %v4181_v32  ;;  %6125 = vst [vmem:[#allocation14_spill] sm:$0xff] %v4192_v35  ;;  %v4214_v41 = vpack.c.bf16 %v307_v40, %v306_v39  ;;  %v4225_v44 = vpack.c.bf16 %v309_v43, %v308_v42  ;;  %v310_v45 = vld [vmem:[%s6047_s1 + $0xd0] sm:$0xff]  ;;  %v311_v46 = vld [vmem:[%s6047_s1 + $0xd8] sm:$0xff] }
  0x1e   : > { %3080 = vmatprep.subr.msk.bf16.mxu0 %vm456_vm0, %v382_v6  ;;  %6126 = vst [vmem:[#allocation15_spill] sm:$0xff] %v4203_v38  ;;  %v4236_v47 = vpack.c.bf16 %v311_v46, %v310_v45  ;;  %v312_v48 = vld [vmem:[%s6047_s1 + $0xe0] sm:$0xff]  ;;  %v313_v49 = vld [vmem:[%s6047_s1 + $0xe8] sm:$0xff]  ;;  %v314_v51 = vld [vmem:[%s6047_s1 + $0xf0] sm:$0xff] }
  0x1f   : > { %478 = vmatpush1.bf16.msra.mxu0 %v458_v7  ;;  %6127 = vst [vmem:[#allocation16_spill] sm:$0xff] %v4214_v41  ;;  %6128 = vst [vmem:[#allocation17_spill] sm:$0xff] %v4225_v44  ;;  %v4247_v50 = vpack.c.bf16 %v313_v49, %v312_v48  ;;  %v315_v52 = vld [vmem:[%s6047_s1 + $0xf8] sm:$0xff] }
  0x20   : > { %6129 = vst [vmem:[#allocation18_spill] sm:$0xff] %v4236_v47  ;;  %v4258_v53 = vpack.c.bf16 %v315_v52, %v314_v51 }
  0x21   : > { %6130 = vst [vmem:[#allocation19_spill] sm:$0xff] %v4247_v50 }
  0x22   : > { %3081 = vmatmul.mubr.msk.bf16.vlgmr.msra.gmra.mxu0 %vm383_vm1, %v4093_v8  ;;  %6131 = vst [vmem:[#allocation20_spill] sm:$0xff] %v4258_v53 }
  0x23   : > { %505 = vmatprep.mubr.bf16.mxu0 %v6054_v0 }
  0x2a   : > { %3082 = vmatmul.mubr.msk.bf16.gmra.mxu0 %vm383_vm1, %v4104_v11 }
  0x2b   : > { %515 = vmatprep.mubr.bf16.mxu0 %v6054_v0 }
  0x32   : > { %3083 = vmatmul.mubr.msk.bf16.gmra.mxu0 %vm383_vm1, %v4115_v14 }
  0x33   : > { %525 = vmatprep.mubr.bf16.mxu0 %v6054_v0 }
  0x3a   : > { %3084 = vmatmul.mubr.msk.bf16.gmra.mxu0 %vm383_vm1, %v4126_v17 }
  0x3b   : > { %535 = vmatprep.mubr.bf16.mxu0 %v6054_v0 }
  0x42   : > { %3085 = vmatmul.mubr.msk.bf16.gmra.mxu0 %vm383_vm1, %v4137_v20 }
  0x43   : > { %545 = vmatprep.mubr.bf16.mxu0 %v6054_v0 }
  0x4a   : > { %3086 = vmatmul.mubr.msk.bf16.gmra.mxu0 %vm383_vm1, %v4148_v23 }
  0x4b   : > { %555 = vmatprep.mubr.bf16.mxu0 %v6054_v0 }
  0x52   : > { %3087 = vmatmul.mubr.msk.bf16.gmra.mxu0 %vm383_vm1, %v4159_v26 }
  0x53   : > { %565 = vmatprep.mubr.bf16.mxu0 %v6054_v0 }
  0x5a   : > { %3088 = vmatmul.mubr.msk.bf16.gmra.mxu0 %vm383_vm1, %v4170_v29 }
  0x5b   : > { %575 = vmatprep.mubr.bf16.mxu0 %v6054_v0 }
  0x62   : > { %3089 = vmatmul.mubr.msk.bf16.gmra.mxu0 %vm383_vm1, %v4181_v32 }
  0x63   : > { %585 = vmatprep.mubr.bf16.mxu0 %v6054_v0 }
  0x6a   : > { %3090 = vmatmul.mubr.msk.bf16.gmra.mxu0 %vm383_vm1, %v4192_v35 }
  0x6b   : > { %595 = vmatprep.mubr.bf16.mxu0 %v6054_v0 }
  0x72   : > { %3091 = vmatmul.mubr.msk.bf16.gmra.mxu0 %vm383_vm1, %v4203_v38 }
  0x73   : > { %605 = vmatprep.mubr.bf16.mxu0 %v6054_v0 }
  0x7a   : > { %3092 = vmatmul.mubr.msk.bf16.gmra.mxu0 %vm383_vm1, %v4214_v41 }
  0x7b   : > { %615 = vmatprep.mubr.bf16.mxu0 %v6054_v0 }
  0x82   : > { %3093 = vmatmul.mubr.msk.bf16.gmra.mxu0 %vm383_vm1, %v4225_v44 }
  0x83   : > { %625 = vmatprep.mubr.bf16.mxu0 %v6054_v0 }
  0x8a   : > { %3094 = vmatmul.mubr.msk.bf16.gmra.mxu0 %vm383_vm1, %v4236_v47 }
  0x8b   : > { %635 = vmatprep.mubr.bf16.mxu0 %v6054_v0 }
  0x92   : > { %3095 = vmatmul.mubr.msk.bf16.gmra.mxu0 %vm383_vm1, %v4247_v50 }
  0x93   : > { %645 = vmatprep.mubr.bf16.mxu0 %v6054_v0 }
  0x9a   : > { %3096 = vmatmul.mubr.msk.bf16.gmra.mxu0 %vm383_vm1, %v4258_v53 }
  0x9b   : > { %655 = vmatprep.mubr.bf16.mxu0 %v6054_v0 }
  0xe2   : > { %v497_v54 = vpop.f32.mrf.mxu0 }
  0xe4   : > { %v499_v55 = vpop.f32.mrf.mxu0 }
  0xe6   : > { %v501_v56 = vpop.f32.mrf.mxu0 }
  0xe7   : > { %v736_v57 = vmax.f32 %v497_v54, %v501_v56 }
  0xe8   : > { %v503_v58 = vpop.f32.mrf.mxu0 }
  0xe9   : > { %v745_v60 = vmax.f32 %v499_v55, %v503_v58 }
  0xea   : > { %v507_v59 = vpop.f32.mrf.mxu0 }
  0xeb   : > { %v737_v61 = vmax.f32 %v736_v57, %v507_v59 }
  0xec   : > { %v509_v62 = vpop.f32.mrf.mxu0 }
  0xed   : > { %v746_v63 = vmax.f32 %v745_v60, %v509_v62 }
  0xee   : > { %v511_v1 = vpop.f32.mrf.mxu0 }
  0xef   : > { %v738_v2 = vmax.f32 %v737_v61, %v511_v1 }
  0xf0   : > { %v513_v3 = vpop.f32.mrf.mxu0 }
  0xf1   : > { %v739_v4 = vrot.slane %v738_v2, 4  ;;  %v747_v5 = vmax.f32 %v746_v63, %v513_v3 }
  0xf2   : > { %v4263_v6 = vpop.f32.mrf.mxu0 }
  0xf3   : > { %v740_v7 = vmax.f32 %v738_v2, %v739_v4  ;;  %v748_v9 = vrot.slane %v747_v5, 4 }
  0xf4   : > { %v4265_v10 = vpop.f32.mrf.mxu0 }
  0xf5   : > { %v741_v12 = vrot.slane %v740_v7, 2  ;;  %v749_v13 = vmax.f32 %v747_v5, %v748_v9 }
  0xf6   : > { %v4267_v15 = vpop.f32.mrf.mxu0 }
  0xf7   : > { %v742_v16 = vmax.f32 %v740_v7, %v741_v12  ;;  %v750_v18 = vrot.slane %v749_v13, 2  ;;  %v754_v19 = vmax.f32 %v4263_v6, %v4267_v15 }
  0xf8   : > { %v4271_v21 = vpop.f32.mrf.mxu0 }
  0xf9   : > { %v743_v22 = vrot.slane %v742_v16, 1  ;;  %v751_v24 = vmax.f32 %v749_v13, %v750_v18  ;;  %v763_v31 = vmax.f32 %v4265_v10, %v4271_v21 }
  0xfa   : > { %v4273_v25 = vpop.f32.mrf.mxu0 }
  0xfb   : > { %v744_v27 = vmax.f32 %v742_v16, %v743_v22  ;;  %v752_v28 = vrot.slane %v751_v24, 1  ;;  %v755_v30 = vmax.f32 %v754_v19, %v4273_v25 }
  0xfc   : > { %v4278_v33 = vpop.f32.mrf.mxu0 }
  0xfd   : > { %v808_v34 = vsub.f32 %v497_v54, %v744_v27  ;;  %v810_v36 = vsub.f32 %v501_v56, %v744_v27  ;;  %v812_v37 = vsub.f32 %v507_v59, %v744_v27  ;;  %v814_v39 = vsub.f32 %v511_v1, %v744_v27 }
  0xfe   : > { %v753_v40 = vmax.f32 %v751_v24, %v752_v28  ;;  %v764_v42 = vmax.f32 %v763_v31, %v4278_v33  ;;  %v531_v43 = vpop.f32.mrf.mxu0 }
  0xff   : > { %v840_v45 = vmul.f32 1.442695, %v808_v34  ;;  %v844_v46 = vmul.f32 1.442695, %v810_v36  ;;  %v848_v48 = vmul.f32 1.442695, %v812_v37  ;;  %v756_v49 = vmax.f32 %v755_v30, %v531_v43 }
 0x100   : > { %v852_v51 = vmul.f32 1.442695, %v814_v39  ;;  %v809_v52 = vsub.f32 %v499_v55, %v753_v40  ;;  %v811_v57 = vsub.f32 %v503_v58, %v753_v40  ;;  %v813_v60 = vsub.f32 %v509_v62, %v753_v40  ;;  %v4281_v61 = vpop.f32.mrf.mxu0 }
 0x101   : > { %3551 = vpow2.f32 %v840_v45  ;;  %v757_v63 = vrot.slane %v756_v49, 4  ;;  %v765_v54 = vmax.f32 %v764_v42, %v4281_v61  ;;  %v815_v56 = vsub.f32 %v513_v3, %v753_v40 }
 0x102   : > { %3553 = vpow2.f32 %v844_v46  ;;  %v842_v59 = vmul.f32 1.442695, %v809_v52  ;;  %v846_v1 = vmul.f32 1.442695, %v811_v57  ;;  %v4284_v2 = vpop.f32.mrf.mxu0  ;;  %v850_v7 = vmul.f32 1.442695, %v813_v60 }
 0x103   : > { %3555 = vpow2.f32 %v848_v48  ;;  %v758_v4 = vmax.f32 %v756_v49, %v757_v63  ;;  %v766_v5 = vrot.slane %v765_v54, 4  ;;  %v854_v9 = vmul.f32 1.442695, %v815_v56 }
 0x104   : > { %3557 = vpow2.f32 %v852_v51  ;;  %v4286_v55 = vpop.f32.mrf.mxu0 }
 0x105   : > { %3559 = vpow2.f32 %v842_v59  ;;  %v759_v58 = vrot.slane %v758_v4, 2  ;;  %v767_v62 = vmax.f32 %v765_v54, %v766_v5 }
 0x106   : > { %3561 = vpow2.f32 %v846_v1  ;;  %v4288_v12 = vpop.f32.mrf.mxu0 }
 0x107   : > { %v760_v13 = vmax.f32 %v758_v4, %v759_v58  ;;  %v768_v3 = vrot.slane %v767_v62, 2  ;;  %v772_v16 = vmax.f32 %v4284_v2, %v4288_v12  ;;  %3563 = vpow2.f32 %v850_v7 }
 0x108   : > { %v4292_v18 = vpop.f32.mrf.mxu0  ;;  %3565 = vpow2.f32 %v854_v9 }
 0x109   : > { %v761_v19 = vrot.slane %v760_v13, 1  ;;  %v769_v22 = vmax.f32 %v767_v62, %v768_v3  ;;  %v781_v31 = vmax.f32 %v4286_v55, %v4292_v18 }
 0x10a   : > { %v4294_v24 = vpop.f32.mrf.mxu0 }
 0x10b   : > { %v762_v27 = vmax.f32 %v760_v13, %v761_v19  ;;  %v770_v28 = vrot.slane %v769_v22, 1  ;;  %v773_v30 = vmax.f32 %v772_v16, %v4294_v24 }
 0x10c   : > { %v4299_v34 = vpop.f32.mrf.mxu0 }
 0x10d   : > { %v816_v36 = vsub.f32 %v4263_v6, %v762_v27  ;;  %v818_v37 = vsub.f32 %v4267_v15, %v762_v27  ;;  %v820_v39 = vsub.f32 %v4273_v25, %v762_v27  ;;  %v822_v40 = vsub.f32 %v531_v43, %v762_v27 }
 0x10e   : > { %v4304_v42 = vpop.eup %3551  ;;  %v771_v45 = vmax.f32 %v769_v22, %v770_v28  ;;  %v782_v46 = vmax.f32 %v781_v31, %v4299_v34  ;;  %v4307_v48 = vpop.f32.mrf.mxu0 }
 0x10f   : > { %v4309_v49 = vpop.eup %3553  ;;  %v856_v51 = vmul.f32 1.442695, %v816_v36  ;;  %v860_v52 = vmul.f32 1.442695, %v818_v37  ;;  %v864_v57 = vmul.f32 1.442695, %v820_v39  ;;  %v774_v60 = vmax.f32 %v773_v30, %v4307_v48 }
 0x110   : > { %v4312_v6 = vpop.eup %3555  ;;  %v904_v15 = vadd.f32 %v4309_v49, %v4304_v42  ;;  %v868_v25 = vmul.f32 1.442695, %v822_v40  ;;  %v817_v43 = vsub.f32 %v4265_v10, %v771_v45  ;;  %v819_v63 = vsub.f32 %v4271_v21, %v771_v45  ;;  %v4318_v54 = vpop.f32.mrf.mxu0 }
 0x111   : > { %v4320_v56 = vpop.eup %3557  ;;  %3567 = vpow2.f32 %v856_v51  ;;  %v821_v59 = vsub.f32 %v4278_v33, %v771_v45  ;;  %v823_v1 = vsub.f32 %v4281_v61, %v771_v45  ;;  %v775_v4 = vrot.slane %v774_v60, 4 }
 0x112   : > { %v4324_v5 = vpop.eup %3559  ;;  %v905_v7 = vadd.f32 %v4312_v6, %v904_v15  ;;  %3569 = vpow2.f32 %v860_v52  ;;  %v858_v58 = vmul.f32 1.442695, %v817_v43  ;;  %v862_v62 = vmul.f32 1.442695, %v819_v63  ;;  %v4327_v10 = vpop.f32.mrf.mxu0 }
 0x113   : > { %v4329_v21 = vpop.eup %3561  ;;  %3571 = vpow2.f32 %v864_v57  ;;  %v866_v9 = vmul.f32 1.442695, %v821_v59  ;;  %v776_v13 = vmax.f32 %v774_v60, %v775_v4  ;;  %v783_v61 = vmax.f32 %v782_v46, %v4318_v54 }
 0x114   : > { %v906_v3 = vadd.f32 %v4320_v56, %v905_v7  ;;  %v913_v33 = vadd.f32 %v4329_v21, %v4324_v5  ;;  %3573 = vpow2.f32 %v868_v25  ;;  %v4335_v16 = vpop.f32.mrf.mxu0  ;;  %v4337_v19 = vpop.eup %3563  ;;  %v870_v22 = vmul.f32 1.442695, %v823_v1 }
 0x115   : > { %3575 = vpow2.f32 %v858_v58  ;;  %v777_v27 = vrot.slane %v776_v13, 2  ;;  %v784_v31 = vrot.slane %v783_v61, 4  ;;  %v4342_v37 = vpop.eup %3565 }
 0x116   : > { %v907_v28 = vrot.slane %v906_v3, 4  ;;  %v914_v30 = vadd.f32 %v4337_v19, %v913_v33  ;;  %3577 = vpow2.f32 %v862_v62  ;;  %v4340_v36 = vpop.f32.mrf.mxu0 }
 0x117   : > { %v778_v39 = vmax.f32 %v776_v13, %v777_v27  ;;  %v790_v40 = vmax.f32 %v4327_v10, %v4340_v36  ;;  %3579 = vpow2.f32 %v866_v9  ;;  %v785_v51 = vmax.f32 %v783_v61, %v784_v31 }
 0x118   : > { %v908_v45 = vadd.f32 %v907_v28, %v906_v3  ;;  %v915_v46 = vadd.f32 %v4342_v37, %v914_v30  ;;  %v4347_v52 = vpop.f32.mrf.mxu0  ;;  %3581 = vpow2.f32 %v870_v22 }
 0x119   : > { %v779_v57 = vrot.slane %v778_v39, 1  ;;  %v786_v25 = vrot.slane %v785_v51, 2  ;;  %v799_v58 = vmax.f32 %v4335_v16, %v4347_v52 }
 0x11a   : > { %v909_v60 = vrot.slane %v908_v45, 2  ;;  %v916_v15 = vrot.slane %v915_v46, 4  ;;  %v4349_v43 = vpop.f32.mrf.mxu0 }
 0x11b   : > { %v780_v63 = vmax.f32 %v778_v39, %v779_v57  ;;  %v791_v59 = vmax.f32 %v790_v40, %v4349_v43  ;;  %v787_v7 = vmax.f32 %v785_v51, %v786_v25 }
 0x11c   : > { %v910_v1 = vadd.f32 %v909_v60, %v908_v45  ;;  %v917_v4 = vadd.f32 %v916_v15, %v915_v46  ;;  %v4354_v62 = vpop.f32.mrf.mxu0 }
 0x11d   : > { %v824_v9 = vsub.f32 %v4284_v2, %v780_v63  ;;  %v826_v13 = vsub.f32 %v4288_v12, %v780_v63  ;;  %v828_v3 = vsub.f32 %v4294_v24, %v780_v63  ;;  %v830_v33 = vsub.f32 %v4307_v48, %v780_v63 }
 0x11e   : > { %v4360_v61 = vpop.eup %3567  ;;  %v911_v22 = vrot.slane %v910_v1, 1  ;;  %v788_v27 = vrot.slane %v787_v7, 1  ;;  %v800_v28 = vmax.f32 %v799_v58, %v4354_v62  ;;  %v4363_v30 = vpop.f32.mrf.mxu0  ;;  %v918_v31 = vrot.slane %v917_v4, 2 }
 0x11f   : > { %v4365_v39 = vpop.eup %3569  ;;  %v872_v40 = vmul.f32 1.442695, %v824_v9  ;;  %v876_v45 = vmul.f32 1.442695, %v826_v13  ;;  %v880_v2 = vmul.f32 1.442695, %v828_v3  ;;  %v792_v12 = vmax.f32 %v791_v59, %v4363_v30 }
 0x120   : > { %v4368_v46 = vpop.eup %3571  ;;  %v922_v24 = vadd.f32 %v4365_v39, %v4360_v61  ;;  %v884_v48 = vmul.f32 1.442695, %v830_v33  ;;  %v789_v51 = vmax.f32 %v787_v7, %v788_v27  ;;  %v4372_v57 = vpop.f32.mrf.mxu0  ;;  %v919_v60 = vadd.f32 %v918_v31, %v917_v4 }
 0x121   : > { %v4374_v15 = vpop.eup %3573  ;;  %3583 = vpow2.f32 %v872_v40  ;;  %v793_v25 = vrot.slane %v792_v12, 4  ;;  %v801_v63 = vmax.f32 %v800_v28, %v4372_v57  ;;  %v912_v58 = vadd.f32 %v911_v22, %v910_v1 }
 0x122   : > { %v4377_v9 = vpop.eup %3575  ;;  %v923_v59 = vadd.f32 %v4368_v46, %v922_v24  ;;  %3585 = vpow2.f32 %v876_v45  ;;  %v825_v13 = vsub.f32 %v4286_v55, %v789_v51  ;;  %v827_v3 = vsub.f32 %v4292_v18, %v789_v51  ;;  %v4382_v7 = vpop.f32.mrf.mxu0 }
 0x123   : > { %v4384_v33 = vpop.eup %3577  ;;  %3587 = vpow2.f32 %v880_v2  ;;  %v829_v4 = vsub.f32 %v4299_v34, %v789_v51  ;;  %v831_v27 = vsub.f32 %v4318_v54, %v789_v51  ;;  %v794_v28 = vmax.f32 %v792_v12, %v793_v25 }
 0x124   : > { %v924_v1 = vadd.f32 %v4374_v15, %v923_v59  ;;  %v931_v22 = vadd.f32 %v4384_v33, %v4377_v9  ;;  %3589 = vpow2.f32 %v884_v48  ;;  %v874_v31 = vmul.f32 1.442695, %v825_v13  ;;  %v4391_v55 = vpop.f32.mrf.mxu0  ;;  %v4393_v18 = vpop.eup %3579 }
 0x125   : > { %v878_v40 = vmul.f32 1.442695, %v827_v3  ;;  %v882_v45 = vmul.f32 1.442695, %v829_v4  ;;  %v886_v24 = vmul.f32 1.442695, %v831_v27  ;;  %v1024_v34 = vmax.f32 %v4382_v7, %v4391_v55  ;;  %v4400_v25 = vpop.eup %3581 }
 0x126   : > { %v925_v2 = vrot.slane %v924_v1, 4  ;;  %v932_v54 = vadd.f32 %v4393_v18, %v931_v22  ;;  %3591 = vpow2.f32 %v874_v31  ;;  %v795_v12 = vrot.slane %v794_v28, 2  ;;  %v4398_v51 = vpop.f32.mrf.mxu0 }
 0x127   : > { %3593 = vpow2.f32 %v878_v40  ;;  %v802_v48 = vrot.slane %v801_v63, 4  ;;  %1025 = vmax.xlane.f32.xlu0 %v1024_v34  ;;  %v920_v59 = vrot.slane %v919_v60, 1 }
 0x128   : > { %v926_v13 = vadd.f32 %v925_v2, %v924_v1  ;;  %v933_v3 = vadd.f32 %v4400_v25, %v932_v54  ;;  %3595 = vpow2.f32 %v882_v45  ;;  %v796_v4 = vmax.f32 %v794_v28, %v795_v12  ;;  %v4403_v27 = vpop.f32.mrf.mxu0 }
 0x129   : > { %3597 = vpow2.f32 %v886_v24  ;;  %v803_v0 = vmax.f32 %v801_v63, %v802_v48  ;;  %v1027_v22 = vmax.f32 %v4398_v51, %v4403_v27  ;;  %v921_v31 = vadd.f32 %v920_v59, %v919_v60 }
 0x12a   : > { %v927_v53 = vrot.slane %v926_v13, 2  ;;  %v934_v50 = vrot.slane %v933_v3, 4  ;;  %v797_v47 = vrot.slane %v796_v4, 1  ;;  %v4407_v40 = vpop.f32.mrf.mxu0  ;;  %3599 = vrcp.f32 %v912_v58 }
 0x12b   : > { %v804_v34 = vrot.slane %v803_v0, 2  ;;  %1028 = vmax.xlane.f32.xlu0 %v1027_v22  ;;  %3601 = vrcp.f32 %v921_v31 }
 0x12c   : > { %v935_v1 = vadd.f32 %v934_v50, %v933_v3  ;;  %v798_v45 = vmax.f32 %v796_v4, %v797_v47  ;;  %v4409_v28 = vpop.f32.mrf.mxu0  ;;  %v928_v60 = vadd.f32 %v927_v53, %v926_v13 }
 0x12d   : > { %v805_v2 = vmax.f32 %v803_v0, %v804_v34  ;;  %v1030_v63 = vmax.f32 %v4407_v40, %v4409_v28 }
 0x12e   : > { %v4413_v24 = vpop.eup %3583  ;;  %v832_v54 = vsub.f32 %v4327_v10, %v798_v45  ;;  %v834_v12 = vsub.f32 %v4340_v36, %v798_v45  ;;  %v836_v58 = vsub.f32 %v4349_v43, %v798_v45  ;;  %v4418_v48 = vpop.f32.mrf.mxu0  ;;  %v838_v47 = vsub.f32 %v4363_v30, %v798_v45 }
 0x12f   : > { %v4420_v59 = vpop.eup %3585  ;;  %v806_v50 = vrot.slane %v805_v2, 1  ;;  %1031 = vmax.xlane.f32.xlu1 %v1030_v63  ;;  %v936_v0 = vrot.slane %v935_v1, 2  ;;  %v929_v45 = vrot.slane %v928_v60, 1 }
 0x130   : > { %v4423_v3 = vpop.eup %3587  ;;  %v940_v53 = vadd.f32 %v4420_v59, %v4413_v24  ;;  %v888_v13 = vmul.f32 1.442695, %v832_v54  ;;  %v892_v10 = vmul.f32 1.442695, %v834_v12  ;;  %v896_v4 = vmul.f32 1.442695, %v836_v58  ;;  %v4427_v36 = vpop.f32.mrf.mxu0 }
 0x131   : > { %v4429_v43 = vpop.eup %3589  ;;  %v900_v22 = vmul.f32 1.442695, %v838_v47  ;;  %v807_v31 = vmax.f32 %v805_v2, %v806_v50  ;;  %v1033_v30 = vmax.f32 %v4418_v48, %v4427_v36  ;;  %v937_v34 = vadd.f32 %v936_v0, %v935_v1 }
 0x132   : > { %v941_v63 = vadd.f32 %v4423_v3, %v940_v53  ;;  %3603 = vpow2.f32 %v888_v13  ;;  %v4434_v44 = vpop.f32.mrf.mxu0 }
 0x133   : > { %v4436_v41 = vpop.eup %3591  ;;  %3605 = vpow2.f32 %v892_v10  ;;  %v833_v54 = vsub.f32 %v4335_v16, %v807_v31  ;;  %v835_v12 = vsub.f32 %v4347_v52, %v807_v31  ;;  %v837_v58 = vsub.f32 %v4354_v62, %v807_v31  ;;  %1034 = vmax.xlane.f32.xlu1 %v1033_v30 }
 0x134   : > { %v4441_v2 = vpop.eup %3593  ;;  %v942_v1 = vadd.f32 %v4429_v43, %v941_v63  ;;  %3607 = vpow2.f32 %v896_v4  ;;  %v839_v47 = vsub.f32 %v4372_v57, %v807_v31  ;;  %v4445_v50 = vpop.f32.mrf.mxu0  ;;  %v938_v0 = vrot.slane %v937_v34, 1 }
 0x135   : > { %v4447_v53 = vpop.eup %3595  ;;  %v949_v16 = vadd.f32 %v4441_v2, %v4436_v41  ;;  %3609 = vpow2.f32 %v900_v22  ;;  %v890_v52 = vmul.f32 1.442695, %v833_v54  ;;  %v894_v13 = vmul.f32 1.442695, %v835_v12 }
 0x136   : > { %v4451_v62 = vpop.eup %3597  ;;  %v943_v10 = vrot.slane %v942_v1, 4  ;;  %v898_v30 = vmul.f32 1.442695, %v837_v58  ;;  %v902_v38 = vmul.f32 1.442695, %v839_v47  ;;  %v4453_v63 = vpop.f32.mrf.mxu0  ;;  %v1036_v57 = vmax.f32 %v4434_v44, %v4445_v50 }
 0x137   : > { %v3600_v4 = vpop.eup %3599  ;;  %v950_v31 = vadd.f32 %v4447_v53, %v949_v16  ;;  %3611 = vpow2.f32 %v890_v52  ;;  %v939_v35 = vadd.f32 %v938_v0, %v937_v34  ;;  %v930_v54 = vadd.f32 %v929_v45, %v928_v60 }
 0x138   : > { %v3602_v32 = vpop.eup %3601  ;;  %v944_v29 = vadd.f32 %v943_v10, %v942_v1  ;;  %3613 = vpow2.f32 %v894_v13  ;;  %1037 = vmax.xlane.f32.xlu0 %v1036_v57  ;;  %v4458_v22 = vpop.f32.mrf.mxu0  ;;  %v984_v12 = vmul.f32 0.17677669, %v3600_v4 }
 0x139   : > { %v951_v58 = vadd.f32 %v4451_v62, %v950_v31  ;;  %3615 = vpow2.f32 %v898_v30  ;;  %v1039_v47 = vmax.f32 %v4453_v63, %v4458_v22  ;;  %v985_v26 = vmul.f32 0.17677669, %v3602_v32 }
 0x13a   : > { %v945_v23 = vrot.slane %v944_v29, 2  ;;  %3617 = vpow2.f32 %v902_v38  ;;  %v4463_v16 = vpop.f32.mrf.mxu0  ;;  %v4466_v34 = vmul.f32 %v4312_v6, %v984_v12  ;;  %v4469_v1 = vmul.f32 %v4320_v56, %v984_v12 }
 0x13b   : > { %v952_v0 = vrot.slane %v951_v58, 4  ;;  %1040 = vmax.xlane.f32.xlu1 %v1039_v47  ;;  %3619 = vrcp.f32 %v939_v35  ;;  %v4472_v60 = vmul.f32 %v4337_v19, %v985_v26  ;;  %v4475_v45 = vmul.f32 %v4342_v37, %v985_v26 }
 0x13c   : > { %6132 = vst [vmem:[#allocation21_spill] sm:$0xff] %v4466_v34  ;;  %6133 = vst [vmem:[#allocation22_spill] sm:$0xff] %v4469_v1  ;;  %v946_v32 = vadd.f32 %v945_v23, %v944_v29  ;;  %v4477_v52 = vpop.f32.mrf.mxu0  ;;  %3621 = vrcp.f32 %v930_v54  ;;  %v4482_v6 = vmul.f32 %v4324_v5, %v985_v26  ;;  %v4489_v37 = vmul.f32 %v4329_v21, %v985_v26 }
 0x13d   : > { %6134 = vst [vmem:[#allocation23_spill] sm:$0xff] %v4472_v60  ;;  %6135 = vst [vmem:[#allocation24_spill] sm:$0xff] %v4475_v45  ;;  %v953_v56 = vadd.f32 %v952_v0, %v951_v58  ;;  %v1042_v35 = vmax.f32 %v4463_v16, %v4477_v52  ;;  %v4494_v13 = vmul.f32 %v4304_v42, %v984_v12 }
 0x13e   : > { %6136 = vst [vmem:[#allocation25_spill] sm:$0xff] %v4482_v6  ;;  %6137 = vst [vmem:[#allocation26_spill] sm:$0xff] %v4489_v37  ;;  %v947_v23 = vrot.slane %v946_v32, 1  ;;  %v4491_v29 = vpop.f32.mrf.mxu0  ;;  %v4497_v10 = vmul.f32 %v4309_v49, %v984_v12 }
 0x13f   : > { %6138 = vst [vmem:[#allocation27_spill] sm:$0xff] %v4494_v13  ;;  %v4499_v5 = vpop.eup %3603  ;;  %1043 = vmax.xlane.f32.xlu0 %v1042_v35  ;;  %v954_v30 = vrot.slane %v953_v56, 2 }
 0x140   : > { %6139 = vst [vmem:[#allocation28_spill] sm:$0xff] %v4497_v10  ;;  %v4503_v4 = vpop.eup %3605  ;;  %v4505_v26 = vpop.f32.mrf.mxu0  ;;  %v948_v21 = vadd.f32 %v947_v23, %v946_v32 }
 0x141   : > { %v4509_v42 = vpop.eup %3607  ;;  %v958_v49 = vadd.f32 %v4503_v4, %v4499_v5  ;;  %v1045_v54 = vmax.f32 %v4491_v29, %v4505_v26  ;;  %v955_v12 = vadd.f32 %v954_v30, %v953_v56 }
 0x142   : > { %v4515_v58 = vpop.eup %3609  ;;  %v4517_v47 = vpop.f32.mrf.mxu0  ;;  %3623 = vrcp.f32 %v948_v21 }
 0x143   : > { %v959_v0 = vadd.f32 %v4509_v42, %v958_v49  ;;  %1046 = vmax.xlane.f32.xlu1 %v1045_v54  ;;  %v956_v32 = vrot.slane %v955_v12, 1 }
 0x144   : > { %v4520_v35 = vpop.eup %3611  ;;  %v4522_v23 = vpop.f32.mrf.mxu0 }
 0x145   : > { %v4524_v31 = vpop.eup %3613  ;;  %v960_v57 = vadd.f32 %v4515_v58, %v959_v0  ;;  %v1048_v56 = vmax.f32 %v4517_v47, %v4522_v23  ;;  %v957_v30 = vadd.f32 %v956_v32, %v955_v12 }
 0x146   : > { %v4529_v38 = vpop.eup %3615  ;;  %v967_v21 = vadd.f32 %v4524_v31, %v4520_v35  ;;  %v4533_v49 = vpop.f32.mrf.mxu0 }
 0x147   : > { %v4535_v54 = vpop.eup %3617  ;;  %v961_v19 = vrot.slane %v960_v57, 4  ;;  %1049 = vmax.xlane.f32.xlu0 %v1048_v56  ;;  %3625 = vrcp.f32 %v957_v30 }
 0x148   : > { %v3620_v20 = vpop.eup %3619  ;;  %v968_v17 = vadd.f32 %v4529_v38, %v967_v21  ;;  %v4538_v0 = vpop.f32.mrf.mxu0 }
 0x149   : > { %v3622_v14 = vpop.eup %3621  ;;  %v962_v11 = vadd.f32 %v961_v19, %v960_v57  ;;  %v1051_v12 = vmax.f32 %v4533_v49, %v4538_v0  ;;  %v987_v32 = vmul.f32 0.17677669, %v3620_v20 }
 0x14a   : > { %v969_v8 = vadd.f32 %v4535_v54, %v968_v17  ;;  %v4543_v13 = vpop.f32.mrf.mxu0  ;;  %v986_v10 = vmul.f32 0.17677669, %v3622_v14 }
 0x14b   : > { %v963_v6 = vrot.slane %v962_v11, 2  ;;  %1052 = vmax.xlane.f32.xlu1 %v1051_v12  ;;  %v4546_v56 = vmul.f32 %v4393_v18, %v987_v32  ;;  %v4549_v30 = vmul.f32 %v4400_v25, %v987_v32  ;;  %v4552_v21 = vmul.f32 %v4377_v9, %v987_v32 }
 0x14c   : > { %v970_v19 = vrot.slane %v969_v8, 4  ;;  %v4554_v57 = vpop.f32.mrf.mxu0  ;;  %v4557_v20 = vmul.f32 %v4368_v46, %v986_v10  ;;  %v4560_v17 = vmul.f32 %v4374_v15, %v986_v10  ;;  %v4563_v14 = vmul.f32 %v4384_v33, %v987_v32 }
 0x14d   : > { %6140 = vst [vmem:[#allocation29_spill] sm:$0xff] %v4552_v21  ;;  %v964_v18 = vadd.f32 %v963_v6, %v962_v11  ;;  %v1054_v25 = vmax.f32 %v4543_v13, %v4554_v57  ;;  %v4570_v12 = vmul.f32 %v4360_v61, %v986_v10  ;;  %v4579_v11 = vmul.f32 %v4365_v39, %v986_v10 }
 0x14e   : > { %6141 = vst [vmem:[#allocation30_spill] sm:$0xff] %v4557_v20  ;;  %6142 = vst [vmem:[#allocation31_spill] sm:$0xff] %v4560_v17  ;;  %v971_v37 = vadd.f32 %v970_v19, %v969_v8  ;;  %v4572_v34 = vpop.f32.mrf.mxu0 }
 0x14f   : > { %6143 = vst [vmem:[#allocation32_spill] sm:$0xff] %v4563_v14  ;;  %6144 = vst [vmem:[#allocation33_spill] sm:$0xff] %v4570_v12  ;;  %v3624_v33 = vpop.eup %3623  ;;  %v965_v6 = vrot.slane %v964_v18, 1  ;;  %1055 = vmax.xlane.f32.xlu0 %v1054_v25 }
 0x150   : > { %6145 = vst [vmem:[#allocation34_spill] sm:$0xff] %v4579_v11  ;;  %v4581_v32 = vpop.f32.mrf.mxu0  ;;  %v972_v9 = vrot.slane %v971_v37, 2  ;;  %v988_v61 = vmul.f32 0.17677669, %v3624_v33 }
 0x151   : > { %v1057_v19 = vmax.f32 %v4572_v34, %v4581_v32  ;;  %v966_v46 = vadd.f32 %v965_v6, %v964_v18 }
 0x152   : > { %v4587_v1 = vpop.f32.mrf.mxu0  ;;  %v973_v15 = vadd.f32 %v972_v9, %v971_v37  ;;  %v4590_v39 = vmul.f32 %v4423_v3, %v988_v61  ;;  %v4593_v10 = vmul.f32 %v4429_v43, %v988_v61  ;;  %v4596_v25 = vmul.f32 %v4413_v24, %v988_v61 }
 0x153   : > { %1058 = vmax.xlane.f32.xlu1 %v1057_v19  ;;  %3627 = vrcp.f32 %v966_v46  ;;  %v4599_v33 = vmul.f32 %v4420_v59, %v988_v61 }
 0x154   : > { %v3626_v8 = vpop.eup %3625  ;;  %v4601_v60 = vpop.f32.mrf.mxu0  ;;  %v974_v18 = vrot.slane %v973_v15, 1 }
 0x155   : > { %v1060_v3 = vmax.f32 %v4587_v1, %v4601_v60  ;;  %v989_v43 = vmul.f32 0.17677669, %v3626_v8 }
 0x156   : > { %v4609_v9 = vpop.f32.mrf.mxu0  ;;  %v975_v46 = vadd.f32 %v974_v18, %v973_v15 }
 0x157   : > { %1061 = vmax.xlane.f32.xlu0 %v1060_v3  ;;  %v4612_v59 = vmul.f32 %v4447_v53, %v989_v43  ;;  %v4615_v6 = vmul.f32 %v4451_v62, %v989_v43  ;;  %v4618_v61 = vmul.f32 %v4436_v41, %v989_v43  ;;  %v4621_v19 = vmul.f32 %v4441_v2, %v989_v43 }
 0x158   : > { %v4623_v8 = vpop.f32.mrf.mxu0  ;;  %3629 = vrcp.f32 %v975_v46 }
 0x159   : > { %v1063_v24 = vmax.f32 %v4609_v9, %v4623_v8 }
 0x15a   : > { %v4631_v62 = vpop.f32.mrf.mxu0 }
 0x15b   : > { %1064 = vmax.xlane.f32.xlu1 %v1063_v24 }
 0x15c   : > { %v4633_v41 = vpop.f32.mrf.mxu0 }
 0x15d   : > { %v1066_v2 = vmax.f32 %v4631_v62, %v4633_v41 }
 0x15e   : > { %v4637_v18 = vpop.f32.mrf.mxu0 }
 0x15f   : > { %1067 = vmax.xlane.f32.xlu0 %v1066_v2 }
 0x160   : > { %v3628_v3 = vpop.eup %3627  ;;  %v4639_v43 = vpop.f32.mrf.mxu0 }
 0x161   : > { %v1069_v46 = vmax.f32 %v4637_v18, %v4639_v43  ;;  %v990_v37 = vmul.f32 0.17677669, %v3628_v3 }
 0x163   : > { %1070 = vmax.xlane.f32.xlu1 %v1069_v46  ;;  %v4644_v53 = vmul.f32 %v4509_v42, %v990_v37  ;;  %v4647_v24 = vmul.f32 %v4515_v58, %v990_v37  ;;  %v4650_v15 = vmul.f32 %v4499_v5, %v990_v37  ;;  %v4653_v45 = vmul.f32 %v4503_v4, %v990_v37 }
 0x165   : > { %v3630_v2 = vpop.eup %3629 }
 0x166   : > { %v991_v46 = vmul.f32 0.17677669, %v3630_v2 }
 0x168   : > { %v4660_v42 = vmul.f32 %v4529_v38, %v991_v46  ;;  %v4663_v58 = vmul.f32 %v4535_v54, %v991_v46  ;;  %v4666_v5 = vmul.f32 %v4520_v35, %v991_v46  ;;  %v4669_v4 = vmul.f32 %v4524_v31, %v991_v46 }
 0x1b0   : > { %v1026_v3 = vpop.xlane.xlu0 %1025 }
 0x1b1   : > { %v1072_v2 = vsub.f32 %v4382_v7, %v1026_v3  ;;  %v1073_v38 = vsub.f32 %v4391_v55, %v1026_v3 }
 0x1b3   : > { %v1104_v11 = vmul.f32 1.442695, %v1072_v2  ;;  %v1106_v54 = vmul.f32 1.442695, %v1073_v38 }
 0x1b4   : > { %v1029_v21 = vpop.xlane.xlu0 %1028 }
 0x1b5   : > { %3631 = vpow2.f32 %v1104_v11  ;;  %v1074_v35 = vsub.f32 %v4398_v51, %v1029_v21  ;;  %v1075_v31 = vsub.f32 %v4403_v27, %v1029_v21 }
 0x1b6   : > { %3633 = vpow2.f32 %v1106_v54 }
 0x1b7   : > { %v1108_v46 = vmul.f32 1.442695, %v1074_v35  ;;  %v1110_v14 = vmul.f32 1.442695, %v1075_v31 }
 0x1b8   : > { %v1032_v37 = vpop.xlane.xlu1 %1031 }
 0x1b9   : > { %3635 = vpow2.f32 %v1108_v46  ;;  %v1076_v12 = vsub.f32 %v4407_v40, %v1032_v37  ;;  %v1077_v20 = vsub.f32 %v4409_v28, %v1032_v37 }
 0x1ba   : > { %3637 = vpow2.f32 %v1110_v14 }
 0x1bb   : > { %v1112_v7 = vmul.f32 1.442695, %v1076_v12  ;;  %v1114_v55 = vmul.f32 1.442695, %v1077_v20 }
 0x1bc   : > { %v1035_v3 = vpop.xlane.xlu1 %1034 }
 0x1bd   : > { %3639 = vpow2.f32 %v1112_v7  ;;  %v1078_v11 = vsub.f32 %v4418_v48, %v1035_v3  ;;  %v1079_v51 = vsub.f32 %v4427_v36, %v1035_v3 }
 0x1be   : > { %3641 = vpow2.f32 %v1114_v55 }
 0x1bf   : > { %v1116_v27 = vmul.f32 1.442695, %v1078_v11  ;;  %v1118_v21 = vmul.f32 1.442695, %v1079_v51 }
 0x1c1   : > { %3643 = vpow2.f32 %v1116_v27  ;;  %v1038_v2 = vpop.xlane.xlu0 %1037 }
 0x1c2   : > { %v4683_v38 = vpop.eup %3631  ;;  %3645 = vpow2.f32 %v1118_v21  ;;  %v1080_v40 = vsub.f32 %v4434_v44, %v1038_v2  ;;  %v1081_v28 = vsub.f32 %v4445_v50, %v1038_v2 }
 0x1c3   : > { %v4687_v14 = vpop.eup %3633 }
 0x1c4   : > { %v1120_v20 = vmul.f32 1.442695, %v1080_v40  ;;  %v1122_v12 = vmul.f32 1.442695, %v1081_v28  ;;  %v1041_v37 = vpop.xlane.xlu1 %1040  ;;  %v1168_v48 = vadd.f32 %v4687_v14, %v4683_v38 }
 0x1c5   : > { %v1082_v36 = vsub.f32 %v4453_v63, %v1041_v37  ;;  %v1083_v54 = vsub.f32 %v4458_v22, %v1041_v37 }
 0x1c6   : > { %v4693_v35 = vpop.eup %3635  ;;  %3647 = vpow2.f32 %v1120_v20  ;;  %1169 = vadd.xlane.f32.xlu0 %v1168_v48 }
 0x1c7   : > { %v4695_v31 = vpop.eup %3637  ;;  %3649 = vpow2.f32 %v1122_v12  ;;  %v1124_v44 = vmul.f32 1.442695, %v1082_v36  ;;  %v1126_v50 = vmul.f32 1.442695, %v1083_v54 }
 0x1c8   : > { %v1044_v46 = vpop.xlane.xlu0 %1043  ;;  %v1171_v7 = vadd.f32 %v4695_v31, %v4693_v35 }
 0x1c9   : > { %3651 = vpow2.f32 %v1124_v44  ;;  %v1084_v55 = vsub.f32 %v4463_v16, %v1044_v46  ;;  %v1085_v63 = vsub.f32 %v4477_v52, %v1044_v46 }
 0x1ca   : > { %v4701_v3 = vpop.eup %3639  ;;  %3653 = vpow2.f32 %v1126_v50  ;;  %1172 = vadd.xlane.f32.xlu1 %v1171_v7 }
 0x1cb   : > { %v4703_v22 = vpop.eup %3641  ;;  %v1128_v11 = vmul.f32 1.442695, %v1084_v55  ;;  %v1130_v51 = vmul.f32 1.442695, %v1085_v63 }
 0x1cc   : > { %v1047_v27 = vpop.xlane.xlu1 %1046  ;;  %v1174_v21 = vadd.f32 %v4703_v22, %v4701_v3 }
 0x1cd   : > { %3655 = vpow2.f32 %v1128_v11  ;;  %v1086_v2 = vsub.f32 %v4491_v29, %v1047_v27  ;;  %v1087_v40 = vsub.f32 %v4505_v26, %v1047_v27 }
 0x1ce   : > { %v4709_v16 = vpop.eup %3643  ;;  %3657 = vpow2.f32 %v1130_v51  ;;  %1175 = vadd.xlane.f32.xlu0 %v1174_v21 }
 0x1cf   : > { %v4711_v52 = vpop.eup %3645  ;;  %v1132_v28 = vmul.f32 1.442695, %v1086_v2  ;;  %v1134_v20 = vmul.f32 1.442695, %v1087_v40 }
 0x1d0   : > { %v1050_v12 = vpop.xlane.xlu0 %1049  ;;  %v1177_v37 = vadd.f32 %v4711_v52, %v4709_v16 }
 0x1d1   : > { %3659 = vpow2.f32 %v1132_v28  ;;  %v1088_v48 = vsub.f32 %v4517_v47, %v1050_v12  ;;  %v1089_v36 = vsub.f32 %v4522_v23, %v1050_v12 }
 0x1d2   : > { %3661 = vpow2.f32 %v1134_v20  ;;  %1178 = vadd.xlane.f32.xlu1 %v1177_v37 }
 0x1d3   : > { %v4717_v29 = vpop.eup %3647  ;;  %v1136_v26 = vmul.f32 1.442695, %v1088_v48  ;;  %v1138_v54 = vmul.f32 1.442695, %v1089_v36 }
 0x1d4   : > { %v4719_v44 = vpop.eup %3649  ;;  %v1053_v50 = vpop.xlane.xlu1 %1052 }
 0x1d5   : > { %3663 = vpow2.f32 %v1136_v26  ;;  %v1090_v46 = vsub.f32 %v4533_v49, %v1053_v50  ;;  %v1091_v7 = vsub.f32 %v4538_v0, %v1053_v50  ;;  %v1180_v55 = vadd.f32 %v4719_v44, %v4717_v29 }
 0x1d6   : > { %v4725_v47 = vpop.eup %3651  ;;  %3665 = vpow2.f32 %v1138_v54 }
 0x1d7   : > { %v4727_v23 = vpop.eup %3653  ;;  %v1140_v63 = vmul.f32 1.442695, %v1090_v46  ;;  %v1142_v11 = vmul.f32 1.442695, %v1091_v7  ;;  %1181 = vadd.xlane.f32.xlu0 %v1180_v55 }
 0x1d8   : > { %v1056_v51 = vpop.xlane.xlu0 %1055  ;;  %v1183_v27 = vadd.f32 %v4727_v23, %v4725_v47 }
 0x1d9   : > { %3667 = vpow2.f32 %v1140_v63  ;;  %v1092_v49 = vsub.f32 %v4543_v13, %v1056_v51  ;;  %v1093_v0 = vsub.f32 %v4554_v57, %v1056_v51 }
 0x1da   : > { %v4733_v21 = vpop.eup %3655  ;;  %3669 = vpow2.f32 %v1142_v11  ;;  %1184 = vadd.xlane.f32.xlu1 %v1183_v27 }
 0x1db   : > { %v4735_v2 = vpop.eup %3657  ;;  %v1144_v40 = vmul.f32 1.442695, %v1092_v49  ;;  %v1146_v28 = vmul.f32 1.442695, %v1093_v0 }
 0x1dc   : > { %v1059_v20 = vpop.xlane.xlu1 %1058  ;;  %v1186_v12 = vadd.f32 %v4735_v2, %v4733_v21 }
 0x1dd   : > { %3671 = vpow2.f32 %v1144_v40  ;;  %v1094_v37 = vsub.f32 %v4572_v34, %v1059_v20  ;;  %v1095_v48 = vsub.f32 %v4581_v32, %v1059_v20 }
 0x1de   : > { %v4741_v13 = vpop.eup %3659  ;;  %3673 = vpow2.f32 %v1146_v28  ;;  %1187 = vadd.xlane.f32.xlu0 %v1186_v12 }
 0x1df   : > { %v4743_v57 = vpop.eup %3661  ;;  %v1148_v36 = vmul.f32 1.442695, %v1094_v37  ;;  %v1150_v26 = vmul.f32 1.442695, %v1095_v48 }
 0x1e0   : > { %v1062_v54 = vpop.xlane.xlu0 %1061  ;;  %v1189_v50 = vadd.f32 %v4743_v57, %v4741_v13 }
 0x1e1   : > { %3675 = vpow2.f32 %v1148_v36  ;;  %v1096_v46 = vsub.f32 %v4587_v1, %v1062_v54  ;;  %v1097_v7 = vsub.f32 %v4601_v60, %v1062_v54 }
 0x1e2   : > { %v4749_v34 = vpop.eup %3663  ;;  %3677 = vpow2.f32 %v1150_v26  ;;  %1190 = vadd.xlane.f32.xlu1 %v1189_v50 }
 0x1e3   : > { %v4751_v32 = vpop.eup %3665  ;;  %v1152_v55 = vmul.f32 1.442695, %v1096_v46  ;;  %v1154_v63 = vmul.f32 1.442695, %v1097_v7  ;;  %v317_v7 = vld [vmem:[%s6047_s1 + $0x108] sm:$0xff] }
 0x1e4   : > { %v1065_v11 = vpop.xlane.xlu1 %1064  ;;  %v1192_v51 = vadd.f32 %v4751_v32, %v4749_v34 }
 0x1e5   : > { %3679 = vpow2.f32 %v1152_v55  ;;  %v1098_v27 = vsub.f32 %v4609_v9, %v1065_v11  ;;  %v1099_v49 = vsub.f32 %v4623_v8, %v1065_v11 }
 0x1e6   : > { %v4757_v1 = vpop.eup %3667  ;;  %3681 = vpow2.f32 %v1154_v63  ;;  %1193 = vadd.xlane.f32.xlu0 %v1192_v51 }
 0x1e7   : > { %v4759_v60 = vpop.eup %3669  ;;  %v1156_v0 = vmul.f32 1.442695, %v1098_v27  ;;  %v1158_v40 = vmul.f32 1.442695, %v1099_v49  ;;  %v6147_v27 = vmov 0  }
 0x1e8   : > { %v1068_v28 = vpop.xlane.xlu0 %1067  ;;  %v1195_v20 = vadd.f32 %v4759_v60, %v4757_v1 }
 0x1e9   : > { %3683 = vpow2.f32 %v1156_v0  ;;  %v1100_v12 = vsub.f32 %v4631_v62, %v1068_v28  ;;  %v1101_v37 = vsub.f32 %v4633_v41, %v1068_v28  ;;  %v316_v41 = vld [vmem:[%s6047_s1 + $0x100] sm:$0xff] }
 0x1ea   : > { %v4765_v9 = vpop.eup %3671  ;;  %3685 = vpow2.f32 %v1158_v40  ;;  %1196 = vadd.xlane.f32.xlu1 %v1195_v20  ;;  %v4783_v51 = vpack.c.bf16 %v317_v7, %v316_v41  ;;  %v318_v20 = vld [vmem:[%s6047_s1 + $0x110] sm:$0xff]  ;;  %v320_v41 = vld [vmem:[%s6047_s1 + $0x120] sm:$0xff]  ;;  %v321_v7 = vld [vmem:[%s6047_s1 + $0x128] sm:$0xff] }
 0x1eb   : > { %v4767_v8 = vpop.eup %3673  ;;  %v1160_v48 = vmul.f32 1.442695, %v1100_v12  ;;  %v1162_v36 = vmul.f32 1.442695, %v1101_v37  ;;  %v319_v12 = vld [vmem:[%s6047_s1 + $0x118] sm:$0xff] }
 0x1ec   : > { %v1071_v26 = vpop.xlane.xlu1 %1070  ;;  %v1198_v54 = vadd.f32 %v4767_v8, %v4765_v9  ;;  %6146 = vst [vmem:[#allocation35_spill] sm:$0xff] %v4783_v51  ;;  %3097 = vmatmul.mubr.msk.bf16.gmra.mxu0 %vm383_vm1, %v4783_v51 }
 0x1ed   : > { %3687 = vpow2.f32 %v1160_v48  ;;  %v1102_v50 = vsub.f32 %v4637_v18, %v1071_v26  ;;  %v1103_v46 = vsub.f32 %v4639_v43, %v1071_v26  ;;  %665 = vmatprep.mubr.bf16.mxu0 %v6147_v27  ;;  %v4808_v48 = vpack.c.bf16 %v319_v12, %v318_v20  ;;  %v324_v12 = vld [vmem:[%s6047_s1 + $0x140] sm:$0xff] }
 0x1ee   : > { %v4773_v62 = vpop.eup %3675  ;;  %3689 = vpow2.f32 %v1162_v36  ;;  %1199 = vadd.xlane.f32.xlu0 %v1198_v54 }
 0x1ef   : > { %v4781_v55 = vpop.eup %3677  ;;  %v1164_v63 = vmul.f32 1.442695, %v1102_v50  ;;  %v1166_v11 = vmul.f32 1.442695, %v1103_v46  ;;  %6148 = vst [vmem:[#allocation36_spill] sm:$0xff] %v4808_v48 }
 0x1f0   : > { %v1201_v18 = vadd.f32 %v4781_v55, %v4773_v62 }
 0x1f1   : > { %3691 = vpow2.f32 %v1164_v63 }
 0x1f2   : > { %v4789_v43 = vpop.eup %3679  ;;  %3693 = vpow2.f32 %v1166_v11  ;;  %1202 = vadd.xlane.f32.xlu1 %v1201_v18  ;;  %v4831_v11 = vpack.c.bf16 %v321_v7, %v320_v41  ;;  %v322_v18 = vld [vmem:[%s6047_s1 + $0x130] sm:$0xff]  ;;  %v327_v7 = vld [vmem:[%s6047_s1 + $0x158] sm:$0xff] }
 0x1f3   : > { %v4792_v49 = vpop.eup %3681  ;;  %v326_v41 = vld [vmem:[%s6047_s1 + $0x150] sm:$0xff] }
 0x1f4   : > { %v1204_v0 = vadd.f32 %v4792_v49, %v4789_v43  ;;  %3098 = vmatmul.mubr.msk.bf16.gmra.mxu0 %vm383_vm1, %v4808_v48  ;;  %6149 = vst [vmem:[#allocation37_spill] sm:$0xff] %v4831_v11 }
 0x1f5   : > { %675 = vmatprep.mubr.bf16.mxu0 %v6147_v27 }
 0x1f6   : > { %v4796_v40 = vpop.eup %3683  ;;  %1205 = vadd.xlane.f32.xlu0 %v1204_v0  ;;  %v323_v0 = vld [vmem:[%s6047_s1 + $0x138] sm:$0xff] }
 0x1f7   : > { %v4798_v28 = vpop.eup %3685  ;;  %v4842_v20 = vpack.c.bf16 %v323_v0, %v322_v18  ;;  %v328_v18 = vld [vmem:[%s6047_s1 + $0x160] sm:$0xff]  ;;  %v329_v0 = vld [vmem:[%s6047_s1 + $0x168] sm:$0xff] }
 0x1f8   : > { %v1207_v37 = vadd.f32 %v4798_v28, %v4796_v40 }
 0x1f9   : > { %6150 = vst [vmem:[#allocation38_spill] sm:$0xff] %v4842_v20 }
 0x1fa   : > { %v4810_v36 = vpop.eup %3687  ;;  %1208 = vadd.xlane.f32.xlu1 %v1207_v37  ;;  %v325_v37 = vld [vmem:[%s6047_s1 + $0x148] sm:$0xff] }
 0x1fb   : > { %v4814_v26 = vpop.eup %3689 }
 0x1fc   : > { %v1210_v54 = vadd.f32 %v4814_v26, %v4810_v36  ;;  %3099 = vmatmul.mubr.msk.bf16.gmra.mxu0 %vm383_vm1, %v4831_v11 }
 0x1fd   : > { %685 = vmatprep.mubr.bf16.mxu0 %v6147_v27 }
 0x1fe   : > { %v4819_v50 = vpop.eup %3691  ;;  %1211 = vadd.xlane.f32.xlu0 %v1210_v54  ;;  %v4853_v54 = vpack.c.bf16 %v325_v37, %v324_v12  ;;  %v4875_v12 = vpack.c.bf16 %v329_v0, %v328_v18  ;;  %v330_v37 = vld [vmem:[%s6047_s1 + $0x170] sm:$0xff] }
 0x1ff   : > { %v4821_v46 = vpop.eup %3693 }
 0x200   : > { %v1213_v63 = vadd.f32 %v4821_v46, %v4819_v50  ;;  %6151 = vst [vmem:[#allocation39_spill] sm:$0xff] %v4853_v54  ;;  %6153 = vst [vmem:[#allocation41_spill] sm:$0xff] %v4875_v12 }
 0x202   : > { %1214 = vadd.xlane.f32.xlu1 %v1213_v63  ;;  %v4864_v63 = vpack.c.bf16 %v327_v7, %v326_v41  ;;  %v331_v41 = vld [vmem:[%s6047_s1 + $0x178] sm:$0xff] }
 0x203   : > { %v4886_v7 = vpack.c.bf16 %v331_v41, %v330_v37 }
 0x204   : > { %3100 = vmatmul.mubr.msk.bf16.gmra.mxu0 %vm383_vm1, %v4842_v20  ;;  %6152 = vst [vmem:[#allocation40_spill] sm:$0xff] %v4864_v63 }
 0x205   : > { %695 = vmatprep.mubr.bf16.mxu0 %v6147_v27  ;;  %6154 = vst [vmem:[#allocation42_spill] sm:$0xff] %v4886_v7 }
 0x20c   : > { %3101 = vmatmul.mubr.msk.bf16.gmra.mxu0 %vm383_vm1, %v4853_v54 }
 0x20d   : > { %705 = vmatprep.mubr.bf16.mxu0 %v6147_v27 }
 0x214   : > { %3102 = vmatmul.mubr.msk.bf16.gmra.mxu0 %vm383_vm1, %v4864_v63 }
 0x215   : > { %715 = vmatprep.mubr.bf16.mxu0 %v6147_v27 }
 0x21c   : > { %3103 = vmatmul.mubr.msk.bf16.gmra.mxu0 %vm383_vm1, %v4875_v12 }
 0x21d   : > { %725 = vmatprep.mubr.bf16.mxu0 %v6147_v27 }
 0x224   : > { %3104 = vmatmul.mubr.msk.bf16.gmra.mxu0 %vm383_vm1, %v4886_v7 }
 0x24f   : > { %v1170_v18 = vpop.xlane.xlu0 %1169 }
 0x250   : > { %3695 = vrcp.f32 %v1170_v18 }
 0x253   : > { %v1173_v0 = vpop.xlane.xlu1 %1172 }
 0x254   : > { %3697 = vrcp.f32 %v1173_v0 }
 0x257   : > { %v1176_v12 = vpop.xlane.xlu0 %1175 }
 0x258   : > { %3699 = vrcp.f32 %v1176_v12 }
 0x25b   : > { %v1179_v63 = vpop.xlane.xlu1 %1178 }
 0x25c   : > { %3701 = vrcp.f32 %v1179_v63 }
 0x25d   : > { %v3696_v54 = vpop.eup %3695 }
 0x25e   : > { %v1232_v20 = vmul.f32 %v3696_v54, %v4683_v38  ;;  %v1233_v11 = vmul.f32 %v3696_v54, %v4687_v14 }
 0x260   : > { %v1182_v48 = vpop.xlane.xlu0 %1181  ;;  %v3323_v51 = vpack.i.bf16 %v1232_v20, %v1233_v11 }
 0x261   : > { %v3698_v37 = vpop.eup %3697  ;;  %3703 = vrcp.f32 %v1182_v48 }
 0x262   : > { %3324 = vxpose.xlu0.b32.start [1/16] %v3323_v51, 128  ;;  %v1234_v41 = vmul.f32 %v3698_v37, %v4693_v35  ;;  %v1235_v18 = vmul.f32 %v3698_v37, %v4695_v31 }
 0x263   : > { %v1185_v7 = vpop.xlane.xlu1 %1184 }
 0x264   : > { %3705 = vrcp.f32 %v1185_v7  ;;  %v3325_v0 = vpack.i.bf16 %v1234_v41, %v1235_v18 }
 0x265   : > { %v3700_v12 = vpop.eup %3699 }
 0x266   : > { %3326 = vxpose.xlu0.b32.cont [2/16] %v3325_v0, 128  ;;  %v1236_v63 = vmul.f32 %v3700_v12, %v4701_v3  ;;  %v1237_v38 = vmul.f32 %v3700_v12, %v4703_v22 }
 0x267   : > { %v1188_v17 = vpop.xlane.xlu0 %1187 }
 0x268   : > { %3707 = vrcp.f32 %v1188_v17  ;;  %v3327_v14 = vpack.i.bf16 %v1236_v63, %v1237_v38 }
 0x269   : > { %v3702_v11 = vpop.eup %3701 }
 0x26a   : > { %3328 = vxpose.xlu0.b32.cont [3/16] %v3327_v14, 128  ;;  %v1238_v51 = vmul.f32 %v3702_v11, %v4709_v16  ;;  %v1239_v35 = vmul.f32 %v3702_v11, %v4711_v52 }
 0x26b   : > { %v1191_v48 = vpop.xlane.xlu1 %1190 }
 0x26c   : > { %3709 = vrcp.f32 %v1191_v48  ;;  %v3329_v31 = vpack.i.bf16 %v1238_v51, %v1239_v35 }
 0x26e   : > { %v3704_v20 = vpop.eup %3703  ;;  %3330 = vxpose.xlu0.b32.cont [4/16] %v3329_v31, 128 }
 0x26f   : > { %v1194_v54 = vpop.xlane.xlu0 %1193  ;;  %v1240_v7 = vmul.f32 %v3704_v20, %v4717_v29  ;;  %v1241_v3 = vmul.f32 %v3704_v20, %v4719_v44 }
 0x270   : > { %3711 = vrcp.f32 %v1194_v54 }
 0x271   : > { %v3706_v22 = vpop.eup %3705  ;;  %v3331_v17 = vpack.i.bf16 %v1240_v7, %v1241_v3 }
 0x272   : > { %v1242_v37 = vmul.f32 %v3706_v22, %v4725_v47  ;;  %v1243_v41 = vmul.f32 %v3706_v22, %v4727_v23 }
 0x273   : > { %3332 = vxpose.xlu0.b32.cont [5/16] %v3331_v17, 128  ;;  %v1197_v16 = vpop.xlane.xlu1 %1196 }
 0x274   : > { %3713 = vrcp.f32 %v1197_v16  ;;  %v3333_v52 = vpack.i.bf16 %v1242_v37, %v1243_v41 }
 0x275   : > { %v3708_v18 = vpop.eup %3707 }
 0x276   : > { %v1244_v0 = vmul.f32 %v3708_v18, %v4733_v21  ;;  %v1245_v12 = vmul.f32 %v3708_v18, %v4735_v2 }
 0x277   : > { %3334 = vxpose.xlu0.b32.cont [6/16] %v3333_v52, 128  ;;  %v1200_v29 = vpop.xlane.xlu0 %1199 }
 0x278   : > { %3715 = vrcp.f32 %v1200_v29  ;;  %v3335_v44 = vpack.i.bf16 %v1244_v0, %v1245_v12 }
 0x279   : > { %v3710_v63 = vpop.eup %3709 }
 0x27a   : > { %v1246_v38 = vmul.f32 %v3710_v63, %v4741_v13  ;;  %v1247_v47 = vmul.f32 %v3710_v63, %v4743_v57 }
 0x27b   : > { %3336 = vxpose.xlu0.b32.cont [7/16] %v3335_v44, 128  ;;  %v1203_v23 = vpop.xlane.xlu1 %1202 }
 0x27c   : > { %3717 = vrcp.f32 %v1203_v23  ;;  %v3337_v14 = vpack.i.bf16 %v1246_v38, %v1247_v47 }
 0x27d   : > { %v3712_v11 = vpop.eup %3711 }
 0x27e   : > { %v1248_v51 = vmul.f32 %v3712_v11, %v4749_v34  ;;  %v1249_v21 = vmul.f32 %v3712_v11, %v4751_v32 }
 0x27f   : > { %3338 = vxpose.xlu0.b32.cont [8/16] %v3337_v14, 128  ;;  %v1206_v2 = vpop.xlane.xlu0 %1205 }
 0x280   : > { %3719 = vrcp.f32 %v1206_v2  ;;  %v3339_v35 = vpack.i.bf16 %v1248_v51, %v1249_v21 }
 0x281   : > { %v3714_v48 = vpop.eup %3713 }
 0x282   : > { %v1250_v31 = vmul.f32 %v3714_v48, %v4757_v1  ;;  %v1251_v13 = vmul.f32 %v3714_v48, %v4759_v60 }
 0x283   : > { %3340 = vxpose.xlu0.b32.cont [9/16] %v3339_v35, 128  ;;  %v1209_v57 = vpop.xlane.xlu1 %1208 }
 0x284   : > { %3721 = vrcp.f32 %v1209_v57  ;;  %v3341_v20 = vpack.i.bf16 %v1250_v31, %v1251_v13 }
 0x285   : > { %v3716_v54 = vpop.eup %3715 }
 0x286   : > { %v1252_v7 = vmul.f32 %v3716_v54, %v4765_v9  ;;  %v1253_v34 = vmul.f32 %v3716_v54, %v4767_v8 }
 0x287   : > { %3342 = vxpose.xlu0.b32.cont [10/16] %v3341_v20, 128  ;;  %v1212_v32 = vpop.xlane.xlu0 %1211 }
 0x288   : > { %3723 = vrcp.f32 %v1212_v32  ;;  %v3343_v3 = vpack.i.bf16 %v1252_v7, %v1253_v34 }
 0x289   : > { %v3718_v22 = vpop.eup %3717 }
 0x28a   : > { %v1254_v17 = vmul.f32 %v3718_v22, %v4773_v62  ;;  %v1255_v1 = vmul.f32 %v3718_v22, %v4781_v55 }
 0x28b   : > { %3344 = vxpose.xlu0.b32.cont [11/16] %v3343_v3, 128  ;;  %v1215_v60 = vpop.xlane.xlu1 %1214 }
 0x28c   : > { %3725 = vrcp.f32 %v1215_v60  ;;  %v3345_v37 = vpack.i.bf16 %v1254_v17, %v1255_v1 }
 0x28d   : > { %v3720_v41 = vpop.eup %3719 }
 0x28e   : > { %v1256_v16 = vmul.f32 %v3720_v41, %v4789_v43  ;;  %v1257_v9 = vmul.f32 %v3720_v41, %v4792_v49 }
 0x28f   : > { %3346 = vxpose.xlu0.b32.cont [12/16] %v3345_v37, 128 }
 0x290   : > { %v3347_v8 = vpack.i.bf16 %v1256_v16, %v1257_v9 }
 0x291   : > { %v3722_v52 = vpop.eup %3721 }
 0x292   : > { %v1258_v18 = vmul.f32 %v3722_v52, %v4796_v40  ;;  %v1259_v0 = vmul.f32 %v3722_v52, %v4798_v28 }
 0x293   : > { %3348 = vxpose.xlu0.b32.cont [13/16] %v3347_v8, 128 }
 0x294   : > { %v3349_v62 = vpack.i.bf16 %v1258_v18, %v1259_v0 }
 0x295   : > { %v3724_v12 = vpop.eup %3723 }
 0x296   : > { %v1260_v55 = vmul.f32 %v3724_v12, %v4810_v36  ;;  %v1261_v29 = vmul.f32 %v3724_v12, %v4814_v26 }
 0x297   : > { %3350 = vxpose.xlu0.b32.cont [14/16] %v3349_v62, 128 }
 0x298   : > { %v3351_v44 = vpack.i.bf16 %v1260_v55, %v1261_v29 }
 0x299   : > { %v3726_v63 = vpop.eup %3725 }
 0x29a   : > { %v1262_v43 = vmul.f32 %v3726_v63, %v4819_v50  ;;  %v1263_v49 = vmul.f32 %v3726_v63, %v4821_v46 }
 0x29b   : > { %3352 = vxpose.xlu0.b32.cont [15/16] %v3351_v44, 128 }
 0x29c   : > { %v3353_v38 = vpack.i.bf16 %v1262_v43, %v1263_v49 }
 0x29f   : > { %3354 = vxpose.xlu0.b32.end [16/16] %v3353_v38, 128 }
 0x2ac   : > { %v4922_v40 = vpop.f32.mrf.mxu0 }
 0x2ae   : > { %v659_v28 = vpop.f32.mrf.mxu0 }
 0x2b0   : > { %v4924_v47 = vpop.f32.mrf.mxu0 }
 0x2b1   : > { %v1344_v36 = vpack.c.bf16 %v4924_v47, %v4922_v40  ;;  %v6159_v40 = vpack.c.bf16 %v4615_v6, %v4612_v59  ;;  %v6163_v6 = vpack.c.bf16 %v4549_v30, %v4546_v56  ;;  %v6167_v47 = vld [vmem:[#allocation32_spill] sm:$0xff] }
 0x2b2   : > { %v663_v23 = vpop.f32.mrf.mxu0  ;;  %v6173_v30 = vld [vmem:[#allocation24_spill] sm:$0xff] }
 0x2b3   : > { %v1345_v26 = vpack.c.bf16 %v663_v23, %v659_v28 }
 0x2b4   : > { %v4945_v1 = vpop.f32.mrf.mxu0 }
 0x2b5   : > { %1392 = vmatprep.mubr.bf16.mxu1 %v1345_v26 }
 0x2b6   : > { %v4947_v37 = vpop.f32.mrf.mxu0 }
 0x2b8   : > { %v4949_v16 = vpop.f32.mrf.mxu0 }
 0x2ba   : > { %v4951_v8 = vpop.f32.mrf.mxu0 }
 0x2bc   : > { %v4953_v18 = vpop.f32.mrf.mxu0 }
 0x2be   : > { %v4955_v62 = vpop.f32.mrf.mxu0 }
 0x2c0   : > { %v4957_v55 = vpop.f32.mrf.mxu0 }
 0x2c1   : > { %v1348_v59 = vpack.c.bf16 %v4957_v55, %v4953_v18  ;;  %v6174_v18 = vld [vmem:[#allocation23_spill] sm:$0xff] }
 0x2c2   : > { %v4959_v44 = vpop.f32.mrf.mxu0 }
 0x2c8   : > { %3547 = vset.pattern.permute.xlu0 %v6147_v27 }
 0x2df   : > { %v3355_v14 = vpop.trf.xlu0 }
 0x2e0   : > { %v3359_v50 = vunpack.i.h.bf16 %v3355_v14  ;;  %v3356_v11 = vunpack.i.l.bf16 %v3355_v14 }
 0x2e3   : > { %v3360_v46 = vpop.trf.xlu0 }
 0x2e4   : > { %v3364_v51 = vunpack.i.h.bf16 %v3360_v46  ;;  %v3361_v21 = vunpack.i.l.bf16 %v3360_v46 }
 0x2e6   : > { %v4929_v2 = vpack.c.bf16 %v3361_v21, %v3356_v11  ;;  %v4931_v35 = vpack.c.bf16 %v3364_v51, %v3359_v50  ;;  %v4961_v11 = vpop.f32.mrf.mxu0 }
 0x2e7   : > { %v3365_v48 = vpop.trf.xlu0 }
 0x2e8   : > { %v3369_v31 = vunpack.i.h.bf16 %v3365_v48  ;;  %v3366_v13 = vunpack.i.l.bf16 %v3365_v48 }
 0x2eb   : > { %v3370_v57 = vpop.trf.xlu0 }
 0x2ec   : > { %v3374_v20 = vunpack.i.h.bf16 %v3370_v57  ;;  %v3371_v54 = vunpack.i.l.bf16 %v3370_v57 }
 0x2ee   : > { %v4933_v7 = vpack.c.bf16 %v3371_v54, %v3366_v13  ;;  %v4935_v34 = vpack.c.bf16 %v3374_v20, %v3369_v31  ;;  %v4963_v13 = vpop.f32.mrf.mxu0 }
 0x2ef   : > { %v4937_v32 = vpop.trf.xlu0 }
 0x2f3   : > { %v4939_v3 = vpop.trf.xlu0 }
 0x2f7   : > { %v4941_v22 = vpop.trf.xlu0 }
 0x2fb   : > { %v4943_v17 = vpop.trf.xlu0 }
 0x2ff   : > { %v3395_v60 = vpop.trf.xlu0 }
 0x303   : > { %v3400_v41 = vpop.trf.xlu0 }
 0x304   : > { %v3401_v54 = vunpack.i.l.bf16 %v3400_v41 }
 0x307   : > { %v3405_v9 = vpop.trf.xlu0 }
 0x308   : > { %v3406_v31 = vunpack.i.l.bf16 %v3405_v9 }
 0x30b   : > { %v3410_v52 = vpop.trf.xlu0 }
 0x30c   : > { %v3411_v51 = vunpack.i.l.bf16 %v3410_v52  ;;  %v3414_v57 = vunpack.i.h.bf16 %v3410_v52 }
 0x30f   : > { %v3415_v0 = vpop.trf.xlu0 }
 0x310   : > { %v3416_v26 = vunpack.i.l.bf16 %v3415_v0  ;;  %v3419_v48 = vunpack.i.h.bf16 %v3415_v0 }
 0x313   : > { %v3420_v12 = vpop.trf.xlu0 }
 0x314   : > { %v3421_v63 = vunpack.i.l.bf16 %v3420_v12  ;;  %v3424_v46 = vunpack.i.h.bf16 %v3420_v12  ;;  %v3404_v12 = vunpack.i.h.bf16 %v3400_v41  ;;  %v3376_v41 = vunpack.i.l.bf16 %v4937_v32 }
 0x316   : > { %v1342_v21 = vpack.c.bf16 %v3421_v63, %v3416_v26  ;;  %v1334_v20 = vpack.c.bf16 %v3424_v46, %v3419_v48  ;;  %v3391_v63 = vunpack.i.l.bf16 %v4943_v17  ;;  %v3386_v26 = vunpack.i.l.bf16 %v4941_v22 }
 0x317   : > { %v3425_v29 = vpop.trf.xlu0 }
 0x318   : > { %v3426_v49 = vunpack.i.l.bf16 %v3425_v29  ;;  %v3429_v38 = vunpack.i.h.bf16 %v3425_v29  ;;  %v1341_v29 = vpack.c.bf16 %v3411_v51, %v3406_v31  ;;  %v1339_v46 = vpack.c.bf16 %v3391_v63, %v3386_v26 }
 0x319   : > { %v3389_v51 = vunpack.i.h.bf16 %v4941_v22 }
 0x31b   : > { %v3430_v43 = vpop.trf.xlu0 }
 0x31c   : > { %v3431_v28 = vunpack.i.l.bf16 %v3430_v43  ;;  %v3434_v23 = vunpack.i.h.bf16 %v3430_v43  ;;  %v3409_v43 = vunpack.i.h.bf16 %v3405_v9  ;;  %v3381_v9 = vunpack.i.l.bf16 %v4939_v3 }
 0x31e   : > { %v1343_v14 = vpack.c.bf16 %v3431_v28, %v3426_v49  ;;  %v1335_v50 = vpack.c.bf16 %v3434_v23, %v3429_v38  ;;  %v3396_v49 = vunpack.i.l.bf16 %v3395_v60  ;;  %v4965_v38 = vpop.f32.mrf.mxu0  ;;  %v1333_v28 = vpack.c.bf16 %v3414_v57, %v3409_v43 }
 0x31f   : > { %v3399_v23 = vunpack.i.h.bf16 %v3395_v60  ;;  %v3384_v60 = vunpack.i.h.bf16 %v4939_v3  ;;  %v1338_v31 = vpack.c.bf16 %v3381_v9, %v3376_v41  ;;  %v3379_v57 = vunpack.i.h.bf16 %v4937_v32 }
 0x320   : > { %3141 = vmatprep.subr.bf16.mxu1 %v1343_v14  ;;  %v1340_v0 = vpack.c.bf16 %v3401_v54, %v3396_v49  ;;  %v693_v52 = vpop.f32.mrf.mxu0  ;;  %v3394_v14 = vunpack.i.h.bf16 %v4943_v17  ;;  %v1347_v3 = vpack.c.bf16 %v4951_v8, %v4947_v37  ;;  %v6155_v32 = vpack.c.bf16 %v4663_v58, %v4660_v42  ;;  %v6171_v37 = vld [vmem:[#allocation33_spill] sm:$0xff]  ;;  %v6179_v49 = vld [vmem:[#allocation26_spill] sm:$0xff] }
 0x321   : > { %3142 = vmatpush3.bf16.msra.mxu1 %v1335_v50  ;;  %v1332_v50 = vpack.c.bf16 %v3404_v12, %v3399_v23  ;;  %v1349_v42 = vpack.c.bf16 %v4959_v44, %v4955_v62  ;;  %v1346_v58 = vpack.c.bf16 %v4949_v16, %v4945_v1  ;;  %v6170_v1 = vld [vmem:[#allocation34_spill] sm:$0xff]  ;;  %v1350_v56 = vpack.c.bf16 %v4965_v38, %v4961_v11  ;;  %v6180_v12 = vld [vmem:[#allocation25_spill] sm:$0xff]  ;;  %v6183_v23 = vld [vmem:[#allocation27_spill] sm:$0xff] }
 0x322   : > { %3143 = vmatprep.subr.bf16.mxu1 %v1342_v21  ;;  %v697_v21 = vpop.f32.mrf.mxu0  ;;  %v1331_v48 = vpack.c.bf16 %v3394_v14, %v3389_v51  ;;  %v6172_v16 = vpack.c.bf16 %v6170_v1, %v6171_v37  ;;  %v6175_v62 = vpack.c.bf16 %v6173_v30, %v6174_v18  ;;  %v6176_v44 = vld [vmem:[#allocation22_spill] sm:$0xff]  ;;  %v368_v30 = vld [vmem:[%s6052_s6 + $0x38] sm:$0xff] }
 0x324   : > { %v699_v17 = vpop.f32.mrf.mxu0 }
 0x325   : > { %3144 = vmatpush3.bf16.msra.mxu1 %v1334_v20  ;;  %v1330_v20 = vpack.c.bf16 %v3384_v60, %v3379_v57 }
 0x326   : > { %3145 = vmatprep.subr.bf16.mxu1 %v1341_v29  ;;  %v701_v54 = vpop.f32.mrf.mxu0 }
 0x327   : > { %v1352_v38 = vpack.c.bf16 %v701_v54, %v697_v21  ;;  %v362_v54 = vld [vmem:[%s6052_s6 + $0x8] sm:$0xff] }
 0x328   : > { %v703_v22 = vpop.f32.mrf.mxu0 }
 0x329   : > { %3146 = vmatpush3.bf16.msra.mxu1 %v1333_v28  ;;  %v1353_v8 = vpack.c.bf16 %v703_v22, %v699_v17  ;;  %v6181_v28 = vpack.c.bf16 %v6179_v49, %v6180_v12 }
 0x32a   : > { %3147 = vmatprep.subr.bf16.mxu1 %v1340_v0  ;;  %v707_v29 = vpop.f32.mrf.mxu0  ;;  %v6182_v0 = vld [vmem:[#allocation28_spill] sm:$0xff] }
 0x32b   : > { %v6184_v26 = vpack.c.bf16 %v6182_v0, %v6183_v23  ;;  %v370_v0 = vld [vmem:[%s6052_s6 + $0x48] sm:$0xff] }
 0x32d   : > { %3148 = vmatpush3.bf16.msra.mxu1 %v1332_v50 }
 0x32e   : > { %3149 = vmatprep.subr.bf16.mxu1 %v1339_v46 }
 0x331   : > { %3150 = vmatpush3.bf16.msra.mxu1 %v1331_v48 }
 0x332   : > { %3151 = vmatprep.subr.bf16.mxu1 %v1338_v31 }
 0x335   : > { %3152 = vmatpush3.bf16.msra.mxu1 %v1330_v20  ;;  %v361_v20 = vld [vmem:[%s6052_s6] sm:$0xff] }
 0x336   : > { %3153 = vmatprep.subr.bf16.mxu1 %v4933_v7  ;;  %v6156_v7 = vpack.c.bf16 %v4647_v24, %v4644_v53  ;;  %v6160_v24 = vpack.c.bf16 %v4593_v10, %v4590_v39  ;;  %v6164_v10 = vld [vmem:[#allocation31_spill] sm:$0xff] }
 0x339   : > { %3154 = vmatpush3.bf16.msra.mxu1 %v4935_v34  ;;  %v6158_v34 = vpack.c.bf16 %v4653_v45, %v4650_v15  ;;  %v6161_v45 = vpack.c.bf16 %v4621_v19, %v4618_v61  ;;  %v6165_v61 = vld [vmem:[#allocation30_spill] sm:$0xff] }
 0x33a   : > { %3155 = vmatprep.subr.bf16.mxu1 %v4929_v2  ;;  %v6157_v2 = vpack.c.bf16 %v4669_v4, %v4666_v5  ;;  %v6162_v5 = vpack.c.bf16 %v4599_v33, %v4596_v25  ;;  %v1351_v4 = vpack.c.bf16 %v693_v52, %v4963_v13  ;;  %v6166_v19 = vpack.c.bf16 %v6164_v10, %v6165_v61  ;;  %v6177_v13 = vld [vmem:[#allocation21_spill] sm:$0xff]  ;;  %v366_v61 = vld [vmem:[%s6052_s6 + $0x28] sm:$0xff] }
 0x33b   : > { %v6178_v43 = vpack.c.bf16 %v6176_v44, %v6177_v13  ;;  %v365_v10 = vld [vmem:[%s6052_s6 + $0x20] sm:$0xff] }
 0x33d   : > { %3156 = vmatpush3.bf16.msra.mxu1 %v4931_v35  ;;  %v709_v35 = vpop.f32.mrf.mxu0 }
 0x33e   : > { %1497 = vmatprep.subr.bf16.mxu1 %v6155_v32 }
 0x33f   : > { %v711_v53 = vpop.f32.mrf.mxu0 }
 0x340   : > { %1393 = vmatmul.mubr.bf16.vlgmr.msra.gmra.mxu1 %v1344_v36  ;;  %v6168_v36 = vld [vmem:[#allocation29_spill] sm:$0xff]  ;;  %v1354_v9 = vpack.c.bf16 %v711_v53, %v707_v29 }
 0x341   : > { %1400 = vmatprep.mubr.bf16.mxu1 %v1347_v3  ;;  %1498 = vmatpush1.bf16.msra.mxu1 %v6156_v7  ;;  %v713_v15 = vpop.f32.mrf.mxu0  ;;  %v6169_v25 = vpack.c.bf16 %v6167_v47, %v6168_v36 }
 0x342   : > { %1499 = vmatprep.subr.bf16.mxu1 %v6157_v2  ;;  %v1355_v11 = vpack.c.bf16 %v713_v15, %v709_v35 }
 0x343   : > { %v717_v39 = vpop.f32.mrf.mxu0 }
 0x345   : > { %1500 = vmatpush1.bf16.msra.mxu1 %v6158_v34  ;;  %v719_v33 = vpop.f32.mrf.mxu0 }
 0x346   : > { %1501 = vmatprep.subr.bf16.mxu1 %v6159_v40  ;;  %v364_v40 = vld [vmem:[%s6052_s6 + $0x18] sm:$0xff] }
 0x347   : > { %v721_v55 = vpop.f32.mrf.mxu0 }
 0x348   : > { %1401 = vmatmul.mubr.bf16.gmra.mxu1 %v1346_v58  ;;  %v1356_v60 = vpack.c.bf16 %v721_v55, %v717_v39  ;;  %v363_v58 = vld [vmem:[%s6052_s6 + $0x10] sm:$0xff] }
 0x349   : > { %1408 = vmatprep.mubr.bf16.mxu1 %v1349_v42  ;;  %1502 = vmatpush1.bf16.msra.mxu1 %v6160_v24  ;;  %v723_v63 = vpop.f32.mrf.mxu0 }
 0x34a   : > { %1503 = vmatprep.subr.bf16.mxu1 %v6161_v45  ;;  %v1357_v50 = vpack.c.bf16 %v723_v63, %v719_v33  ;;  %v369_v63 = vld [vmem:[%s6052_s6 + $0x40] sm:$0xff] }
 0x34b   : > { %v727_v52 = vpop.f32.mrf.mxu0 }
 0x34d   : > { %1504 = vmatpush1.bf16.msra.mxu1 %v6162_v5  ;;  %v729_v14 = vpop.f32.mrf.mxu0 }
 0x34e   : > { %1505 = vmatprep.subr.bf16.mxu1 %v6163_v6 }
 0x34f   : > { %v731_v46 = vpop.f32.mrf.mxu0 }
 0x350   : > { %1409 = vmatmul.mubr.bf16.gmra.mxu1 %v1348_v59  ;;  %v1358_v48 = vpack.c.bf16 %v731_v46, %v727_v52 }
 0x351   : > { %1416 = vmatprep.mubr.bf16.mxu1 %v1351_v4  ;;  %1506 = vmatpush1.bf16.msra.mxu1 %v6166_v19  ;;  %v733_v51 = vpop.f32.mrf.mxu0 }
 0x352   : > { %1507 = vmatprep.subr.bf16.mxu1 %v6169_v25  ;;  %v1359_v41 = vpack.c.bf16 %v733_v51, %v729_v14  ;;  %v371_v51 = vld [vmem:[%s6052_s6 + $0x50] sm:$0xff] }
 0x355   : > { %1508 = vmatpush1.bf16.msra.mxu1 %v6172_v16 }
 0x356   : > { %1509 = vmatprep.subr.bf16.mxu1 %v6175_v62 }
 0x358   : > { %1417 = vmatmul.mubr.bf16.gmra.mxu1 %v1350_v56  ;;  %v367_v56 = vld [vmem:[%s6052_s6 + $0x30] sm:$0xff] }
 0x359   : > { %1424 = vmatprep.mubr.bf16.mxu1 %v1353_v8  ;;  %1510 = vmatpush1.bf16.msra.mxu1 %v6178_v43 }
 0x35a   : > { %1511 = vmatprep.subr.bf16.mxu1 %v6181_v28 }
 0x35d   : > { %1512 = vmatpush1.bf16.msra.mxu1 %v6184_v26 }
 0x360   : > { %1425 = vmatmul.mubr.bf16.gmra.mxu1 %v1352_v38 }
 0x361   : > { %1432 = vmatprep.mubr.bf16.mxu1 %v1355_v11 }
 0x368   : > { %1433 = vmatmul.mubr.bf16.gmra.mxu1 %v1354_v9 }
 0x369   : > { %1440 = vmatprep.mubr.bf16.mxu1 %v1357_v50 }
 0x370   : > { %1441 = vmatmul.mubr.bf16.gmra.mxu1 %v1356_v60 }
 0x371   : > { %1448 = vmatprep.mubr.bf16.mxu1 %v1359_v41  ;;  %v372_v41 = vld [vmem:[%s6052_s6 + $0x58] sm:$0xff] }
 0x378   : > { %1449 = vmatmul.mubr.bf16.gmra.mxu1 %v1358_v48 }
 0x379   : > { %1529 = vmatprep.mubr.bf16.mxu1 %v6147_v27 }
 0x400   : > { %v3157_v31 = vpop.f32.mrf.mxu1 }
 0x402   : > { %v3158_v21 = vpop.f32.mrf.mxu1 }
 0x403   : > { %v3159_v17 = vadd.f32 %v3158_v21, %v3157_v31 }
 0x404   : > { %v3160_v57 = vpop.f32.mrf.mxu1 }
 0x405   : > { %v1457_v29 = vmul.f32 %v3159_v17, %v361_v20 }
 0x406   : > { %v3161_v22 = vpop.f32.mrf.mxu1 }
 0x407   : > { %v3162_v3 = vadd.f32 %v3161_v22, %v3160_v57 }
 0x408   : > { %v3163_v32 = vpop.f32.mrf.mxu1 }
 0x409   : > { %v1458_v7 = vmul.f32 %v3162_v3, %v362_v54  ;;  %v373_v3 = vld [vmem:[%s6052_s6 + $0x60] sm:$0xff] }
 0x40a   : > { %v3164_v2 = vpop.f32.mrf.mxu1 }
 0x40b   : > { %v1473_v35 = vpack.c.bf16 %v1458_v7, %v1457_v29  ;;  %v3165_v42 = vadd.f32 %v3164_v2, %v3163_v32  ;;  %v374_v32 = vld [vmem:[%s6052_s6 + $0x68] sm:$0xff] }
 0x40c   : > { %v3166_v34 = vpop.f32.mrf.mxu1 }
 0x40d   : > { %1530 = vmatmul.mubr.bf16.vlgmr.msra.gmra.mxu1 %v1473_v35  ;;  %v1459_v15 = vmul.f32 %v3165_v42, %v363_v58 }
 0x40e   : > { %v3167_v53 = vpop.f32.mrf.mxu1  ;;  %1539 = vmatprep.mubr.bf16.mxu1 %v6147_v27 }
 0x40f   : > { %v3168_v24 = vadd.f32 %v3167_v53, %v3166_v34 }
 0x410   : > { %v3169_v45 = vpop.f32.mrf.mxu1 }
 0x411   : > { %v1460_v5 = vmul.f32 %v3168_v24, %v364_v40  ;;  %v375_v24 = vld [vmem:[%s6052_s6 + $0x70] sm:$0xff] }
 0x412   : > { %v3170_v4 = vpop.f32.mrf.mxu1 }
 0x413   : > { %v1474_v59 = vpack.c.bf16 %v1460_v5, %v1459_v15  ;;  %v3171_v39 = vadd.f32 %v3170_v4, %v3169_v45  ;;  %v376_v45 = vld [vmem:[%s6052_s6 + $0x78] sm:$0xff] }
 0x414   : > { %v3172_v6 = vpop.f32.mrf.mxu1 }
 0x415   : > { %1540 = vmatmul.mubr.bf16.gmra.mxu1 %v1474_v59  ;;  %v1461_v25 = vmul.f32 %v3171_v39, %v365_v10 }
 0x416   : > { %v3173_v19 = vpop.f32.mrf.mxu1  ;;  %1549 = vmatprep.mubr.bf16.mxu1 %v6147_v27 }
 0x417   : > { %v3174_v47 = vadd.f32 %v3173_v19, %v3172_v6 }
 0x418   : > { %v3175_v36 = vpop.f32.mrf.mxu1 }
 0x419   : > { %v1462_v33 = vmul.f32 %v3174_v47, %v366_v61 }
 0x41a   : > { %v3176_v1 = vpop.f32.mrf.mxu1 }
 0x41b   : > { %v1475_v37 = vpack.c.bf16 %v1462_v33, %v1461_v25  ;;  %v3177_v8 = vadd.f32 %v3176_v1, %v3175_v36 }
 0x41c   : > { %v3178_v16 = vpop.f32.mrf.mxu1 }
 0x41d   : > { %1550 = vmatmul.mubr.bf16.gmra.mxu1 %v1475_v37  ;;  %v1463_v44 = vmul.f32 %v3177_v8, %v367_v56 }
 0x41e   : > { %v3179_v18 = vpop.f32.mrf.mxu1  ;;  %1559 = vmatprep.mubr.bf16.mxu1 %v6147_v27 }
 0x41f   : > { %v3180_v62 = vadd.f32 %v3179_v18, %v3178_v16 }
 0x420   : > { %v3181_v55 = vpop.f32.mrf.mxu1 }
 0x421   : > { %v1464_v13 = vmul.f32 %v3180_v62, %v368_v30 }
 0x422   : > { %v3182_v43 = vpop.f32.mrf.mxu1 }
 0x423   : > { %v1476_v49 = vpack.c.bf16 %v1464_v13, %v1463_v44  ;;  %v3183_v28 = vadd.f32 %v3182_v43, %v3181_v55 }
 0x424   : > { %v3184_v12 = vpop.f32.mrf.mxu1 }
 0x425   : > { %1560 = vmatmul.mubr.bf16.gmra.mxu1 %v1476_v49  ;;  %v1465_v38 = vmul.f32 %v3183_v28, %v369_v63 }
 0x426   : > { %v3185_v23 = vpop.f32.mrf.mxu1  ;;  %1569 = vmatprep.mubr.bf16.mxu1 %v6147_v27 }
 0x427   : > { %v3186_v26 = vadd.f32 %v3185_v23, %v3184_v12 }
 0x428   : > { %v3187_v11 = vpop.f32.mrf.mxu1 }
 0x429   : > { %v1466_v52 = vmul.f32 %v3186_v26, %v370_v0 }
 0x42a   : > { %v3188_v14 = vpop.f32.mrf.mxu1 }
 0x42b   : > { %v1477_v50 = vpack.c.bf16 %v1466_v52, %v1465_v38  ;;  %v3189_v46 = vadd.f32 %v3188_v14, %v3187_v11 }
 0x42c   : > { %v3190_v9 = vpop.f32.mrf.mxu1 }
 0x42d   : > { %1570 = vmatmul.mubr.bf16.gmra.mxu1 %v1477_v50  ;;  %v1467_v21 = vmul.f32 %v3189_v46, %v371_v51 }
 0x42e   : > { %v3191_v60 = vpop.f32.mrf.mxu1  ;;  %1579 = vmatprep.mubr.bf16.mxu1 %v6147_v27 }
 0x42f   : > { %v3192_v48 = vadd.f32 %v3191_v60, %v3190_v9 }
 0x430   : > { %v3193_v31 = vpop.f32.mrf.mxu1 }
 0x431   : > { %v1468_v57 = vmul.f32 %v3192_v48, %v372_v41 }
 0x432   : > { %v3194_v17 = vpop.f32.mrf.mxu1 }
 0x433   : > { %v1478_v20 = vpack.c.bf16 %v1468_v57, %v1467_v21  ;;  %v3195_v22 = vadd.f32 %v3194_v17, %v3193_v31 }
 0x434   : > { %v3196_v54 = vpop.f32.mrf.mxu1 }
 0x435   : > { %1580 = vmatmul.mubr.bf16.gmra.mxu1 %v1478_v20  ;;  %v1469_v35 = vmul.f32 %v3195_v22, %v373_v3  ;;  %v3105_v3 = vld [vmem:[%s4082_s17 + $0x8] sm:$0xff] }
 0x436   : > { %v3197_v29 = vpop.f32.mrf.mxu1  ;;  %1589 = vmatprep.mubr.bf16.mxu1 %v6147_v27 }
 0x437   : > { %v3198_v7 = vadd.f32 %v3197_v29, %v3196_v54 }
 0x438   : > { %v3199_v2 = vpop.f32.mrf.mxu1 }
 0x439   : > { %v1470_v34 = vmul.f32 %v3198_v7, %v374_v32  ;;  %v1733_v7 = vcombine.high %v3105_v3, %v3105_v3 }
 0x43a   : > { %v3200_v42 = vpop.f32.mrf.mxu1 }
 0x43b   : > { %v1479_v58 = vpack.c.bf16 %v1470_v34, %v1469_v35  ;;  %v3201_v53 = vadd.f32 %v3200_v42, %v3199_v2  ;;  %v356_v35 = vld [vmem:[%s6048_s2] sm:$0xf]  ;;  %v1736_v34 = vpack.c.bf16 %v1733_v7, %v1733_v7  ;;  %v1735_v42 = vpack.c.bf16 %v3105_v3, %v3105_v3 }
 0x43c   : > { %v3202_v40 = vpop.f32.mrf.mxu1 }
 0x43d   : > { %1590 = vmatmul.mubr.bf16.gmra.mxu1 %v1479_v58  ;;  %v1471_v4 = vmul.f32 %v3201_v53, %v375_v24  ;;  %v5111_v58 = vpack.c.bf16 %v356_v35, %v356_v35  ;;  %v6186_v53 = vld [vmem:[#allocation5_spill] sm:$0xff]  ;;  %v6187_v24 = vld [vmem:[#allocation6_spill] sm:$0xff] }
 0x43e   : > { %v3203_v15 = vpop.f32.mrf.mxu1  ;;  %1599 = vmatprep.mubr.bf16.mxu1 %v6147_v27 }
 0x43f   : > { %v3204_v5 = vadd.f32 %v3203_v15, %v3202_v40  ;;  %6185 = vst [vmem:[#allocation31_spill] sm:$0xff] %v5111_v58  ;;  %v1738_v40 = vsel %vm456_vm0, %v1735_v42, 0  ;;  %v6189_v15 = vld [vmem:[#allocation8_spill] sm:$0xff] }
 0x441   : > { %v1472_v59 = vmul.f32 %v3204_v5, %v376_v45  ;;  %v6188_v45 = vld [vmem:[#allocation7_spill] sm:$0xff]  ;;  %v6190_v5 = vld [vmem:[#allocation9_spill] sm:$0xff] }
 0x443   : > { %v1480_v6 = vpack.c.bf16 %v1472_v59, %v1471_v4  ;;  %v6191_v4 = vld [vmem:[#allocation10_spill] sm:$0xff]  ;;  %v6192_v59 = vld [vmem:[#allocation11_spill] sm:$0xff] }
 0x445   : > { %1600 = vmatmul.mubr.bf16.gmra.mxu1 %v1480_v6  ;;  %v6193_v6 = vld [vmem:[#allocation12_spill] sm:$0xff] }
 0x446   : > { %1663 = vmatprep.mubr.bf16.mxu1 %v6147_v27 }
 0x4cd   : > { %v5098_v39 = vpop.f32.mrf.mxu1 }
 0x4cf   : > { %v5100_v10 = vpop.f32.mrf.mxu1 }
 0x4d1   : > { %v5102_v61 = vpop.f32.mrf.mxu1 }
 0x4d2   : > { %v1610_v19 = vpack.c.bf16 %v5102_v61, %v5098_v39  ;;  %v6194_v39 = vld [vmem:[#allocation13_spill] sm:$0xff]  ;;  %v6196_v61 = vld [vmem:[#allocation15_spill] sm:$0xff] }
 0x4d3   : > { %v1537_v47 = vpop.f32.mrf.mxu1 }
 0x4d4   : > { %v1611_v2 = vpack.c.bf16 %v1537_v47, %v5100_v10  ;;  %v6195_v10 = vld [vmem:[#allocation14_spill] sm:$0xff]  ;;  %v6198_v47 = vld [vmem:[#allocation17_spill] sm:$0xff] }
 0x4d5   : > { %v1541_v36 = vpop.f32.mrf.mxu1 }
 0x4d7   : > { %v1543_v25 = vpop.f32.mrf.mxu1 }
 0x4d9   : > { %v1545_v33 = vpop.f32.mrf.mxu1 }
 0x4da   : > { %v1612_v1 = vpack.c.bf16 %v1545_v33, %v1541_v36  ;;  %v6199_v36 = vld [vmem:[#allocation18_spill] sm:$0xff]  ;;  %v6201_v33 = vld [vmem:[#allocation20_spill] sm:$0xff] }
 0x4db   : > { %v1547_v37 = vpop.f32.mrf.mxu1 }
 0x4dc   : > { %v1613_v29 = vpack.c.bf16 %v1547_v37, %v1543_v25  ;;  %v6200_v25 = vld [vmem:[#allocation19_spill] sm:$0xff]  ;;  %v6203_v37 = vld [vmem:[#allocation36_spill] sm:$0xff] }
 0x4dd   : > { %v1551_v16 = vpop.f32.mrf.mxu1 }
 0x4df   : > { %v1553_v8 = vpop.f32.mrf.mxu1 }
 0x4e1   : > { %v1555_v56 = vpop.f32.mrf.mxu1 }
 0x4e2   : > { %v1614_v32 = vpack.c.bf16 %v1555_v56, %v1551_v16  ;;  %v6204_v16 = vld [vmem:[#allocation37_spill] sm:$0xff]  ;;  %v6206_v56 = vld [vmem:[#allocation39_spill] sm:$0xff] }
 0x4e3   : > { %v1557_v30 = vpop.f32.mrf.mxu1 }
 0x4e4   : > { %v1615_v22 = vpack.c.bf16 %v1557_v30, %v1553_v8  ;;  %v6205_v8 = vld [vmem:[#allocation38_spill] sm:$0xff]  ;;  %v6207_v30 = vld [vmem:[#allocation40_spill] sm:$0xff] }
 0x4e5   : > { %v1561_v18 = vpop.f32.mrf.mxu1 }
 0x4e7   : > { %v1563_v62 = vpop.f32.mrf.mxu1 }
 0x4e9   : > { %v1565_v55 = vpop.f32.mrf.mxu1 }
 0x4ea   : > { %v1616_v54 = vpack.c.bf16 %v1565_v55, %v1561_v18  ;;  %v6208_v18 = vld [vmem:[#allocation41_spill] sm:$0xff]  ;;  %v6209_v55 = vld [vmem:[#allocation42_spill] sm:$0xff] }
 0x4eb   : > { %v1567_v44 = vpop.f32.mrf.mxu1 }
 0x4ec   : > { %v1617_v20 = vpack.c.bf16 %v1567_v44, %v1563_v62 }
 0x4ed   : > { %v1571_v13 = vpop.f32.mrf.mxu1 }
 0x4ef   : > { %v1573_v43 = vpop.f32.mrf.mxu1 }
 0x4f1   : > { %v1575_v49 = vpop.f32.mrf.mxu1 }
 0x4f2   : > { %v1618_v17 = vpack.c.bf16 %v1575_v49, %v1571_v13 }
 0x4f3   : > { %v1577_v12 = vpop.f32.mrf.mxu1 }
 0x4f4   : > { %v1619_v57 = vpack.c.bf16 %v1577_v12, %v1573_v43 }
 0x4f5   : > { %v1581_v28 = vpop.f32.mrf.mxu1 }
 0x4f7   : > { %v1583_v63 = vpop.f32.mrf.mxu1 }
 0x4f9   : > { %v1585_v0 = vpop.f32.mrf.mxu1 }
 0x4fa   : > { %v1620_v21 = vpack.c.bf16 %v1585_v0, %v1581_v28 }
 0x4fb   : > { %v1587_v23 = vpop.f32.mrf.mxu1 }
 0x4fc   : > { %v1621_v31 = vpack.c.bf16 %v1587_v23, %v1583_v63 }
 0x4fd   : > { %v1591_v26 = vpop.f32.mrf.mxu1 }
 0x4ff   : > { %v1593_v11 = vpop.f32.mrf.mxu1 }
 0x501   : > { %v1595_v38 = vpop.f32.mrf.mxu1 }
 0x502   : > { %v1622_v48 = vpack.c.bf16 %v1595_v38, %v1591_v26 }
 0x503   : > { %v1597_v52 = vpop.f32.mrf.mxu1 }
 0x504   : > { %v1623_v60 = vpack.c.bf16 %v1597_v52, %v1593_v11 }
 0x505   : > { %v1601_v14 = vpop.f32.mrf.mxu1 }
 0x507   : > { %v1603_v50 = vpop.f32.mrf.mxu1 }
 0x509   : > { %v1605_v9 = vpop.f32.mrf.mxu1 }
 0x50a   : > { %v1624_v41 = vpack.c.bf16 %v1605_v9, %v1601_v14 }
 0x50b   : > { %v1607_v46 = vpop.f32.mrf.mxu1 }
 0x50c   : > { %v1625_v51 = vpack.c.bf16 %v1607_v46, %v1603_v50 }
 0x50e   : > { %1631 = vmatprep.subr.bf16.mxu1 %v1625_v51 }
 0x50f   : > { %1632 = vmatpush1.bf16.msra.mxu1 %v1624_v41 }
 0x510   : > { %1633 = vmatprep.subr.bf16.mxu1 %v1623_v60 }
 0x513   : > { %1634 = vmatpush1.bf16.msra.mxu1 %v1622_v48 }
 0x514   : > { %1635 = vmatprep.subr.bf16.mxu1 %v1621_v31 }
 0x517   : > { %1636 = vmatpush1.bf16.msra.mxu1 %v1620_v21 }
 0x518   : > { %1637 = vmatprep.subr.bf16.mxu1 %v1619_v57 }
 0x51b   : > { %1638 = vmatpush1.bf16.msra.mxu1 %v1618_v17 }
 0x51c   : > { %1639 = vmatprep.subr.bf16.mxu1 %v1617_v20 }
 0x51f   : > { %1640 = vmatpush1.bf16.msra.mxu1 %v1616_v54 }
 0x520   : > { %1641 = vmatprep.subr.bf16.mxu1 %v1615_v22 }
 0x523   : > { %1642 = vmatpush1.bf16.msra.mxu1 %v1614_v32 }
 0x524   : > { %1643 = vmatprep.subr.bf16.mxu1 %v1613_v29 }
 0x527   : > { %1644 = vmatpush1.bf16.msra.mxu1 %v1612_v1  ;;  %v6202_v1 = vld [vmem:[#allocation35_spill] sm:$0xff] }
 0x528   : > { %1645 = vmatprep.subr.bf16.mxu1 %v1611_v2 }
 0x52b   : > { %1646 = vmatpush1.bf16.msra.mxu1 %v1610_v19  ;;  %v6197_v19 = vld [vmem:[#allocation16_spill] sm:$0xff] }
 0x52c   : > { %3106 = vmatprep.subr.msk.bf16.mxu1 %vm456_vm0, %v1736_v34 }
 0x52e   : > { %1664 = vmatmul.mubr.bf16.vlgmr.msra.gmra.mxu1 %v5111_v58 }
 0x52f   : > { %1758 = vmatpush1.bf16.msra.mxu1 %v1738_v40  ;;  %1775 = vmatprep.mubr.bf16.mxu1 %v6147_v27 }
 0x536   : > { %3107 = vmatmul.mubr.msk.bf16.vlgmr.msra.gmra.mxu1 %vm383_vm1, %v6186_v53 }
 0x537   : > { %1785 = vmatprep.mubr.bf16.mxu1 %v6147_v27 }
 0x53e   : > { %3108 = vmatmul.mubr.msk.bf16.gmra.mxu1 %vm383_vm1, %v6187_v24 }
 0x53f   : > { %1795 = vmatprep.mubr.bf16.mxu1 %v6147_v27 }
 0x546   : > { %3109 = vmatmul.mubr.msk.bf16.gmra.mxu1 %vm383_vm1, %v6188_v45 }
 0x547   : > { %1805 = vmatprep.mubr.bf16.mxu1 %v6147_v27 }
 0x54e   : > { %3110 = vmatmul.mubr.msk.bf16.gmra.mxu1 %vm383_vm1, %v6189_v15 }
 0x54f   : > { %1815 = vmatprep.mubr.bf16.mxu1 %v6147_v27 }
 0x556   : > { %3111 = vmatmul.mubr.msk.bf16.gmra.mxu1 %vm383_vm1, %v6190_v5 }
 0x557   : > { %1825 = vmatprep.mubr.bf16.mxu1 %v6147_v27 }
 0x55e   : > { %3112 = vmatmul.mubr.msk.bf16.gmra.mxu1 %vm383_vm1, %v6191_v4 }
 0x55f   : > { %1835 = vmatprep.mubr.bf16.mxu1 %v6147_v27 }
 0x566   : > { %3113 = vmatmul.mubr.msk.bf16.gmra.mxu1 %vm383_vm1, %v6192_v59 }
 0x567   : > { %1845 = vmatprep.mubr.bf16.mxu1 %v6147_v27 }
 0x56e   : > { %3114 = vmatmul.mubr.msk.bf16.gmra.mxu1 %vm383_vm1, %v6193_v6 }
 0x56f   : > { %1855 = vmatprep.mubr.bf16.mxu1 %v6147_v27 }
 0x576   : > { %3115 = vmatmul.mubr.msk.bf16.gmra.mxu1 %vm383_vm1, %v6194_v39 }
 0x577   : > { %1865 = vmatprep.mubr.bf16.mxu1 %v6147_v27 }
 0x57e   : > { %3116 = vmatmul.mubr.msk.bf16.gmra.mxu1 %vm383_vm1, %v6195_v10 }
 0x57f   : > { %1875 = vmatprep.mubr.bf16.mxu1 %v6147_v27 }
 0x586   : > { %3117 = vmatmul.mubr.msk.bf16.gmra.mxu1 %vm383_vm1, %v6196_v61 }
 0x587   : > { %1885 = vmatprep.mubr.bf16.mxu1 %v6147_v27 }
 0x58e   : > { %3118 = vmatmul.mubr.msk.bf16.gmra.mxu1 %vm383_vm1, %v6197_v19 }
 0x58f   : > { %1895 = vmatprep.mubr.bf16.mxu1 %v6147_v27 }
 0x596   : > { %3119 = vmatmul.mubr.msk.bf16.gmra.mxu1 %vm383_vm1, %v6198_v47 }
 0x597   : > { %1905 = vmatprep.mubr.bf16.mxu1 %v6147_v27 }
 0x59e   : > { %3120 = vmatmul.mubr.msk.bf16.gmra.mxu1 %vm383_vm1, %v6199_v36 }
 0x59f   : > { %1915 = vmatprep.mubr.bf16.mxu1 %v6147_v27 }
 0x5a6   : > { %3121 = vmatmul.mubr.msk.bf16.gmra.mxu1 %vm383_vm1, %v6200_v25 }
 0x5a7   : > { %1925 = vmatprep.mubr.bf16.mxu1 %v6147_v27 }
 0x5ae   : > { %3122 = vmatmul.mubr.msk.bf16.gmra.mxu1 %vm383_vm1, %v6201_v33 }
 0x5af   : > { %1935 = vmatprep.mubr.bf16.mxu1 %v6147_v27 }
 0x5b6   : > { %3123 = vmatmul.mubr.msk.bf16.gmra.mxu1 %vm383_vm1, %v6202_v1 }
 0x5b7   : > { %1945 = vmatprep.mubr.bf16.mxu1 %v6147_v27 }
 0x5be   : > { %3124 = vmatmul.mubr.msk.bf16.gmra.mxu1 %vm383_vm1, %v6203_v37 }
 0x5bf   : > { %1955 = vmatprep.mubr.bf16.mxu1 %v6147_v27 }
 0x5c6   : > { %3125 = vmatmul.mubr.msk.bf16.gmra.mxu1 %vm383_vm1, %v6204_v16 }
 0x5c7   : > { %1965 = vmatprep.mubr.bf16.mxu1 %v6147_v27 }
 0x5ce   : > { %3126 = vmatmul.mubr.msk.bf16.gmra.mxu1 %vm383_vm1, %v6205_v8 }
 0x5cf   : > { %1975 = vmatprep.mubr.bf16.mxu1 %v6147_v27 }
 0x5d6   : > { %3127 = vmatmul.mubr.msk.bf16.gmra.mxu1 %vm383_vm1, %v6206_v56 }
 0x5d7   : > { %1985 = vmatprep.mubr.bf16.mxu1 %v6147_v27 }
 0x5de   : > { %3128 = vmatmul.mubr.msk.bf16.gmra.mxu1 %vm383_vm1, %v6207_v30 }
 0x5df   : > { %1995 = vmatprep.mubr.bf16.mxu1 %v6147_v27 }
 0x5e6   : > { %3129 = vmatmul.mubr.msk.bf16.gmra.mxu1 %vm383_vm1, %v6208_v18 }
 0x5e7   : > { %2005 = vmatprep.mubr.bf16.mxu1 %v6147_v27 }
 0x5ee   : > { %v5189_v62 = vpop.f32.mrf.mxu1  ;;  %3130 = vmatmul.mubr.msk.bf16.gmra.mxu1 %vm383_vm1, %v6209_v55 }
 0x5f0   : > { %v5193_v44 = vpop.f32.mrf.mxu1 }
 0x5f2   : > { %v1669_v13 = vpop.f32.mrf.mxu1 }
 0x5f4   : > { %v1670_v43 = vpop.f32.mrf.mxu1 }
 0x5f6   : > { %v1777_v49 = vpop.f32.mrf.mxu1 }
 0x5f8   : > { %v1779_v12 = vpop.f32.mrf.mxu1 }
 0x5fa   : > { %v1781_v28 = vpop.f32.mrf.mxu1 }
 0x5fb   : > { %v2016_v63 = vmax.f32 %v1777_v49, %v1781_v28 }
 0x5fc   : > { %v1783_v0 = vpop.f32.mrf.mxu1 }
 0x5fd   : > { %v2025_v23 = vmax.f32 %v1779_v12, %v1783_v0 }
 0x5fe   : > { %v1787_v26 = vpop.f32.mrf.mxu1 }
 0x5ff   : > { %v2017_v11 = vmax.f32 %v2016_v63, %v1787_v26 }
 0x600   : > { %v1789_v38 = vpop.f32.mrf.mxu1 }
 0x601   : > { %v2026_v52 = vmax.f32 %v2025_v23, %v1789_v38 }
 0x602   : > { %v1791_v14 = vpop.f32.mrf.mxu1 }
 0x603   : > { %v2018_v50 = vmax.f32 %v2017_v11, %v1791_v14 }
 0x604   : > { %v1793_v9 = vpop.f32.mrf.mxu1 }
 0x605   : > { %v2019_v46 = vrot.slane %v2018_v50, 4  ;;  %v2027_v51 = vmax.f32 %v2026_v52, %v1793_v9 }
 0x606   : > { %v5195_v41 = vpop.f32.mrf.mxu1 }
 0x607   : > { %v2020_v60 = vmax.f32 %v2018_v50, %v2019_v46  ;;  %v2028_v48 = vrot.slane %v2027_v51, 4 }
 0x608   : > { %v5197_v31 = vpop.f32.mrf.mxu1 }
 0x609   : > { %v2021_v21 = vrot.slane %v2020_v60, 2  ;;  %v2029_v57 = vmax.f32 %v2027_v51, %v2028_v48 }
 0x60a   : > { %v5199_v17 = vpop.f32.mrf.mxu1 }
 0x60b   : > { %v2022_v20 = vmax.f32 %v2020_v60, %v2021_v21  ;;  %v2030_v54 = vrot.slane %v2029_v57, 2  ;;  %v2034_v22 = vmax.f32 %v5195_v41, %v5199_v17 }
 0x60c   : > { %v5203_v3 = vpop.f32.mrf.mxu1 }
 0x60d   : > { %v2023_v32 = vrot.slane %v2022_v20, 1  ;;  %v2031_v29 = vmax.f32 %v2029_v57, %v2030_v54  ;;  %v2043_v7 = vmax.f32 %v5197_v31, %v5203_v3 }
 0x60e   : > { %v5207_v2 = vpop.f32.mrf.mxu1 }
 0x60f   : > { %v2024_v35 = vmax.f32 %v2022_v20, %v2023_v32  ;;  %v2032_v34 = vrot.slane %v2031_v29, 1  ;;  %v2035_v42 = vmax.f32 %v2034_v22, %v5207_v2 }
 0x610   : > { %v5210_v40 = vpop.f32.mrf.mxu1 }
 0x611   : > { %v2088_v53 = vsub.f32 %v1777_v49, %v2024_v35  ;;  %v2090_v24 = vsub.f32 %v1781_v28, %v2024_v35  ;;  %v2092_v45 = vsub.f32 %v1787_v26, %v2024_v35  ;;  %v2094_v15 = vsub.f32 %v1791_v14, %v2024_v35 }
 0x612   : > { %v2033_v5 = vmax.f32 %v2031_v29, %v2032_v34  ;;  %v2044_v4 = vmax.f32 %v2043_v7, %v5210_v40  ;;  %v1811_v59 = vpop.f32.mrf.mxu1 }
 0x613   : > { %v2120_v6 = vmul.f32 1.442695, %v2088_v53  ;;  %v2124_v39 = vmul.f32 1.442695, %v2090_v24  ;;  %v2128_v10 = vmul.f32 1.442695, %v2092_v45  ;;  %v2036_v61 = vmax.f32 %v2035_v42, %v1811_v59 }
 0x614   : > { %v2132_v19 = vmul.f32 1.442695, %v2094_v15  ;;  %v2089_v47 = vsub.f32 %v1779_v12, %v2033_v5  ;;  %v2091_v36 = vsub.f32 %v1783_v0, %v2033_v5  ;;  %v2093_v25 = vsub.f32 %v1789_v38, %v2033_v5  ;;  %v5213_v33 = vpop.f32.mrf.mxu1 }
 0x615   : > { %3727 = vpow2.f32 %v2120_v6  ;;  %v2095_v1 = vsub.f32 %v1793_v9, %v2033_v5  ;;  %v2037_v37 = vrot.slane %v2036_v61, 4  ;;  %v2045_v16 = vmax.f32 %v2044_v4, %v5213_v33 }
 0x616   : > { %3729 = vpow2.f32 %v2124_v39  ;;  %v2122_v8 = vmul.f32 1.442695, %v2089_v47  ;;  %v2126_v56 = vmul.f32 1.442695, %v2091_v36  ;;  %v5216_v30 = vpop.f32.mrf.mxu1  ;;  %v2130_v13 = vmul.f32 1.442695, %v2093_v25 }
 0x617   : > { %3731 = vpow2.f32 %v2128_v10  ;;  %v2038_v18 = vmax.f32 %v2036_v61, %v2037_v37  ;;  %v2046_v55 = vrot.slane %v2045_v16, 4  ;;  %v2134_v28 = vmul.f32 1.442695, %v2095_v1 }
 0x618   : > { %3733 = vpow2.f32 %v2132_v19  ;;  %v5218_v43 = vpop.f32.mrf.mxu1 }
 0x619   : > { %3735 = vpow2.f32 %v2122_v8  ;;  %v2039_v49 = vrot.slane %v2038_v18, 2  ;;  %v2047_v12 = vmax.f32 %v2045_v16, %v2046_v55 }
 0x61a   : > { %3737 = vpow2.f32 %v2126_v56  ;;  %v5220_v63 = vpop.f32.mrf.mxu1 }
 0x61b   : > { %v2040_v0 = vmax.f32 %v2038_v18, %v2039_v49  ;;  %v2048_v23 = vrot.slane %v2047_v12, 2  ;;  %v2052_v26 = vmax.f32 %v5216_v30, %v5220_v63  ;;  %3739 = vpow2.f32 %v2130_v13 }
 0x61c   : > { %v5224_v11 = vpop.f32.mrf.mxu1  ;;  %3741 = vpow2.f32 %v2134_v28 }
 0x61d   : > { %v2041_v38 = vrot.slane %v2040_v0, 1  ;;  %v2049_v52 = vmax.f32 %v2047_v12, %v2048_v23  ;;  %v2061_v14 = vmax.f32 %v5218_v43, %v5224_v11 }
 0x61e   : > { %v5228_v50 = vpop.f32.mrf.mxu1 }
 0x61f   : > { %v2042_v9 = vmax.f32 %v2040_v0, %v2041_v38  ;;  %v2050_v46 = vrot.slane %v2049_v52, 1  ;;  %v2053_v51 = vmax.f32 %v2052_v26, %v5228_v50 }
 0x620   : > { %v5231_v60 = vpop.f32.mrf.mxu1 }
 0x621   : > { %v2096_v48 = vsub.f32 %v5195_v41, %v2042_v9  ;;  %v2098_v21 = vsub.f32 %v5199_v17, %v2042_v9  ;;  %v2100_v57 = vsub.f32 %v5207_v2, %v2042_v9  ;;  %v2102_v20 = vsub.f32 %v1811_v59, %v2042_v9 }
 0x622   : > { %v5236_v54 = vpop.eup %3727  ;;  %v2051_v22 = vmax.f32 %v2049_v52, %v2050_v46  ;;  %v2062_v32 = vmax.f32 %v2061_v14, %v5231_v60  ;;  %v5239_v29 = vpop.f32.mrf.mxu1 }
 0x623   : > { %v5241_v7 = vpop.eup %3729  ;;  %v2136_v35 = vmul.f32 1.442695, %v2096_v48  ;;  %v2140_v34 = vmul.f32 1.442695, %v2098_v21  ;;  %v2144_v42 = vmul.f32 1.442695, %v2100_v57  ;;  %v2054_v53 = vmax.f32 %v2053_v51, %v5239_v29 }
 0x624   : > { %v5244_v41 = vpop.eup %3731  ;;  %v2184_v17 = vadd.f32 %v5241_v7, %v5236_v54  ;;  %v2148_v2 = vmul.f32 1.442695, %v2102_v20  ;;  %v2097_v24 = vsub.f32 %v5197_v31, %v2051_v22  ;;  %v2099_v45 = vsub.f32 %v5203_v3, %v2051_v22  ;;  %v5250_v15 = vpop.f32.mrf.mxu1 }
 0x625   : > { %v5252_v5 = vpop.eup %3733  ;;  %3743 = vpow2.f32 %v2136_v35  ;;  %v2101_v4 = vsub.f32 %v5210_v40, %v2051_v22  ;;  %v2103_v59 = vsub.f32 %v5213_v33, %v2051_v22  ;;  %v2055_v6 = vrot.slane %v2054_v53, 4 }
 0x626   : > { %v5256_v39 = vpop.eup %3735  ;;  %v2185_v10 = vadd.f32 %v5244_v41, %v2184_v17  ;;  %3745 = vpow2.f32 %v2140_v34  ;;  %v2138_v61 = vmul.f32 1.442695, %v2097_v24  ;;  %v2142_v19 = vmul.f32 1.442695, %v2099_v45  ;;  %v5259_v31 = vpop.f32.mrf.mxu1 }
 0x627   : > { %v5261_v3 = vpop.eup %3737  ;;  %3747 = vpow2.f32 %v2144_v42  ;;  %v2146_v47 = vmul.f32 1.442695, %v2101_v4  ;;  %v2056_v36 = vmax.f32 %v2054_v53, %v2055_v6  ;;  %v2063_v33 = vmax.f32 %v2062_v32, %v5250_v15 }
 0x628   : > { %v2186_v25 = vadd.f32 %v5252_v5, %v2185_v10  ;;  %v2193_v40 = vadd.f32 %v5261_v3, %v5256_v39  ;;  %3749 = vpow2.f32 %v2148_v2  ;;  %v5267_v1 = vpop.f32.mrf.mxu1  ;;  %v5269_v37 = vpop.eup %3739  ;;  %v2150_v16 = vmul.f32 1.442695, %v2103_v59 }
 0x629   : > { %3751 = vpow2.f32 %v2138_v61  ;;  %v2057_v8 = vrot.slane %v2056_v36, 2  ;;  %v2064_v55 = vrot.slane %v2063_v33, 4  ;;  %v5274_v49 = vpop.eup %3741 }
 0x62a   : > { %v2187_v56 = vrot.slane %v2186_v25, 4  ;;  %v2194_v18 = vadd.f32 %v5269_v37, %v2193_v40  ;;  %3753 = vpow2.f32 %v2142_v19  ;;  %v5272_v13 = vpop.f32.mrf.mxu1 }
 0x62b   : > { %v2058_v12 = vmax.f32 %v2056_v36, %v2057_v8  ;;  %v2070_v28 = vmax.f32 %v5259_v31, %v5272_v13  ;;  %3755 = vpow2.f32 %v2146_v47  ;;  %v2065_v26 = vmax.f32 %v2063_v33, %v2064_v55 }
 0x62c   : > { %v2188_v0 = vadd.f32 %v2187_v56, %v2186_v25  ;;  %v2195_v23 = vadd.f32 %v5274_v49, %v2194_v18  ;;  %v5279_v38 = vpop.f32.mrf.mxu1  ;;  %3757 = vpow2.f32 %v2150_v16 }
 0x62d   : > { %v2059_v52 = vrot.slane %v2058_v12, 1  ;;  %v2079_v14 = vmax.f32 %v5267_v1, %v5279_v38  ;;  %v2066_v51 = vrot.slane %v2065_v26, 2 }
 0x62e   : > { %v2189_v9 = vrot.slane %v2188_v0, 2  ;;  %v2196_v46 = vrot.slane %v2195_v23, 4  ;;  %v5283_v48 = vpop.f32.mrf.mxu1 }
 0x62f   : > { %v2060_v21 = vmax.f32 %v2058_v12, %v2059_v52  ;;  %v2071_v57 = vmax.f32 %v2070_v28, %v5283_v48  ;;  %v2067_v32 = vmax.f32 %v2065_v26, %v2066_v51 }
 0x630   : > { %v2190_v20 = vadd.f32 %v2189_v9, %v2188_v0  ;;  %v2197_v22 = vadd.f32 %v2196_v46, %v2195_v23  ;;  %v5286_v35 = vpop.f32.mrf.mxu1 }
 0x631   : > { %v2104_v34 = vsub.f32 %v5216_v30, %v2060_v21  ;;  %v2106_v42 = vsub.f32 %v5220_v63, %v2060_v21  ;;  %v2108_v53 = vsub.f32 %v5228_v50, %v2060_v21  ;;  %v2110_v17 = vsub.f32 %v5239_v29, %v2060_v21 }
 0x632   : > { %v5292_v2 = vpop.eup %3743  ;;  %v2191_v24 = vrot.slane %v2190_v20, 1  ;;  %v2198_v45 = vrot.slane %v2197_v22, 2  ;;  %v2068_v4 = vrot.slane %v2067_v32, 1  ;;  %v2080_v59 = vmax.f32 %v2079_v14, %v5286_v35  ;;  %v5295_v6 = vpop.f32.mrf.mxu1 }
 0x633   : > { %v5297_v10 = vpop.eup %3745  ;;  %v2152_v61 = vmul.f32 1.442695, %v2104_v34  ;;  %v2156_v19 = vmul.f32 1.442695, %v2106_v42  ;;  %v2160_v30 = vmul.f32 1.442695, %v2108_v53  ;;  %v2072_v63 = vmax.f32 %v2071_v57, %v5295_v6 }
 0x634   : > { %v5300_v47 = vpop.eup %3747  ;;  %v2202_v50 = vadd.f32 %v5297_v10, %v5292_v2  ;;  %v2164_v29 = vmul.f32 1.442695, %v2110_v17  ;;  %v2069_v36 = vmax.f32 %v2067_v32, %v2068_v4  ;;  %v5304_v25 = vpop.f32.mrf.mxu1  ;;  %v2199_v40 = vadd.f32 %v2198_v45, %v2197_v22 }
 0x635   : > { %v5306_v33 = vpop.eup %3749  ;;  %3759 = vpow2.f32 %v2152_v61  ;;  %v2073_v16 = vrot.slane %v2072_v63, 4  ;;  %v2081_v8 = vmax.f32 %v2080_v59, %v5304_v25  ;;  %v2192_v56 = vadd.f32 %v2191_v24, %v2190_v20 }
 0x636   : > { %v5309_v18 = vpop.eup %3751  ;;  %v2203_v55 = vadd.f32 %v5300_v47, %v2202_v50  ;;  %3761 = vpow2.f32 %v2156_v19  ;;  %v2105_v12 = vsub.f32 %v5218_v43, %v2069_v36  ;;  %v2107_v28 = vsub.f32 %v5224_v11, %v2069_v36  ;;  %v5314_v0 = vpop.f32.mrf.mxu1 }
 0x637   : > { %v5316_v23 = vpop.eup %3753  ;;  %3763 = vpow2.f32 %v2160_v30  ;;  %v2109_v26 = vsub.f32 %v5231_v60, %v2069_v36  ;;  %v2111_v52 = vsub.f32 %v5250_v15, %v2069_v36  ;;  %v2074_v14 = vmax.f32 %v2072_v63, %v2073_v16 }
 0x638   : > { %v2204_v9 = vadd.f32 %v5306_v33, %v2203_v55  ;;  %v2211_v46 = vadd.f32 %v5316_v23, %v5309_v18  ;;  %3765 = vpow2.f32 %v2164_v29  ;;  %v2154_v51 = vmul.f32 1.442695, %v2105_v12  ;;  %v5323_v43 = vpop.f32.mrf.mxu1  ;;  %v5325_v11 = vpop.eup %3755 }
 0x639   : > { %v2158_v21 = vmul.f32 1.442695, %v2107_v28  ;;  %v2162_v57 = vmul.f32 1.442695, %v2109_v26  ;;  %v2166_v20 = vmul.f32 1.442695, %v2111_v52  ;;  %v2304_v60 = vmax.f32 %v5314_v0, %v5323_v43  ;;  %v5332_v42 = vpop.eup %3757 }
 0x63a   : > { %v2205_v22 = vrot.slane %v2204_v9, 4  ;;  %v2212_v15 = vadd.f32 %v5325_v11, %v2211_v46  ;;  %3767 = vpow2.f32 %v2154_v51  ;;  %v2075_v32 = vrot.slane %v2074_v14, 2  ;;  %v5330_v34 = vpop.f32.mrf.mxu1 }
 0x63b   : > { %3769 = vpow2.f32 %v2158_v21  ;;  %v2082_v53 = vrot.slane %v2081_v8, 4  ;;  %2305 = vmax.xlane.f32.xlu1 %v2304_v60  ;;  %v2200_v17 = vrot.slane %v2199_v40, 1 }
 0x63c   : > { %v2206_v24 = vadd.f32 %v2205_v22, %v2204_v9  ;;  %v2213_v45 = vadd.f32 %v5332_v42, %v2212_v15  ;;  %3771 = vpow2.f32 %v2162_v57  ;;  %v2076_v4 = vmax.f32 %v2074_v14, %v2075_v32  ;;  %v5335_v59 = vpop.f32.mrf.mxu1 }
 0x63d   : > { %3773 = vpow2.f32 %v2166_v20  ;;  %v2083_v61 = vmax.f32 %v2081_v8, %v2082_v53  ;;  %v2307_v19 = vmax.f32 %v5330_v34, %v5335_v59  ;;  %v2201_v30 = vadd.f32 %v2200_v17, %v2199_v40 }
 0x63e   : > { %v2214_v63 = vrot.slane %v2213_v45, 4  ;;  %v2077_v50 = vrot.slane %v2076_v4, 1  ;;  %v5339_v29 = vpop.f32.mrf.mxu1  ;;  %3775 = vrcp.f32 %v2192_v56  ;;  %v2207_v36 = vrot.slane %v2206_v24, 2 }
 0x63f   : > { %v2084_v16 = vrot.slane %v2083_v61, 2  ;;  %2308 = vmax.xlane.f32.xlu1 %v2307_v19  ;;  %3777 = vrcp.f32 %v2201_v30 }
 0x640   : > { %v2215_v55 = vadd.f32 %v2214_v63, %v2213_v45  ;;  %v2078_v12 = vmax.f32 %v2076_v4, %v2077_v50  ;;  %v5341_v28 = vpop.f32.mrf.mxu1  ;;  %v2208_v51 = vadd.f32 %v2207_v36, %v2206_v24 }
 0x641   : > { %v2085_v26 = vmax.f32 %v2083_v61, %v2084_v16  ;;  %v2310_v8 = vmax.f32 %v5339_v29, %v5341_v28 }
 0x642   : > { %v5345_v52 = vpop.eup %3759  ;;  %v2216_v40 = vrot.slane %v2215_v55, 2  ;;  %v2112_v14 = vsub.f32 %v5259_v31, %v2078_v12  ;;  %v2114_v9 = vsub.f32 %v5272_v13, %v2078_v12  ;;  %v5349_v56 = vpop.f32.mrf.mxu1  ;;  %v2116_v21 = vsub.f32 %v5283_v48, %v2078_v12 }
 0x643   : > { %v5351_v46 = vpop.eup %3761  ;;  %v2118_v57 = vsub.f32 %v5295_v6, %v2078_v12  ;;  %v2086_v20 = vrot.slane %v2085_v26, 1  ;;  %2311 = vmax.xlane.f32.xlu1 %v2310_v8  ;;  %v2209_v16 = vrot.slane %v2208_v51, 1 }
 0x644   : > { %v5355_v60 = vpop.eup %3763  ;;  %v2220_v22 = vadd.f32 %v5351_v46, %v5345_v52  ;;  %v2168_v15 = vmul.f32 1.442695, %v2112_v14  ;;  %v2172_v31 = vmul.f32 1.442695, %v2114_v9  ;;  %v5359_v32 = vpop.f32.mrf.mxu1  ;;  %v2217_v13 = vadd.f32 %v2216_v40, %v2215_v55 }
 0x645   : > { %v5361_v53 = vpop.eup %3765  ;;  %v2176_v17 = vmul.f32 1.442695, %v2116_v21  ;;  %v2180_v24 = vmul.f32 1.442695, %v2118_v57  ;;  %v2087_v45 = vmax.f32 %v2085_v26, %v2086_v20  ;;  %v2313_v48 = vmax.f32 %v5349_v56, %v5359_v32 }
 0x646   : > { %v2221_v6 = vadd.f32 %v5355_v60, %v2220_v22  ;;  %3779 = vpow2.f32 %v2168_v15  ;;  %v5366_v4 = vpop.f32.mrf.mxu1  ;;  %v2218_v61 = vrot.slane %v2217_v13, 1 }
 0x647   : > { %v5368_v19 = vpop.eup %3767  ;;  %3781 = vpow2.f32 %v2172_v31  ;;  %v2113_v30 = vsub.f32 %v5267_v1, %v2087_v45  ;;  %v2115_v63 = vsub.f32 %v5279_v38, %v2087_v45  ;;  %v2117_v50 = vsub.f32 %v5286_v35, %v2087_v45  ;;  %2314 = vmax.xlane.f32.xlu1 %v2313_v48 }
 0x648   : > { %v5373_v36 = vpop.eup %3769  ;;  %v2222_v55 = vadd.f32 %v5361_v53, %v2221_v6  ;;  %3783 = vpow2.f32 %v2176_v17  ;;  %v2119_v12 = vsub.f32 %v5304_v25, %v2087_v45  ;;  %v5377_v26 = vpop.f32.mrf.mxu1  ;;  %v2219_v15 = vadd.f32 %v2218_v61, %v2217_v13 }
 0x649   : > { %v5379_v8 = vpop.eup %3771  ;;  %v2229_v1 = vadd.f32 %v5373_v36, %v5368_v19  ;;  %3785 = vpow2.f32 %v2180_v24  ;;  %v2170_v38 = vmul.f32 1.442695, %v2113_v30  ;;  %v2174_v40 = vmul.f32 1.442695, %v2115_v63 }
 0x64a   : > { %v5383_v35 = vpop.eup %3773  ;;  %v2223_v14 = vrot.slane %v2222_v55, 4  ;;  %v2178_v9 = vmul.f32 1.442695, %v2117_v50  ;;  %v2182_v21 = vmul.f32 1.442695, %v2119_v12  ;;  %v5385_v57 = vpop.f32.mrf.mxu1  ;;  %v2316_v25 = vmax.f32 %v5366_v4, %v5377_v26 }
 0x64b   : > { %v3776_v20 = vpop.eup %3775  ;;  %v2230_v22 = vadd.f32 %v5379_v8, %v2229_v1  ;;  %3787 = vpow2.f32 %v2170_v38  ;;  %v2210_v45 = vadd.f32 %v2209_v16, %v2208_v51 }
 0x64c   : > { %v3778_v31 = vpop.eup %3777  ;;  %v2224_v17 = vadd.f32 %v2223_v14, %v2222_v55  ;;  %3789 = vpow2.f32 %v2174_v40  ;;  %2317 = vmax.xlane.f32.xlu1 %v2316_v25  ;;  %v5390_v24 = vpop.f32.mrf.mxu1  ;;  %v2264_v48 = vmul.f32 0.17677669, %v3776_v20 }
 0x64d   : > { %v2231_v6 = vadd.f32 %v5383_v35, %v2230_v22  ;;  %3791 = vpow2.f32 %v2178_v9  ;;  %v2319_v30 = vmax.f32 %v5385_v57, %v5390_v24  ;;  %v2265_v63 = vmul.f32 0.17677669, %v3778_v31 }
 0x64e   : > { %v2225_v50 = vrot.slane %v2224_v17, 2  ;;  %3793 = vpow2.f32 %v2182_v21  ;;  %v5395_v12 = vpop.f32.mrf.mxu1  ;;  %v5398_v13 = vmul.f32 %v5244_v41, %v2264_v48  ;;  %v5401_v61 = vmul.f32 %v5252_v5, %v2264_v48 }
 0x64f   : > { %v2232_v55 = vrot.slane %v2231_v6, 4  ;;  %3795 = vrcp.f32 %v2219_v15  ;;  %v5404_v51 = vmul.f32 %v5269_v37, %v2265_v63  ;;  %v5407_v16 = vmul.f32 %v5274_v49, %v2265_v63 }
 0x650   : > { %6210 = vst [vmem:[#allocation30_spill] sm:$0xff] %v5398_v13  ;;  %6211 = vst [vmem:[#allocation32_spill] sm:$0xff] %v5401_v61  ;;  %v2226_v1 = vadd.f32 %v2225_v50, %v2224_v17  ;;  %2320 = vmax.xlane.f32.xlu1 %v2319_v30  ;;  %v5409_v38 = vpop.f32.mrf.mxu1  ;;  %3797 = vrcp.f32 %v2210_v45  ;;  %v5414_v40 = vmul.f32 %v5256_v39, %v2265_v63 }
 0x651   : > { %6212 = vst [vmem:[#allocation29_spill] sm:$0xff] %v5404_v51  ;;  %6213 = vst [vmem:[#allocation34_spill] sm:$0xff] %v5407_v16  ;;  %v2233_v5 = vadd.f32 %v2232_v55, %v2231_v6  ;;  %v2322_v14 = vmax.f32 %v5395_v12, %v5409_v38  ;;  %v5421_v49 = vmul.f32 %v5261_v3, %v2265_v63 }
 0x652   : > { %6214 = vst [vmem:[#allocation33_spill] sm:$0xff] %v5414_v40  ;;  %v2227_v9 = vrot.slane %v2226_v1, 1  ;;  %v5423_v21 = vpop.f32.mrf.mxu1  ;;  %v5426_v25 = vmul.f32 %v5236_v54, %v2264_v48  ;;  %v5429_v20 = vmul.f32 %v5241_v7, %v2264_v48 }
 0x653   : > { %6215 = vst [vmem:[#allocation24_spill] sm:$0xff] %v5421_v49  ;;  %v5431_v39 = vpop.eup %3779  ;;  %v2234_v22 = vrot.slane %v2233_v5, 2 }
 0x654   : > { %6216 = vst [vmem:[#allocation23_spill] sm:$0xff] %v5426_v25  ;;  %6217 = vst [vmem:[#allocation22_spill] sm:$0xff] %v5429_v20  ;;  %v5435_v31 = vpop.eup %3781  ;;  %2323 = vmax.xlane.f32.xlu1 %v2322_v14  ;;  %v5437_v3 = vpop.f32.mrf.mxu1  ;;  %v2228_v17 = vadd.f32 %v2227_v9, %v2226_v1 }
 0x655   : > { %v5441_v54 = vpop.eup %3783  ;;  %v2238_v7 = vadd.f32 %v5435_v31, %v5431_v39  ;;  %v2325_v48 = vmax.f32 %v5423_v21, %v5437_v3  ;;  %v2235_v6 = vadd.f32 %v2234_v22, %v2233_v5 }
 0x656   : > { %v5447_v30 = vpop.eup %3785  ;;  %v5449_v63 = vpop.f32.mrf.mxu1  ;;  %3799 = vrcp.f32 %v2228_v17 }
 0x657   : > { %v2239_v50 = vadd.f32 %v5441_v54, %v2238_v7  ;;  %v2236_v55 = vrot.slane %v2235_v6, 1 }
 0x658   : > { %v5452_v1 = vpop.eup %3787  ;;  %2326 = vmax.xlane.f32.xlu1 %v2325_v48  ;;  %v5454_v14 = vpop.f32.mrf.mxu1 }
 0x659   : > { %v5456_v9 = vpop.eup %3789  ;;  %v2240_v45 = vadd.f32 %v5447_v30, %v2239_v50  ;;  %v2328_v5 = vmax.f32 %v5449_v63, %v5454_v14  ;;  %v2237_v22 = vadd.f32 %v2236_v55, %v2235_v6 }
 0x65a   : > { %v5461_v15 = vpop.eup %3791  ;;  %v2247_v17 = vadd.f32 %v5456_v9, %v5452_v1  ;;  %v5465_v7 = vpop.f32.mrf.mxu1 }
 0x65b   : > { %v5467_v41 = vpop.eup %3793  ;;  %v2241_v48 = vrot.slane %v2240_v45, 4  ;;  %3801 = vrcp.f32 %v2237_v22 }
 0x65c   : > { %v3796_v37 = vpop.eup %3795  ;;  %v2248_v58 = vadd.f32 %v5461_v15, %v2247_v17  ;;  %2329 = vmax.xlane.f32.xlu1 %v2328_v5  ;;  %v5470_v50 = vpop.f32.mrf.mxu1 }
 0x65d   : > { %v3798_v25 = vpop.eup %3797  ;;  %v2242_v20 = vadd.f32 %v2241_v48, %v2240_v45  ;;  %v2331_v6 = vmax.f32 %v5465_v7, %v5470_v50  ;;  %v2267_v55 = vmul.f32 0.17677669, %v3796_v37 }
 0x65e   : > { %v2249_v40 = vadd.f32 %v5467_v41, %v2248_v58  ;;  %v5475_v49 = vpop.f32.mrf.mxu1  ;;  %v2266_v13 = vmul.f32 0.17677669, %v3798_v25 }
 0x65f   : > { %v2243_v61 = vrot.slane %v2242_v20, 2  ;;  %v5478_v22 = vmul.f32 %v5325_v11, %v2267_v55  ;;  %v5481_v17 = vmul.f32 %v5332_v42, %v2267_v55  ;;  %v5484_v5 = vmul.f32 %v5309_v18, %v2267_v55 }
 0x660   : > { %v2250_v45 = vrot.slane %v2249_v40, 4  ;;  %2332 = vmax.xlane.f32.xlu1 %v2331_v6  ;;  %v5486_v48 = vpop.f32.mrf.mxu1  ;;  %v5489_v37 = vmul.f32 %v5300_v47, %v2266_v13  ;;  %v5492_v58 = vmul.f32 %v5306_v33, %v2266_v13  ;;  %v5495_v25 = vmul.f32 %v5316_v23, %v2267_v55 }
 0x661   : > { %6218 = vst [vmem:[#allocation21_spill] sm:$0xff] %v5478_v22  ;;  %6219 = vst [vmem:[#allocation26_spill] sm:$0xff] %v5481_v17  ;;  %v2244_v11 = vadd.f32 %v2243_v61, %v2242_v20  ;;  %v2334_v42 = vmax.f32 %v5475_v49, %v5486_v48  ;;  %v5502_v6 = vmul.f32 %v5292_v2, %v2266_v13 }
 0x662   : > { %6220 = vst [vmem:[#allocation25_spill] sm:$0xff] %v5484_v5  ;;  %6221 = vst [vmem:[#allocation28_spill] sm:$0xff] %v5489_v37  ;;  %v2251_v51 = vadd.f32 %v2250_v45, %v2249_v40  ;;  %v5504_v16 = vpop.f32.mrf.mxu1  ;;  %v5511_v23 = vmul.f32 %v5297_v10, %v2266_v13 }
 0x663   : > { %6222 = vst [vmem:[#allocation27_spill] sm:$0xff] %v5492_v58  ;;  %6223 = vst [vmem:[#allocation5_spill] sm:$0xff] %v5495_v25  ;;  %v3800_v61 = vpop.eup %3799  ;;  %v2245_v20 = vrot.slane %v2244_v11, 1 }
 0x664   : > { %6224 = vst [vmem:[#allocation6_spill] sm:$0xff] %v5502_v6  ;;  %6225 = vst [vmem:[#allocation7_spill] sm:$0xff] %v5511_v23  ;;  %v2252_v55 = vrot.slane %v2251_v51, 2  ;;  %2335 = vmax.xlane.f32.xlu1 %v2334_v42  ;;  %v5513_v18 = vpop.f32.mrf.mxu1  ;;  %v2268_v2 = vmul.f32 0.17677669, %v3800_v61 }
 0x665   : > { %v2337_v45 = vmax.f32 %v5504_v16, %v5513_v18  ;;  %v2246_v47 = vadd.f32 %v2245_v20, %v2244_v11 }
 0x666   : > { %v5519_v37 = vpop.f32.mrf.mxu1  ;;  %v2253_v33 = vadd.f32 %v2252_v55, %v2251_v51  ;;  %v5522_v10 = vmul.f32 %v5355_v60, %v2268_v2  ;;  %v5525_v13 = vmul.f32 %v5361_v53, %v2268_v2  ;;  %v5528_v42 = vmul.f32 %v5345_v52, %v2268_v2 }
 0x667   : > { %3803 = vrcp.f32 %v2246_v47  ;;  %v5531_v61 = vmul.f32 %v5351_v46, %v2268_v2 }
 0x668   : > { %v3802_v40 = vpop.eup %3801  ;;  %2338 = vmax.xlane.f32.xlu1 %v2337_v45  ;;  %v5533_v6 = vpop.f32.mrf.mxu1  ;;  %v2254_v11 = vrot.slane %v2253_v33, 1 }
 0x669   : > { %v2340_v60 = vmax.f32 %v5519_v37, %v5533_v6  ;;  %v2269_v53 = vmul.f32 0.17677669, %v3802_v40 }
 0x66a   : > { %v5541_v20 = vpop.f32.mrf.mxu1  ;;  %v2255_v47 = vadd.f32 %v2254_v11, %v2253_v33 }
 0x66b   : > { %v5544_v46 = vmul.f32 %v5379_v8, %v2269_v53  ;;  %v5547_v55 = vmul.f32 %v5383_v35, %v2269_v53  ;;  %v5550_v2 = vmul.f32 %v5368_v19, %v2269_v53  ;;  %v5553_v45 = vmul.f32 %v5373_v36, %v2269_v53 }
 0x66c   : > { %2341 = vmax.xlane.f32.xlu1 %v2340_v60  ;;  %v5555_v40 = vpop.f32.mrf.mxu1  ;;  %3805 = vrcp.f32 %v2255_v47 }
 0x66d   : > { %v2343_v52 = vmax.f32 %v5541_v20, %v5555_v40 }
 0x66e   : > { %v5563_v33 = vpop.f32.mrf.mxu1 }
 0x670   : > { %2344 = vmax.xlane.f32.xlu1 %v2343_v52  ;;  %v5565_v19 = vpop.f32.mrf.mxu1 }
 0x671   : > { %v2346_v36 = vmax.f32 %v5563_v33, %v5565_v19 }
 0x672   : > { %v5569_v11 = vpop.f32.mrf.mxu1 }
 0x674   : > { %v3804_v60 = vpop.eup %3803  ;;  %2347 = vmax.xlane.f32.xlu1 %v2346_v36  ;;  %v5571_v53 = vpop.f32.mrf.mxu1 }
 0x675   : > { %v2349_v47 = vmax.f32 %v5569_v11, %v5571_v53  ;;  %v2270_v51 = vmul.f32 0.17677669, %v3804_v60 }
 0x677   : > { %v5576_v35 = vmul.f32 %v5441_v54, %v2270_v51  ;;  %v5579_v52 = vmul.f32 %v5447_v30, %v2270_v51  ;;  %v5582_v8 = vmul.f32 %v5431_v39, %v2270_v51  ;;  %v5585_v23 = vmul.f32 %v5435_v31, %v2270_v51 }
 0x678   : > { %2350 = vmax.xlane.f32.xlu1 %v2349_v47 }
 0x679   : > { %v3806_v36 = vpop.eup %3805 }
 0x67a   : > { %v2271_v25 = vmul.f32 0.17677669, %v3806_v36 }
 0x67c   : > { %v5592_v54 = vmul.f32 %v5461_v15, %v2271_v25  ;;  %v5595_v30 = vmul.f32 %v5467_v41, %v2271_v25  ;;  %v5598_v39 = vmul.f32 %v5452_v1, %v2271_v25  ;;  %v5601_v31 = vmul.f32 %v5456_v9, %v2271_v25 }
 0x6c4   : > { %v2306_v60 = vpop.xlane.xlu1 %2305 }
 0x6c5   : > { %v2352_v36 = vsub.f32 %v5314_v0, %v2306_v60  ;;  %v2353_v15 = vsub.f32 %v5323_v43, %v2306_v60 }
 0x6c7   : > { %v2384_v5 = vmul.f32 1.442695, %v2352_v36  ;;  %v2386_v41 = vmul.f32 1.442695, %v2353_v15 }
 0x6c8   : > { %v2309_v58 = vpop.xlane.xlu1 %2308 }
 0x6c9   : > { %3807 = vpow2.f32 %v2384_v5  ;;  %v2354_v1 = vsub.f32 %v5330_v34, %v2309_v58  ;;  %v2355_v9 = vsub.f32 %v5335_v59, %v2309_v58 }
 0x6ca   : > { %3809 = vpow2.f32 %v2386_v41 }
 0x6cb   : > { %v2388_v25 = vmul.f32 1.442695, %v2354_v1  ;;  %v2390_v22 = vmul.f32 1.442695, %v2355_v9 }
 0x6cc   : > { %v2312_v51 = vpop.xlane.xlu1 %2311 }
 0x6cd   : > { %3811 = vpow2.f32 %v2388_v25  ;;  %v2356_v47 = vsub.f32 %v5339_v29, %v2312_v51  ;;  %v2357_v17 = vsub.f32 %v5341_v28, %v2312_v51 }
 0x6ce   : > { %3813 = vpow2.f32 %v2390_v22 }
 0x6cf   : > { %v2392_v0 = vmul.f32 1.442695, %v2356_v47  ;;  %v2394_v43 = vmul.f32 1.442695, %v2357_v17 }
 0x6d0   : > { %v2315_v60 = vpop.xlane.xlu1 %2314 }
 0x6d1   : > { %3815 = vpow2.f32 %v2392_v0  ;;  %v2358_v5 = vsub.f32 %v5349_v56, %v2315_v60  ;;  %v2359_v34 = vsub.f32 %v5359_v32, %v2315_v60 }
 0x6d2   : > { %3817 = vpow2.f32 %v2394_v43 }
 0x6d3   : > { %v2396_v59 = vmul.f32 1.442695, %v2358_v5  ;;  %v2398_v58 = vmul.f32 1.442695, %v2359_v34 }
 0x6d5   : > { %3819 = vpow2.f32 %v2396_v59  ;;  %v2318_v36 = vpop.xlane.xlu1 %2317 }
 0x6d6   : > { %v5615_v15 = vpop.eup %3807  ;;  %3821 = vpow2.f32 %v2398_v58  ;;  %v2360_v29 = vsub.f32 %v5366_v4, %v2318_v36  ;;  %v2361_v28 = vsub.f32 %v5377_v26, %v2318_v36 }
 0x6d7   : > { %v5619_v22 = vpop.eup %3809 }
 0x6d8   : > { %v2400_v17 = vmul.f32 1.442695, %v2360_v29  ;;  %v2402_v51 = vmul.f32 1.442695, %v2361_v28  ;;  %v2448_v56 = vadd.f32 %v5619_v22, %v5615_v15 }
 0x6d9   : > { %v2321_v32 = vpop.xlane.xlu1 %2320 }
 0x6da   : > { %v5623_v47 = vpop.eup %3811  ;;  %3823 = vpow2.f32 %v2400_v17  ;;  %v2362_v41 = vsub.f32 %v5385_v57, %v2321_v32  ;;  %v2363_v1 = vsub.f32 %v5390_v24, %v2321_v32  ;;  %2449 = vadd.xlane.f32.xlu1 %v2448_v56 }
 0x6db   : > { %v5627_v9 = vpop.eup %3813  ;;  %3825 = vpow2.f32 %v2402_v51 }
 0x6dc   : > { %v2404_v4 = vmul.f32 1.442695, %v2362_v41  ;;  %v2406_v26 = vmul.f32 1.442695, %v2363_v1  ;;  %v2451_v25 = vadd.f32 %v5627_v9, %v5623_v47 }
 0x6dd   : > { %v2324_v0 = vpop.xlane.xlu1 %2323 }
 0x6de   : > { %v5631_v43 = vpop.eup %3815  ;;  %3827 = vpow2.f32 %v2404_v4  ;;  %v2364_v60 = vsub.f32 %v5395_v12, %v2324_v0  ;;  %v2365_v5 = vsub.f32 %v5409_v38, %v2324_v0  ;;  %2452 = vadd.xlane.f32.xlu1 %v2451_v25 }
 0x6df   : > { %v5635_v57 = vpop.eup %3817  ;;  %3829 = vpow2.f32 %v2406_v26 }
 0x6e0   : > { %v2408_v24 = vmul.f32 1.442695, %v2364_v60  ;;  %v2410_v34 = vmul.f32 1.442695, %v2365_v5  ;;  %v2454_v59 = vadd.f32 %v5635_v57, %v5631_v43 }
 0x6e1   : > { %v2327_v58 = vpop.xlane.xlu1 %2326 }
 0x6e2   : > { %v5639_v36 = vpop.eup %3819  ;;  %3831 = vpow2.f32 %v2408_v24  ;;  %v2366_v29 = vsub.f32 %v5423_v21, %v2327_v58  ;;  %v2367_v28 = vsub.f32 %v5437_v3, %v2327_v58  ;;  %2455 = vadd.xlane.f32.xlu1 %v2454_v59 }
 0x6e3   : > { %v5643_v12 = vpop.eup %3821  ;;  %3833 = vpow2.f32 %v2410_v34 }
 0x6e4   : > { %v2412_v38 = vmul.f32 1.442695, %v2366_v29  ;;  %v2414_v17 = vmul.f32 1.442695, %v2367_v28  ;;  %v2457_v51 = vadd.f32 %v5643_v12, %v5639_v36 }
 0x6e5   : > { %v2330_v56 = vpop.xlane.xlu1 %2329 }
 0x6e6   : > { %3835 = vpow2.f32 %v2412_v38  ;;  %v2368_v32 = vsub.f32 %v5449_v63, %v2330_v56  ;;  %v2369_v41 = vsub.f32 %v5454_v14, %v2330_v56  ;;  %2458 = vadd.xlane.f32.xlu1 %v2457_v51 }
 0x6e7   : > { %v5649_v1 = vpop.eup %3823  ;;  %3837 = vpow2.f32 %v2414_v17 }
 0x6e8   : > { %v5651_v21 = vpop.eup %3825  ;;  %v2416_v3 = vmul.f32 1.442695, %v2368_v32  ;;  %v2418_v4 = vmul.f32 1.442695, %v2369_v41 }
 0x6e9   : > { %v2333_v26 = vpop.xlane.xlu1 %2332  ;;  %v2460_v25 = vadd.f32 %v5651_v21, %v5649_v1 }
 0x6ea   : > { %3839 = vpow2.f32 %v2416_v3  ;;  %v2370_v0 = vsub.f32 %v5465_v7, %v2333_v26  ;;  %v2371_v60 = vsub.f32 %v5470_v50, %v2333_v26 }
 0x6eb   : > { %v5657_v63 = vpop.eup %3827  ;;  %3841 = vpow2.f32 %v2418_v4  ;;  %2461 = vadd.xlane.f32.xlu1 %v2460_v25 }
 0x6ec   : > { %v5659_v14 = vpop.eup %3829  ;;  %v2420_v5 = vmul.f32 1.442695, %v2370_v0  ;;  %v2422_v24 = vmul.f32 1.442695, %v2371_v60 }
 0x6ed   : > { %v2336_v34 = vpop.xlane.xlu1 %2335  ;;  %v2463_v59 = vadd.f32 %v5659_v14, %v5657_v63 }
 0x6ee   : > { %3843 = vpow2.f32 %v2420_v5  ;;  %v2372_v58 = vsub.f32 %v5475_v49, %v2336_v34  ;;  %v2373_v29 = vsub.f32 %v5486_v48, %v2336_v34 }
 0x6ef   : > { %v5665_v7 = vpop.eup %3831  ;;  %3845 = vpow2.f32 %v2422_v24  ;;  %2464 = vadd.xlane.f32.xlu1 %v2463_v59 }
 0x6f0   : > { %v5667_v50 = vpop.eup %3833  ;;  %v2424_v28 = vmul.f32 1.442695, %v2372_v58  ;;  %v2426_v38 = vmul.f32 1.442695, %v2373_v29 }
 0x6f1   : > { %v2339_v17 = vpop.xlane.xlu1 %2338  ;;  %v2466_v51 = vadd.f32 %v5667_v50, %v5665_v7 }
 0x6f2   : > { %3847 = vpow2.f32 %v2424_v28  ;;  %v2374_v56 = vsub.f32 %v5504_v16, %v2339_v17  ;;  %v2375_v32 = vsub.f32 %v5513_v18, %v2339_v17 }
 0x6f3   : > { %v5673_v49 = vpop.eup %3835  ;;  %3849 = vpow2.f32 %v2426_v38  ;;  %2467 = vadd.xlane.f32.xlu1 %v2466_v51 }
 0x6f4   : > { %v5675_v48 = vpop.eup %3837  ;;  %v2428_v41 = vmul.f32 1.442695, %v2374_v56  ;;  %v2430_v3 = vmul.f32 1.442695, %v2375_v32 }
 0x6f5   : > { %v2342_v4 = vpop.xlane.xlu1 %2341  ;;  %v2469_v26 = vadd.f32 %v5675_v48, %v5673_v49 }
 0x6f6   : > { %3851 = vpow2.f32 %v2428_v41  ;;  %v2376_v25 = vsub.f32 %v5519_v37, %v2342_v4  ;;  %v2377_v0 = vsub.f32 %v5533_v6, %v2342_v4 }
 0x6f7   : > { %v5681_v16 = vpop.eup %3839  ;;  %3853 = vpow2.f32 %v2430_v3  ;;  %2470 = vadd.xlane.f32.xlu1 %v2469_v26 }
 0x6f8   : > { %v5683_v18 = vpop.eup %3841  ;;  %v2432_v60 = vmul.f32 1.442695, %v2376_v25  ;;  %v2434_v5 = vmul.f32 1.442695, %v2377_v0 }
 0x6f9   : > { %v2345_v24 = vpop.xlane.xlu1 %2344  ;;  %v2472_v34 = vadd.f32 %v5683_v18, %v5681_v16 }
 0x6fa   : > { %3855 = vpow2.f32 %v2432_v60  ;;  %v2378_v59 = vsub.f32 %v5541_v20, %v2345_v24  ;;  %v2379_v58 = vsub.f32 %v5555_v40, %v2345_v24 }
 0x6fb   : > { %v5689_v37 = vpop.eup %3843  ;;  %3857 = vpow2.f32 %v2434_v5  ;;  %2473 = vadd.xlane.f32.xlu1 %v2472_v34 }
 0x6fc   : > { %v5691_v6 = vpop.eup %3845  ;;  %v2436_v29 = vmul.f32 1.442695, %v2378_v59  ;;  %v2438_v28 = vmul.f32 1.442695, %v2379_v58 }
 0x6fd   : > { %v2348_v38 = vpop.xlane.xlu1 %2347  ;;  %v2475_v17 = vadd.f32 %v5691_v6, %v5689_v37 }
 0x6fe   : > { %3859 = vpow2.f32 %v2436_v29  ;;  %v2380_v51 = vsub.f32 %v5563_v33, %v2348_v38  ;;  %v2381_v56 = vsub.f32 %v5565_v19, %v2348_v38 }
 0x6ff   : > { %v5697_v20 = vpop.eup %3847  ;;  %3861 = vpow2.f32 %v2438_v28  ;;  %2476 = vadd.xlane.f32.xlu1 %v2475_v17 }
 0x700   : > { %v5699_v40 = vpop.eup %3849  ;;  %v2440_v32 = vmul.f32 1.442695, %v2380_v51  ;;  %v2442_v41 = vmul.f32 1.442695, %v2381_v56 }
 0x701   : > { %v2351_v3 = vpop.xlane.xlu1 %2350  ;;  %v2478_v4 = vadd.f32 %v5699_v40, %v5697_v20 }
 0x702   : > { %3863 = vpow2.f32 %v2440_v32  ;;  %v2382_v26 = vsub.f32 %v5569_v11, %v2351_v3  ;;  %v2383_v25 = vsub.f32 %v5571_v53, %v2351_v3  ;;  %v358_v32 = vld [vmem:[%s6049_s3] sm:$0xf] }
 0x703   : > { %v5705_v33 = vpop.eup %3851  ;;  %3865 = vpow2.f32 %v2442_v41  ;;  %2479 = vadd.xlane.f32.xlu1 %v2478_v4 }
 0x704   : > { %v5707_v19 = vpop.eup %3853  ;;  %v2444_v0 = vmul.f32 1.442695, %v2382_v26  ;;  %v2446_v60 = vmul.f32 1.442695, %v2383_v25 }
 0x705   : > { %v2481_v5 = vadd.f32 %v5707_v19, %v5705_v33 }
 0x706   : > { %3867 = vpow2.f32 %v2444_v0 }
 0x707   : > { %v5711_v24 = vpop.eup %3855  ;;  %3869 = vpow2.f32 %v2446_v60  ;;  %2482 = vadd.xlane.f32.xlu0 %v2481_v5 }
 0x708   : > { %v5713_v34 = vpop.eup %3857 }
 0x709   : > { %v2484_v11 = vadd.f32 %v5713_v34, %v5711_v24 }
 0x70b   : > { %v5717_v53 = vpop.eup %3859  ;;  %2485 = vadd.xlane.f32.xlu1 %v2484_v11 }
 0x70c   : > { %v5719_v59 = vpop.eup %3861 }
 0x70d   : > { %v2487_v58 = vadd.f32 %v5719_v59, %v5717_v53 }
 0x70f   : > { %v5723_v29 = vpop.eup %3863  ;;  %2488 = vadd.xlane.f32.xlu1 %v2487_v58 }
 0x710   : > { %v5725_v28 = vpop.eup %3865 }
 0x711   : > { %v2490_v38 = vadd.f32 %v5725_v28, %v5723_v29 }
 0x713   : > { %v5729_v17 = vpop.eup %3867  ;;  %2491 = vadd.xlane.f32.xlu1 %v2490_v38 }
 0x714   : > { %v5731_v51 = vpop.eup %3869 }
 0x715   : > { %v2493_v56 = vadd.f32 %v5731_v51, %v5729_v17 }
 0x717   : > { %2494 = vadd.xlane.f32.xlu1 %v2493_v56 }
 0x71d   : > { %1628 = vperm.xlu0 %3547, %v358_v32  }
 0x763   : > { %v2450_v41 = vpop.xlane.xlu1 %2449 }
 0x764   : > { %3871 = vrcp.f32 %v2450_v41 }
 0x767   : > { %v2453_v3 = vpop.xlane.xlu1 %2452 }
 0x768   : > { %3873 = vrcp.f32 %v2453_v3 }
 0x76b   : > { %v2456_v4 = vpop.xlane.xlu1 %2455 }
 0x76c   : > { %3875 = vrcp.f32 %v2456_v4 }
 0x76f   : > { %v2459_v26 = vpop.xlane.xlu1 %2458 }
 0x770   : > { %3877 = vrcp.f32 %v2459_v26 }
 0x771   : > { %v3872_v25 = vpop.eup %3871 }
 0x772   : > { %v2512_v0 = vmul.f32 %v3872_v25, %v5615_v15  ;;  %v2513_v60 = vmul.f32 %v3872_v25, %v5619_v22 }
 0x774   : > { %v2462_v5 = vpop.xlane.xlu1 %2461  ;;  %v3435_v11 = vpack.i.bf16 %v2512_v0, %v2513_v60 }
 0x775   : > { %v3874_v58 = vpop.eup %3873  ;;  %3879 = vrcp.f32 %v2462_v5 }
 0x776   : > { %3436 = vxpose.xlu1.b32.start [1/16] %v3435_v11, 128  ;;  %v2514_v38 = vmul.f32 %v3874_v58, %v5623_v47  ;;  %v2515_v56 = vmul.f32 %v3874_v58, %v5627_v9 }
 0x778   : > { %v2465_v32 = vpop.xlane.xlu1 %2464  ;;  %v3437_v41 = vpack.i.bf16 %v2514_v38, %v2515_v56 }
 0x779   : > { %v3876_v3 = vpop.eup %3875  ;;  %3881 = vrcp.f32 %v2465_v32 }
 0x77a   : > { %3438 = vxpose.xlu1.b32.cont [2/16] %v3437_v41, 128  ;;  %v2516_v4 = vmul.f32 %v3876_v3, %v5631_v43  ;;  %v2517_v15 = vmul.f32 %v3876_v3, %v5635_v57 }
 0x77c   : > { %v2468_v26 = vpop.xlane.xlu1 %2467  ;;  %v3439_v22 = vpack.i.bf16 %v2516_v4, %v2517_v15 }
 0x77d   : > { %v3878_v25 = vpop.eup %3877  ;;  %3883 = vrcp.f32 %v2468_v26 }
 0x77e   : > { %3440 = vxpose.xlu1.b32.cont [3/16] %v3439_v22, 128  ;;  %v2518_v0 = vmul.f32 %v3878_v25, %v5639_v36  ;;  %v2519_v47 = vmul.f32 %v3878_v25, %v5643_v12 }
 0x780   : > { %v2471_v60 = vpop.xlane.xlu1 %2470  ;;  %v3441_v9 = vpack.i.bf16 %v2518_v0, %v2519_v47 }
 0x781   : > { %3885 = vrcp.f32 %v2471_v60 }
 0x782   : > { %v3880_v5 = vpop.eup %3879  ;;  %3442 = vxpose.xlu1.b32.cont [4/16] %v3441_v9, 128 }
 0x783   : > { %v2520_v11 = vmul.f32 %v3880_v5, %v5649_v1  ;;  %v2521_v43 = vmul.f32 %v3880_v5, %v5651_v21 }
 0x784   : > { %v2474_v58 = vpop.xlane.xlu1 %2473 }
 0x785   : > { %3887 = vrcp.f32 %v2474_v58  ;;  %v3443_v57 = vpack.i.bf16 %v2520_v11, %v2521_v43 }
 0x786   : > { %v3882_v38 = vpop.eup %3881 }
 0x787   : > { %3444 = vxpose.xlu1.b32.cont [5/16] %v3443_v57, 128  ;;  %v2522_v56 = vmul.f32 %v3882_v38, %v5657_v63  ;;  %v2523_v36 = vmul.f32 %v3882_v38, %v5659_v14 }
 0x788   : > { %v2477_v32 = vpop.xlane.xlu1 %2476 }
 0x789   : > { %3889 = vrcp.f32 %v2477_v32  ;;  %v3445_v12 = vpack.i.bf16 %v2522_v56, %v2523_v36 }
 0x78a   : > { %v3884_v41 = vpop.eup %3883 }
 0x78b   : > { %3446 = vxpose.xlu1.b32.cont [6/16] %v3445_v12, 128  ;;  %v2524_v3 = vmul.f32 %v3884_v41, %v5665_v7  ;;  %v2525_v1 = vmul.f32 %v3884_v41, %v5667_v50 }
 0x78c   : > { %v2480_v4 = vpop.xlane.xlu1 %2479 }
 0x78d   : > { %3891 = vrcp.f32 %v2480_v4  ;;  %v3447_v21 = vpack.i.bf16 %v2524_v3, %v2525_v1 }
 0x78e   : > { %v3886_v15 = vpop.eup %3885 }
 0x78f   : > { %3448 = vxpose.xlu1.b32.cont [7/16] %v3447_v21, 128  ;;  %v2526_v26 = vmul.f32 %v3886_v15, %v5673_v49  ;;  %v2527_v63 = vmul.f32 %v3886_v15, %v5675_v48 }
 0x790   : > { %v2483_v22 = vpop.xlane.xlu0 %2482 }
 0x791   : > { %3893 = vrcp.f32 %v2483_v22  ;;  %v3449_v14 = vpack.i.bf16 %v2526_v26, %v2527_v63 }
 0x792   : > { %v3888_v25 = vpop.eup %3887 }
 0x793   : > { %3450 = vxpose.xlu1.b32.cont [8/16] %v3449_v14, 128  ;;  %v2528_v0 = vmul.f32 %v3888_v25, %v5681_v16  ;;  %v2529_v7 = vmul.f32 %v3888_v25, %v5683_v18 }
 0x794   : > { %v2486_v47 = vpop.xlane.xlu1 %2485 }
 0x795   : > { %3895 = vrcp.f32 %v2486_v47  ;;  %v3451_v50 = vpack.i.bf16 %v2528_v0, %v2529_v7  ;;  %v5784_v0 = vpop.f32.mrf.mxu1 }
 0x796   : > { %v3890_v60 = vpop.eup %3889 }
 0x797   : > { %3452 = vxpose.xlu1.b32.cont [9/16] %v3451_v50, 128  ;;  %v2530_v9 = vmul.f32 %v3890_v60, %v5689_v37  ;;  %v2531_v49 = vmul.f32 %v3890_v60, %v5691_v6 }
 0x798   : > { %v5758_v5 = vpop.permute.xlu0 %1628  ;;  %v2489_v48 = vpop.xlane.xlu1 %2488 }
 0x799   : > { %6226 = vst [vmem:[#allocation8_spill] sm:$0xff] %v5758_v5  ;;  %3897 = vrcp.f32 %v2489_v48  ;;  %v3453_v11 = vpack.i.bf16 %v2530_v9, %v2531_v49  ;;  %v5762_v16 = vadd.f32 %v5189_v62, %v5758_v5  ;;  %v5766_v18 = vadd.f32 %v5193_v44, %v5758_v5 }
 0x79a   : > { %v3892_v43 = vpop.eup %3891 }
 0x79b   : > { %3454 = vxpose.xlu1.b32.cont [10/16] %v3453_v11, 128  ;;  %v1673_v37 = vsel %vm1672_vm2, %v5762_v16, 0.0  ;;  %v1674_v6 = vsel %vm1672_vm2, %v5766_v18, 0.0  ;;  %v2532_v58 = vmul.f32 %v3892_v43, %v5697_v20  ;;  %v2533_v57 = vmul.f32 %v3892_v43, %v5699_v40 }
 0x79c   : > { %v2492_v38 = vpop.xlane.xlu1 %2491  ;;  %v1675_v56 = vadd.f32 %v1674_v6, %v1673_v37 }
 0x79d   : > { %3899 = vrcp.f32 %v2492_v38  ;;  %v3455_v62 = vpack.i.bf16 %v2532_v58, %v2533_v57 }
 0x79e   : > { %v3894_v36 = vpop.eup %3893  ;;  %1676 = vadd.xlane.f32.xlu0 %v1675_v56 }
 0x79f   : > { %3456 = vxpose.xlu1.b32.cont [11/16] %v3455_v62, 128  ;;  %v2534_v44 = vmul.f32 %v3894_v36, %v5705_v33  ;;  %v2535_v32 = vmul.f32 %v3894_v36, %v5707_v19 }
 0x7a0   : > { %v2495_v12 = vpop.xlane.xlu1 %2494 }
 0x7a1   : > { %3901 = vrcp.f32 %v2495_v12  ;;  %v3457_v41 = vpack.i.bf16 %v2534_v44, %v2535_v32 }
 0x7a2   : > { %v3896_v3 = vpop.eup %3895 }
 0x7a3   : > { %3458 = vxpose.xlu1.b32.cont [12/16] %v3457_v41, 128  ;;  %v2536_v20 = vmul.f32 %v3896_v3, %v5711_v24  ;;  %v2537_v40 = vmul.f32 %v3896_v3, %v5713_v34 }
 0x7a5   : > { %v3459_v1 = vpack.i.bf16 %v2536_v20, %v2537_v40 }
 0x7a6   : > { %v3898_v4 = vpop.eup %3897 }
 0x7a7   : > { %3460 = vxpose.xlu1.b32.cont [13/16] %v3459_v1, 128  ;;  %v2538_v21 = vmul.f32 %v3898_v4, %v5717_v53  ;;  %v2539_v15 = vmul.f32 %v3898_v4, %v5719_v59  ;;  %v1939_v53 = vpop.f32.mrf.mxu1 }
 0x7a9   : > { %v3461_v26 = vpack.i.bf16 %v2538_v21, %v2539_v15  ;;  %v5786_v59 = vpop.f32.mrf.mxu1 }
 0x7aa   : > { %v3900_v33 = vpop.eup %3899 }
 0x7ab   : > { %3462 = vxpose.xlu1.b32.cont [14/16] %v3461_v26, 128  ;;  %v2540_v19 = vmul.f32 %v3900_v33, %v5723_v29  ;;  %v2541_v63 = vmul.f32 %v3900_v33, %v5725_v28  ;;  %v1943_v29 = vpop.f32.mrf.mxu1 }
 0x7ac   : > { %v2625_v47 = vpack.c.bf16 %v1943_v29, %v1939_v53 }
 0x7ad   : > { %v3463_v22 = vpack.i.bf16 %v2540_v19, %v2541_v63  ;;  %v5807_v12 = vpop.f32.mrf.mxu1 }
 0x7ae   : > { %v3902_v14 = vpop.eup %3901  ;;  %2672 = vmatprep.mubr.bf16.mxu0 %v2625_v47 }
 0x7af   : > { %3464 = vxpose.xlu1.b32.cont [15/16] %v3463_v22, 128  ;;  %v2542_v24 = vmul.f32 %v3902_v14, %v5729_v17  ;;  %v2543_v34 = vmul.f32 %v3902_v14, %v5731_v51  ;;  %v5809_v3 = vpop.f32.mrf.mxu1 }
 0x7b1   : > { %v3465_v25 = vpack.i.bf16 %v2542_v24, %v2543_v34  ;;  %v5811_v40 = vpop.f32.mrf.mxu1 }
 0x7b3   : > { %3466 = vxpose.xlu1.b32.end [16/16] %v3465_v25, 128  ;;  %v5813_v4 = vpop.f32.mrf.mxu1 }
 0x7b5   : > { %v5815_v15 = vpop.f32.mrf.mxu1 }
 0x7b7   : > { %v5817_v33 = vpop.f32.mrf.mxu1 }
 0x7b9   : > { %v5819_v24 = vpop.f32.mrf.mxu1 }
 0x7bb   : > { %v5821_v29 = vpop.f32.mrf.mxu1 }
 0x7d1   : > { %3548 = vset.pattern.permute.xlu1 %v6147_v27 }
 0x7f3   : > { %v3467_v28 = vpop.trf.xlu1 }
 0x7f4   : > { %v3471_v50 = vunpack.i.h.bf16 %v3467_v28  ;;  %v3468_v17 = vunpack.i.l.bf16 %v3467_v28 }
 0x7f7   : > { %v3472_v60 = vpop.trf.xlu1 }
 0x7f8   : > { %v3476_v51 = vunpack.i.h.bf16 %v3472_v60  ;;  %v3473_v9 = vunpack.i.l.bf16 %v3472_v60 }
 0x7fa   : > { %v5791_v49 = vpack.c.bf16 %v3473_v9, %v3468_v17  ;;  %v5793_v48 = vpack.c.bf16 %v3476_v51, %v3471_v50 }
 0x7fb   : > { %v3477_v11 = vpop.trf.xlu1 }
 0x7fc   : > { %v3481_v43 = vunpack.i.h.bf16 %v3477_v11  ;;  %v3478_v37 = vunpack.i.l.bf16 %v3477_v11 }
 0x7ff   : > { %v3482_v6 = vpop.trf.xlu1 }
 0x800   : > { %v3486_v58 = vunpack.i.h.bf16 %v3482_v6  ;;  %v3483_v57 = vunpack.i.l.bf16 %v3482_v6  ;;  %v5823_v6 = vpop.f32.mrf.mxu1 }
 0x802   : > { %v5795_v38 = vpack.c.bf16 %v3483_v57, %v3478_v37  ;;  %v5797_v56 = vpack.c.bf16 %v3486_v58, %v3481_v43 }
 0x803   : > { %v5799_v62 = vpop.trf.xlu1 }
 0x807   : > { %v5801_v36 = vpop.trf.xlu1 }
 0x80b   : > { %v5803_v44 = vpop.trf.xlu1 }
 0x80f   : > { %v5805_v32 = vpop.trf.xlu1 }
 0x813   : > { %v3507_v41 = vpop.trf.xlu1 }
 0x817   : > { %v3512_v20 = vpop.trf.xlu1 }
 0x818   : > { %v3513_v5 = vunpack.i.l.bf16 %v3512_v20 }
 0x81b   : > { %v3517_v1 = vpop.trf.xlu1 }
 0x81f   : > { %v3522_v21 = vpop.trf.xlu1 }
 0x820   : > { %v3526_v7 = vunpack.i.h.bf16 %v3522_v21 }
 0x823   : > { %v3527_v26 = vpop.trf.xlu1 }
 0x824   : > { %v3528_v11 = vunpack.i.l.bf16 %v3527_v26 }
 0x827   : > { %v1677_v19 = vpop.xlane.xlu0 %1676  ;;  %v3532_v63 = vpop.trf.xlu1 }
 0x828   : > { %v1678_v22 = vrot.slane %v1677_v19, 4  ;;  %v3533_v47 = vunpack.i.l.bf16 %v3532_v63  ;;  %v3536_v58 = vunpack.i.h.bf16 %v3532_v63 }
 0x82a   : > { %v1679_v14 = vadd.f32 %v1678_v22, %v1677_v19  ;;  %v3523_v19 = vunpack.i.l.bf16 %v3522_v21  ;;  %v2622_v22 = vpack.c.bf16 %v3533_v47, %v3528_v11  ;;  %v3506_v11 = vunpack.i.h.bf16 %v5805_v32 }
 0x82b   : > { %v3537_v34 = vpop.trf.xlu1 }
 0x82c   : > { %v1680_v25 = vrot.slane %v1679_v14, 2  ;;  %v3541_v28 = vunpack.i.h.bf16 %v3537_v34  ;;  %v3538_v50 = vunpack.i.l.bf16 %v3537_v34  ;;  %v5825_v34 = vpop.f32.mrf.mxu1 }
 0x82e   : > { %v1681_v53 = vadd.f32 %v1680_v25, %v1679_v14  ;;  %v3531_v14 = vunpack.i.h.bf16 %v3527_v26  ;;  %v3518_v25 = vunpack.i.l.bf16 %v3517_v1  ;;  %v5827_v63 = vpop.f32.mrf.mxu1  ;;  %v3503_v26 = vunpack.i.l.bf16 %v5805_v32 }
 0x82f   : > { %v3542_v17 = vpop.trf.xlu1 }
 0x830   : > { %v3546_v60 = vunpack.i.h.bf16 %v3542_v17  ;;  %v3543_v51 = vunpack.i.l.bf16 %v3542_v17  ;;  %v1682_v9 = vrot.slane %v1681_v53, 1  ;;  %v2614_v17 = vpack.c.bf16 %v3536_v58, %v3531_v14  ;;  %v1973_v21 = vpop.f32.mrf.mxu1 }
 0x831   : > { %v2621_v27 = vpack.c.bf16 %v3523_v19, %v3518_v25  ;;  %v6228_v25 = vpack.c.bf16 %v5786_v59, %v5784_v0  ;;  %v2631_v0 = vpack.c.bf16 %v1973_v21, %v5825_v34  ;;  %v6237_v59 = vld [vmem:[#allocation21_spill] sm:$0xff] }
 0x832   : > { %v2623_v43 = vpack.c.bf16 %v3543_v51, %v3538_v50  ;;  %v2615_v37 = vpack.c.bf16 %v3546_v60, %v3541_v28  ;;  %v1683_v57 = vadd.f32 %v1682_v9, %v1681_v53  ;;  %v3521_v50 = vunpack.i.h.bf16 %v3517_v1 }
 0x833   : > { %v3508_v28 = vunpack.i.l.bf16 %v3507_v41  ;;  %v3516_v53 = vunpack.i.h.bf16 %v3512_v20  ;;  %v3511_v51 = vunpack.i.h.bf16 %v3507_v41  ;;  %v3498_v9 = vunpack.i.l.bf16 %v5803_v44  ;;  %v5835_v20 = vpop.f32.mrf.mxu1 }
 0x834   : > { %3205 = vmatprep.subr.bf16.mxu0 %v2623_v43  ;;  %3269 = vpush %v1683_v57  ;;  %v2613_v60 = vpack.c.bf16 %v3526_v7, %v3521_v50  ;;  %v3493_v1 = vunpack.i.l.bf16 %v5801_v36  ;;  %v3488_v7 = vunpack.i.l.bf16 %v5799_v62  ;;  %v3491_v57 = vunpack.i.h.bf16 %v5799_v62 }
 0x835   : > { %3206 = vmatpush3.bf16.msra.mxu0 %v2615_v37  ;;  %v2620_v47 = vpack.c.bf16 %v3513_v5, %v3508_v28  ;;  %v2612_v43 = vpack.c.bf16 %v3516_v53, %v3511_v51  ;;  %v2619_v37 = vpack.c.bf16 %v3503_v26, %v3498_v9  ;;  %v3496_v5 = vunpack.i.h.bf16 %v5801_v36  ;;  %v1979_v32 = vpop.f32.mrf.mxu1  ;;  %v6248_v28 = vld [vmem:[#allocation34_spill] sm:$0xff]  ;;  %v6249_v53 = vld [vmem:[#allocation29_spill] sm:$0xff] }
 0x836   : > { %3207 = vmatprep.subr.bf16.mxu0 %v2622_v22  ;;  %v2618_v58 = vpack.c.bf16 %v3493_v1, %v3488_v7  ;;  %v2627_v36 = vpack.c.bf16 %v5813_v4, %v5809_v3  ;;  %v6227_v62 = vpack.c.bf16 %v5595_v30, %v5592_v54  ;;  %v2629_v54 = vpack.c.bf16 %v5821_v29, %v5817_v33  ;;  %v6240_v3 = vld [vmem:[#allocation28_spill] sm:$0xff]  ;;  %v6246_v33 = vld [vmem:[#allocation6_spill] sm:$0xff]  ;;  %v6258_v7 = vld [vmem:[#allocation23_spill] sm:$0xff] }
 0x837   : > { %v2610_v19 = vpack.c.bf16 %v3496_v5, %v3491_v57  ;;  %v2626_v30 = vpack.c.bf16 %v5811_v40, %v5807_v12  ;;  %v2630_v50 = vpack.c.bf16 %v5827_v63, %v5823_v6  ;;  %v6252_v9 = vld [vmem:[#allocation30_spill] sm:$0xff] }
 0x839   : > { %3208 = vmatpush3.bf16.msra.mxu0 %v2614_v17 }
 0x83a   : > { %3209 = vmatprep.subr.bf16.mxu0 %v2621_v27  ;;  %v3501_v27 = vunpack.i.h.bf16 %v5803_v44  ;;  %v1981_v44 = vpop.f32.mrf.mxu1 }
 0x83c   : > { %v2611_v41 = vpack.c.bf16 %v3506_v11, %v3501_v27  ;;  %v1983_v22 = vpop.f32.mrf.mxu1  ;;  %v6255_v11 = vld [vmem:[#allocation33_spill] sm:$0xff]  ;;  %v6257_v27 = vld [vmem:[#allocation22_spill] sm:$0xff] }
 0x83d   : > { %3210 = vmatpush3.bf16.msra.mxu0 %v2613_v60  ;;  %v2633_v29 = vpack.c.bf16 %v1983_v22, %v1979_v32  ;;  %v6250_v60 = vpack.c.bf16 %v6248_v28, %v6249_v53  ;;  %v6259_v5 = vpack.c.bf16 %v6257_v27, %v6258_v7  ;;  %v3913_v7 = vld [vmem:[%s6052_s6 + $0x30] sm:$0xff] }
 0x83e   : > { %3211 = vmatprep.subr.bf16.mxu0 %v2620_v47  ;;  %v1987_v14 = vpop.f32.mrf.mxu1 }
 0x841   : > { %3212 = vmatpush3.bf16.msra.mxu0 %v2612_v43 }
 0x842   : > { %3213 = vmatprep.subr.bf16.mxu0 %v2619_v37 }
 0x845   : > { %3214 = vmatpush3.bf16.msra.mxu0 %v2611_v41 }
 0x846   : > { %3215 = vmatprep.subr.bf16.mxu0 %v2618_v58  ;;  %v2632_v58 = vpack.c.bf16 %v1981_v44, %v5835_v20  ;;  %v6260_v44 = vmov 0  }
 0x849   : > { %3216 = vmatpush3.bf16.msra.mxu0 %v2610_v19 }
 0x84a   : > { %3217 = vmatprep.subr.bf16.mxu0 %v5795_v38  ;;  %v6229_v38 = vpack.c.bf16 %v5579_v52, %v5576_v35  ;;  %v6232_v35 = vpack.c.bf16 %v5547_v55, %v5544_v46  ;;  %v2628_v46 = vpack.c.bf16 %v5819_v24, %v5815_v15  ;;  %v6236_v55 = vld [vmem:[#allocation26_spill] sm:$0xff]  ;;  %v6245_v15 = vld [vmem:[#allocation7_spill] sm:$0xff] }
 0x84b   : > { %v6238_v12 = vpack.c.bf16 %v6236_v55, %v6237_v59  ;;  %v6247_v24 = vpack.c.bf16 %v6245_v15, %v6246_v33  ;;  %v3907_v59 = vld [vmem:[%s6052_s6] sm:$0xff]  ;;  %v3909_v15 = vld [vmem:[%s6052_s6 + $0x10] sm:$0xff] }
 0x84d   : > { %3218 = vmatpush3.bf16.msra.mxu0 %v5797_v56  ;;  %v6231_v56 = vpack.c.bf16 %v5585_v23, %v5582_v8  ;;  %v6234_v23 = vpack.c.bf16 %v5553_v45, %v5550_v2  ;;  %v6242_v45 = vld [vmem:[#allocation5_spill] sm:$0xff] }
 0x84e   : > { %3219 = vmatprep.subr.bf16.mxu0 %v5791_v49  ;;  %v6230_v49 = vpack.c.bf16 %v5601_v31, %v5598_v39  ;;  %v6233_v39 = vpack.c.bf16 %v5525_v13, %v5522_v10  ;;  %v6235_v31 = vpack.c.bf16 %v5531_v61, %v5528_v42  ;;  %v6239_v13 = vld [vmem:[#allocation27_spill] sm:$0xff]  ;;  %v6243_v42 = vld [vmem:[#allocation25_spill] sm:$0xff] }
 0x84f   : > { %v6241_v2 = vpack.c.bf16 %v6239_v13, %v6240_v3  ;;  %v6244_v61 = vpack.c.bf16 %v6242_v45, %v6243_v42 }
 0x851   : > { %3220 = vmatpush3.bf16.msra.mxu0 %v5793_v48  ;;  %v1989_v48 = vpop.f32.mrf.mxu1 }
 0x852   : > { %2777 = vmatprep.subr.bf16.mxu0 %v6227_v62 }
 0x853   : > { %v1991_v52 = vpop.f32.mrf.mxu1 }
 0x854   : > { %2673 = vmatmul.mubr.bf16.vlgmr.msra.gmra.mxu0 %v6228_v25  ;;  %v2634_v22 = vpack.c.bf16 %v1991_v52, %v1987_v14  ;;  %v359_v25 = vld [vmem:[%s6050_s4] sm:$0xf] }
 0x855   : > { %2778 = vmatpush1.bf16.msra.mxu0 %v6229_v38  ;;  %2680 = vmatprep.mubr.bf16.mxu0 %v2627_v36  ;;  %v1993_v8 = vpop.f32.mrf.mxu1 }
 0x856   : > { %2779 = vmatprep.subr.bf16.mxu0 %v6230_v49  ;;  %v2635_v41 = vpack.c.bf16 %v1993_v8, %v1989_v48  ;;  %1713 = vperm.xlu1 %3548, %v359_v25  }
 0x857   : > { %v1997_v10 = vpop.f32.mrf.mxu1 }
 0x859   : > { %2780 = vmatpush1.bf16.msra.mxu0 %v6231_v56  ;;  %v1999_v40 = vpop.f32.mrf.mxu1 }
 0x85a   : > { %2781 = vmatprep.subr.bf16.mxu0 %v6232_v35 }
 0x85b   : > { %v2001_v26 = vpop.f32.mrf.mxu1 }
 0x85c   : > { %2681 = vmatmul.mubr.bf16.gmra.mxu0 %v2626_v30  ;;  %v2636_v49 = vpack.c.bf16 %v2001_v26, %v1997_v10  ;;  %v3908_v10 = vld [vmem:[%s6052_s6 + $0x8] sm:$0xff] }
 0x85d   : > { %2782 = vmatpush1.bf16.msra.mxu0 %v6233_v39  ;;  %2688 = vmatprep.mubr.bf16.mxu0 %v2629_v54  ;;  %v2003_v1 = vpop.f32.mrf.mxu1 }
 0x85e   : > { %2783 = vmatprep.subr.bf16.mxu0 %v6234_v23  ;;  %v2637_v19 = vpack.c.bf16 %v2003_v1, %v1999_v40 }
 0x85f   : > { %v2007_v57 = vpop.f32.mrf.mxu1 }
 0x861   : > { %2784 = vmatpush1.bf16.msra.mxu0 %v6235_v31  ;;  %v2009_v32 = vpop.f32.mrf.mxu1 }
 0x862   : > { %2785 = vmatprep.subr.bf16.mxu0 %v6238_v12 }
 0x863   : > { %v2011_v36 = vpop.f32.mrf.mxu1 }
 0x864   : > { %2689 = vmatmul.mubr.bf16.gmra.mxu0 %v2628_v46  ;;  %v2638_v20 = vpack.c.bf16 %v2011_v36, %v2007_v57 }
 0x865   : > { %2786 = vmatpush1.bf16.msra.mxu0 %v6241_v2  ;;  %2696 = vmatprep.mubr.bf16.mxu0 %v2631_v0  ;;  %s3270_s19 = spop %3269  ;;  %v2013_v62 = vpop.f32.mrf.mxu1 }
 0x866   : > { %2787 = vmatprep.subr.bf16.mxu0 %v6244_v61  ;;  %s1685_s20 = smul.f32 0.0009765625, %s3270_s19  ;;  %v2639_v38 = vpack.c.bf16 %v2013_v62, %v2009_v32  ;;  %s6006_s19 = scalar_lea.sflag [#allocation3], %s272_s21 }
 0x868   : > { %v1686_v4 = vstv %s1685_s20  ;;  %s3923_s20 = scalar_lea.vmem %s6002_s15, 256 }
 0x869   : > { %2788 = vmatpush1.bf16.msra.mxu0 %v6247_v24  ;;  %v5892_v34 = vsub.f32 %v5762_v16, %v1686_v4  ;;  %v5895_v17 = vsub.f32 %v5766_v18, %v1686_v4  ;;  %v6251_v16 = vld [vmem:[#allocation32_spill] sm:$0xff]  ;;  %p3924_p11 = scmp.ne.s32.totalorder %s6002_s15, %s3923_s20 }
 0x86a   : > { %2789 = vmatprep.subr.bf16.mxu0 %v6250_v60  ;;  %v6253_v21 = vpack.c.bf16 %v6251_v16, %v6252_v9  ;;  %v6254_v18 = vld [vmem:[#allocation24_spill] sm:$0xff]  ;;  %v3911_v16 = vld [vmem:[%s6052_s6 + $0x20] sm:$0xff] }
 0x86b   : > { %v1689_v47 = vmul.f32 %v5892_v34, %v5892_v34  ;;  %v1690_v51 = vmul.f32 %v5895_v17, %v5895_v17  ;;  %v6256_v6 = vpack.c.bf16 %v6254_v18, %v6255_v11  ;;  %v3910_v24 = vld [vmem:[%s6052_s6 + $0x18] sm:$0xff]  ;;  %p3925_p12 = pnand %p3924_p11, %p4067_p5 }
 0x86c   : > { %2697 = vmatmul.mubr.bf16.gmra.mxu0 %v2630_v50 }
 0x86d   : > { %2790 = vmatpush1.bf16.msra.mxu0 %v6253_v21  ;;  %2704 = vmatprep.mubr.bf16.mxu0 %v2633_v29  ;;  %v1691_v63 = vsel %vm1672_vm2, %v1689_v47, 0.0  ;;  %v1692_v43 = vsel %vm1672_vm2, %v1690_v51, 0.0  ;;  %v3912_v21 = vld [vmem:[%s6052_s6 + $0x28] sm:$0xff]  ;;  %p3926_p13 = pneg %p3925_p12 }
 0x86e   : > { %2791 = vmatprep.subr.bf16.mxu0 %v6256_v6  ;;  %v1693_v37 = vadd.f32 %v1692_v43, %v1691_v63 }
 0x870   : > { %1694 = vadd.xlane.f32.xlu0 %v1693_v37 }
 0x871   : > { %2792 = vmatpush1.bf16.msra.mxu0 %v6259_v5 }
 0x874   : > { %2705 = vmatmul.mubr.bf16.gmra.mxu0 %v2632_v58 }
 0x875   : > { %2712 = vmatprep.mubr.bf16.mxu0 %v2635_v41  ;;  %v3914_v41 = vld [vmem:[%s6052_s6 + $0x38] sm:$0xff] }
 0x87c   : > { %2713 = vmatmul.mubr.bf16.gmra.mxu0 %v2634_v22 }
 0x87d   : > { %2720 = vmatprep.mubr.bf16.mxu0 %v2637_v19 }
 0x884   : > { %2721 = vmatmul.mubr.bf16.gmra.mxu0 %v2636_v49 }
 0x885   : > { %2728 = vmatprep.mubr.bf16.mxu0 %v2639_v38  ;;  %v3915_v38 = vld [vmem:[%s6052_s6 + $0x40] sm:$0xff] }
 0x88c   : > { %2729 = vmatmul.mubr.bf16.gmra.mxu0 %v2638_v20 }
 0x88d   : > { %2809 = vmatprep.mubr.bf16.mxu0 %v6260_v44 }
 0x8f9   : > { %v1695_v48 = vpop.xlane.xlu0 %1694 }
 0x8fa   : > { %v1696_v56 = vrot.slane %v1695_v48, 4 }
 0x8fc   : > { %v1697_v14 = vadd.f32 %v1696_v56, %v1695_v48  ;;  %v3916_v48 = vld [vmem:[%s6052_s6 + $0x48] sm:$0xff] }
 0x8fe   : > { %v1698_v54 = vrot.slane %v1697_v14, 2 }
 0x900   : > { %v1699_v30 = vadd.f32 %v1698_v54, %v1697_v14 }
 0x902   : > { %v1700_v35 = vrot.slane %v1699_v30, 1 }
 0x904   : > { %v1701_v52 = vadd.f32 %v1700_v35, %v1699_v30 }
 0x906   : > { %3271 = vpush %v1701_v52 }
 0x914   : > { %v3221_v39 = vpop.f32.mrf.mxu0 }
 0x916   : > { %v3222_v23 = vpop.f32.mrf.mxu0 }
 0x917   : > { %v3223_v31 = vadd.f32 %v3222_v23, %v3221_v39 }
 0x918   : > { %v3224_v8 = vpop.f32.mrf.mxu0 }
 0x919   : > { %v2737_v12 = vmul.f32 %v3907_v59, %v3223_v31 }
 0x91a   : > { %v3225_v0 = vpop.f32.mrf.mxu0 }
 0x91b   : > { %v3226_v46 = vadd.f32 %v3225_v0, %v3224_v8  ;;  %v3917_v8 = vld [vmem:[%s6052_s6 + $0x50] sm:$0xff]  ;;  %v3918_v0 = vld [vmem:[%s6052_s6 + $0x58] sm:$0xff] }
 0x91c   : > { %v3227_v55 = vpop.f32.mrf.mxu0 }
 0x91d   : > { %v2738_v13 = vmul.f32 %v3908_v10, %v3226_v46 }
 0x91e   : > { %v3228_v3 = vpop.f32.mrf.mxu0 }
 0x91f   : > { %v2753_v2 = vpack.c.bf16 %v2738_v13, %v2737_v12  ;;  %v3229_v42 = vadd.f32 %v3228_v3, %v3227_v55 }
 0x920   : > { %v3230_v45 = vpop.f32.mrf.mxu0 }
 0x921   : > { %2810 = vmatmul.mubr.bf16.vlgmr.msra.gmra.mxu0 %v2753_v2  ;;  %v2739_v33 = vmul.f32 %v3909_v15, %v3229_v42  ;;  %v3919_v42 = vld [vmem:[%s6052_s6 + $0x60] sm:$0xff] }
 0x922   : > { %v3231_v61 = vpop.f32.mrf.mxu0  ;;  %2819 = vmatprep.mubr.bf16.mxu0 %v6260_v44 }
 0x923   : > { %v3232_v40 = vadd.f32 %v3231_v61, %v3230_v45 }
 0x924   : > { %v3233_v4 = vpop.f32.mrf.mxu0 }
 0x925   : > { %v2740_v29 = vmul.f32 %v3910_v24, %v3232_v40  ;;  %v3920_v40 = vld [vmem:[%s6052_s6 + $0x68] sm:$0xff] }
 0x926   : > { %v3234_v50 = vpop.f32.mrf.mxu0 }
 0x927   : > { %v2754_v28 = vpack.c.bf16 %v2740_v29, %v2739_v33  ;;  %v3235_v60 = vadd.f32 %v3234_v50, %v3233_v4 }
 0x928   : > { %v3236_v53 = vpop.f32.mrf.mxu0 }
 0x929   : > { %2820 = vmatmul.mubr.bf16.gmra.mxu0 %v2754_v28  ;;  %v2741_v9 = vmul.f32 %v3911_v16, %v3235_v60 }
 0x92a   : > { %v3237_v26 = vpop.f32.mrf.mxu0  ;;  %2829 = vmatprep.mubr.bf16.mxu0 %v6260_v44 }
 0x92b   : > { %v3238_v47 = vadd.f32 %v3237_v26, %v3236_v53  ;;  %v3921_v53 = vld [vmem:[%s6052_s6 + $0x70] sm:$0xff]  ;;  %v3922_v26 = vld [vmem:[%s6052_s6 + $0x78] sm:$0xff] }
 0x92c   : > { %v3239_v51 = vpop.f32.mrf.mxu0 }
 0x92d   : > { %v2742_v18 = vmul.f32 %v3912_v21, %v3238_v47 }
 0x92e   : > { %v3240_v11 = vpop.f32.mrf.mxu0 }
 0x92f   : > { %v2755_v6 = vpack.c.bf16 %v2742_v18, %v2741_v9  ;;  %v3241_v43 = vadd.f32 %v3240_v11, %v3239_v51 }
 0x930   : > { %v3242_v63 = vpop.f32.mrf.mxu0 }
 0x931   : > { %2830 = vmatmul.mubr.bf16.gmra.mxu0 %v2755_v6  ;;  %v2743_v5 = vmul.f32 %v3913_v7, %v3241_v43 }
 0x932   : > { %v3243_v1 = vpop.f32.mrf.mxu0  ;;  %2839 = vmatprep.mubr.bf16.mxu0 %v6260_v44 }
 0x933   : > { %v3244_v37 = vadd.f32 %v3243_v1, %v3242_v63 }
 0x934   : > { %v3245_v27 = vpop.f32.mrf.mxu0 }
 0x935   : > { %v2744_v58 = vmul.f32 %v3914_v41, %v3244_v37 }
 0x936   : > { %v3246_v57 = vpop.f32.mrf.mxu0 }
 0x937   : > { %v2756_v32 = vpack.c.bf16 %v2744_v58, %v2743_v5  ;;  %s3272_s8 = spop %3271  ;;  %v3247_v22 = vadd.f32 %v3246_v57, %v3245_v27 }
 0x938   : > { %v3248_v19 = vpop.f32.mrf.mxu0  ;;  %s1703_s9 = smul.f32 0.0009765625, %s3272_s8 }
 0x939   : > { %2840 = vmatmul.mubr.bf16.gmra.mxu0 %v2756_v32  ;;  %v2745_v49 = vmul.f32 %v3915_v38, %v3247_v22 }
 0x93a   : > { %v3249_v36 = vpop.f32.mrf.mxu0  ;;  %2849 = vmatprep.mubr.bf16.mxu0 %v6260_v44  ;;  %s1704_s13 = sadd.f32 1e-05, %s1703_s9 }
 0x93b   : > { %v3250_v62 = vadd.f32 %v3249_v36, %v3248_v19 }
 0x93c   : > { %v3251_v25 = vpop.f32.mrf.mxu0  ;;  %v1705_v20 = vstv %s1704_s13 }
 0x93d   : > { %v2746_v56 = vmul.f32 %v3916_v48, %v3250_v62  ;;  %3903 = vrsqrt.f32 %v1705_v20 }
 0x93e   : > { %v3252_v14 = vpop.f32.mrf.mxu0 }
 0x93f   : > { %v2757_v54 = vpack.c.bf16 %v2746_v56, %v2745_v49  ;;  %v3253_v35 = vadd.f32 %v3252_v14, %v3251_v25 }
 0x940   : > { %v3254_v30 = vpop.f32.mrf.mxu0 }
 0x941   : > { %2850 = vmatmul.mubr.bf16.gmra.mxu0 %v2757_v54  ;;  %v2747_v31 = vmul.f32 %v3917_v8, %v3253_v35 }
 0x942   : > { %v3255_v52 = vpop.f32.mrf.mxu0  ;;  %2859 = vmatprep.mubr.bf16.mxu0 %v6260_v44 }
 0x943   : > { %v3256_v39 = vadd.f32 %v3255_v52, %v3254_v30 }
 0x944   : > { %v3257_v23 = vpop.f32.mrf.mxu0 }
 0x945   : > { %v2748_v46 = vmul.f32 %v3918_v0, %v3256_v39 }
 0x946   : > { %v3258_v55 = vpop.f32.mrf.mxu0 }
 0x947   : > { %v2758_v59 = vpack.c.bf16 %v2748_v46, %v2747_v31  ;;  %v3259_v10 = vadd.f32 %v3258_v55, %v3257_v23 }
 0x948   : > { %v3260_v12 = vpop.f32.mrf.mxu0 }
 0x949   : > { %2860 = vmatmul.mubr.bf16.gmra.mxu0 %v2758_v59  ;;  %v2749_v61 = vmul.f32 %v3919_v42, %v3259_v10 }
 0x94a   : > { %v3261_v13 = vpop.f32.mrf.mxu0  ;;  %2869 = vmatprep.mubr.bf16.mxu0 %v6260_v44  ;;  %v3904_v3 = vpop.eup %3903 }
 0x94b   : > { %v3262_v2 = vadd.f32 %v3261_v13, %v3260_v12  ;;  %3273 = vpush %v3904_v3 }
 0x94c   : > { %v3263_v45 = vpop.f32.mrf.mxu0 }
 0x94d   : > { %v2750_v4 = vmul.f32 %v3920_v40, %v3262_v2 }
 0x94e   : > { %v3264_v15 = vpop.f32.mrf.mxu0 }
 0x94f   : > { %v2759_v33 = vpack.c.bf16 %v2750_v4, %v2749_v61  ;;  %v3265_v29 = vadd.f32 %v3264_v15, %v3263_v45  ;;  %v6261_v61 = vld [vmem:[#allocation31_spill] sm:$0xff]  ;;  %v6262_v4 = vld [vmem:[#allocation8_spill] sm:$0xff] }
 0x950   : > { %v3266_v24 = vpop.f32.mrf.mxu0 }
 0x951   : > { %2870 = vmatmul.mubr.bf16.gmra.mxu0 %v2759_v33  ;;  %v2751_v60 = vmul.f32 %v3921_v53, %v3265_v29 }
 0x952   : > { %v3267_v50 = vpop.f32.mrf.mxu0  ;;  %2879 = vmatprep.mubr.bf16.mxu0 %v6260_v44 }
 0x953   : > { %v3268_v28 = vadd.f32 %v3267_v50, %v3266_v24 }
 0x955   : > { %v2752_v47 = vmul.f32 %v3922_v26, %v3268_v28 }
 0x957   : > { %v2760_v51 = vpack.c.bf16 %v2752_v47, %v2751_v60 }
 0x959   : > { %2880 = vmatmul.mubr.bf16.gmra.mxu0 %v2760_v51 }
 0x95a   : > { %2938 = vmatprep.mubr.bf16.mxu0 %v6260_v44 }
 0x97c   : > { %s3274_s16 = spop %3273 }
 0x9e1   : > { %v5978_v16 = vpop.f32.mrf.mxu0 }
 0x9e3   : > { %v2813_v9 = vpop.f32.mrf.mxu0 }
 0x9e5   : > { %v2815_v21 = vpop.f32.mrf.mxu0 }
 0x9e6   : > { %v2890_v18 = vpack.c.bf16 %v2815_v21, %v5978_v16 }
 0x9e7   : > { %v2817_v11 = vpop.f32.mrf.mxu0 }
 0x9e8   : > { %v2891_v6 = vpack.c.bf16 %v2817_v11, %v2813_v9 }
 0x9e9   : > { %v2821_v63 = vpop.f32.mrf.mxu0 }
 0x9eb   : > { %v2823_v43 = vpop.f32.mrf.mxu0 }
 0x9ed   : > { %v2825_v1 = vpop.f32.mrf.mxu0 }
 0x9ee   : > { %v2892_v37 = vpack.c.bf16 %v2825_v1, %v2821_v63 }
 0x9ef   : > { %v2827_v27 = vpop.f32.mrf.mxu0 }
 0x9f0   : > { %v2893_v7 = vpack.c.bf16 %v2827_v27, %v2823_v43 }
 0x9f1   : > { %v2831_v5 = vpop.f32.mrf.mxu0 }
 0x9f3   : > { %v2833_v41 = vpop.f32.mrf.mxu0 }
 0x9f5   : > { %v2835_v58 = vpop.f32.mrf.mxu0 }
 0x9f6   : > { %v2894_v42 = vpack.c.bf16 %v2835_v58, %v2831_v5  ;;  %v360_v5 = vld [vmem:[%s6051_s5] sm:$0xf] }
 0x9f7   : > { %v2837_v57 = vpop.f32.mrf.mxu0 }
 0x9f8   : > { %v2895_v45 = vpack.c.bf16 %v2837_v57, %v2833_v41  ;;  %v1708_v41 = vstv %s3274_s16 }
 0x9f9   : > { %v2841_v32 = vpop.f32.mrf.mxu0 }
 0x9fb   : > { %v2843_v44 = vpop.f32.mrf.mxu0 }
 0x9fd   : > { %v2845_v19 = vpop.f32.mrf.mxu0 }
 0x9fe   : > { %v2896_v2 = vpack.c.bf16 %v2845_v19, %v2841_v32  ;;  %v1709_v32 = vmul.f32 %v1708_v41, %v5892_v34 }
 0x9ff   : > { %v2847_v22 = vpop.f32.mrf.mxu0 }
 0xa00   : > { %v2897_v3 = vpack.c.bf16 %v2847_v22, %v2843_v44  ;;  %v1710_v44 = vmul.f32 %v1708_v41, %v5895_v17  ;;  %v1714_v22 = vpop.permute.xlu1 %1713 }
 0xa01   : > { %v2851_v36 = vpop.f32.mrf.mxu0 }
 0xa03   : > { %v2853_v62 = vpop.f32.mrf.mxu0 }
 0xa05   : > { %v2855_v25 = vpop.f32.mrf.mxu0 }
 0xa06   : > { %v2898_v13 = vpack.c.bf16 %v2855_v25, %v2851_v36  ;;  %v1717_v25 = vmul.f32 %v1714_v22, %v1710_v44 }
 0xa07   : > { %v2857_v38 = vpop.f32.mrf.mxu0 }
 0xa08   : > { %v2899_v10 = vpack.c.bf16 %v2857_v38, %v2853_v62  ;;  %v1716_v62 = vmul.f32 %v1714_v22, %v1709_v32 }
 0xa09   : > { %v2861_v49 = vpop.f32.mrf.mxu0 }
 0xa0b   : > { %v2863_v20 = vpop.f32.mrf.mxu0 }
 0xa0d   : > { %v2865_v48 = vpop.f32.mrf.mxu0 }
 0xa0e   : > { %v2900_v12 = vpack.c.bf16 %v2865_v48, %v2861_v49 }
 0xa0f   : > { %v2867_v56 = vpop.f32.mrf.mxu0 }
 0xa10   : > { %v2901_v59 = vpack.c.bf16 %v2867_v56, %v2863_v20 }
 0xa11   : > { %v2871_v14 = vpop.f32.mrf.mxu0 }
 0xa13   : > { %v2873_v54 = vpop.f32.mrf.mxu0 }
 0xa15   : > { %v2875_v30 = vpop.f32.mrf.mxu0 }
 0xa16   : > { %v2902_v55 = vpack.c.bf16 %v2875_v30, %v2871_v14 }
 0xa17   : > { %v2877_v35 = vpop.f32.mrf.mxu0 }
 0xa18   : > { %v2903_v46 = vpack.c.bf16 %v2877_v35, %v2873_v54 }
 0xa19   : > { %v2881_v52 = vpop.f32.mrf.mxu0 }
 0xa1b   : > { %v2883_v39 = vpop.f32.mrf.mxu0 }
 0xa1d   : > { %v2885_v23 = vpop.f32.mrf.mxu0 }
 0xa1e   : > { %v2904_v0 = vpack.c.bf16 %v2885_v23, %v2881_v52 }
 0xa1f   : > { %v2887_v8 = vpop.f32.mrf.mxu0 }
 0xa20   : > { %v2905_v31 = vpack.c.bf16 %v2887_v8, %v2883_v39 }
 0xa22   : > { %2906 = vmatprep.subr.bf16.mxu0 %v2905_v31 }
 0xa23   : > { %2907 = vmatpush1.bf16.msra.mxu0 %v2904_v0 }
 0xa24   : > { %2908 = vmatprep.subr.bf16.mxu0 %v2903_v46 }
 0xa27   : > { %2909 = vmatpush1.bf16.msra.mxu0 %v2902_v55 }
 0xa28   : > { %2910 = vmatprep.subr.bf16.mxu0 %v2901_v59 }
 0xa2b   : > { %2911 = vmatpush1.bf16.msra.mxu0 %v2900_v12 }
 0xa2c   : > { %2912 = vmatprep.subr.bf16.mxu0 %v2899_v10 }
 0xa2f   : > { %2913 = vmatpush1.bf16.msra.mxu0 %v2898_v13 }
 0xa30   : > { %2914 = vmatprep.subr.bf16.mxu0 %v2897_v3 }
 0xa33   : > { %2915 = vmatpush1.bf16.msra.mxu0 %v2896_v2 }
 0xa34   : > { %2916 = vmatprep.subr.bf16.mxu0 %v2895_v45 }
 0xa37   : > { %2917 = vmatpush1.bf16.msra.mxu0 %v2894_v42 }
 0xa38   : > { %2918 = vmatprep.subr.bf16.mxu0 %v2893_v7 }
 0xa3b   : > { %2919 = vmatpush1.bf16.msra.mxu0 %v2892_v37 }
 0xa3c   : > { %2920 = vmatprep.subr.bf16.mxu0 %v2891_v6 }
 0xa3f   : > { %2921 = vmatpush1.bf16.msra.mxu0 %v2890_v18 }
 0xa42   : > { %2939 = vmatmul.mubr.bf16.vlgmr.msra.gmra.mxu0 %v6261_v61 }
 0xb02   : > { %v2940_v40 = vpop.f32.mrf.mxu0 }
 0xb03   : > { %v2941_v15 = vadd.f32 %v2940_v40, %v6262_v4 }
 0xb04   : > { %v2942_v33 = vpop.f32.mrf.mxu0 }
 0xb05   : > { %v2943_v24 = vadd.f32 %v2942_v33, %v6262_v4  ;;  %v2947_v50 = vsel %vm1672_vm2, %v2941_v15, 0.0 }
 0xb06   : > { %v2944_v29 = vpop.f32.mrf.mxu0 }
 0xb07   : > { %v2948_v28 = vsel %vm1672_vm2, %v2943_v24, 0.0 }
 0xb08   : > { %v2949_v53 = vadd.f32 %v2948_v28, %v2947_v50  ;;  %v2945_v60 = vpop.f32.mrf.mxu0 }
 0xb0a   : > { %2950 = vadd.xlane.f32.xlu0 %v2949_v53 }
 0xb93   : > { %v2951_v26 = vpop.xlane.xlu0 %2950 }
 0xb94   : > { %v2952_v47 = vrot.slane %v2951_v26, 4 }
 0xb96   : > { %v2953_v51 = vadd.f32 %v2952_v47, %v2951_v26 }
 0xb98   : > { %v2954_v16 = vrot.slane %v2953_v51, 2 }
 0xb9a   : > { %v2955_v9 = vadd.f32 %v2954_v16, %v2953_v51 }
 0xb9c   : > { %v2956_v21 = vrot.slane %v2955_v9, 1 }
 0xb9e   : > { %v2957_v18 = vadd.f32 %v2956_v21, %v2955_v9 }
 0xba0   : > { %3275 = vpush %v2957_v18 }
 0xbd1   : > { %s3276_s17 = spop %3275 }
 0xbd2   : > { %s2959_s18 = smul.f32 0.0009765625, %s3276_s17 }
 0xbd4   : > { %v2960_v11 = vstv %s2959_s18  ;;  %s6000_s18 = scalar_lea.hbm %s6053_s7, %s3140_s14 }
 0xbd5   : > { %v2961_v6 = vsub.f32 %v2941_v15, %v2960_v11  ;;  %v2962_v63 = vsub.f32 %v2943_v24, %v2960_v11 }
 0xbd7   : > { %v2963_v43 = vmul.f32 %v2961_v6, %v2961_v6  ;;  %v2964_v1 = vmul.f32 %v2962_v63, %v2962_v63 }
 0xbd9   : > { %v2965_v37 = vsel %vm1672_vm2, %v2963_v43, 0.0  ;;  %v2966_v27 = vsel %vm1672_vm2, %v2964_v1, 0.0 }
 0xbda   : > { %v2967_v7 = vadd.f32 %v2966_v27, %v2965_v37 }
 0xbdc   : > { %2968 = vadd.xlane.f32.xlu0 %v2967_v7 }
 0xbf2   : > { %1720 = vperm.xlu0 %3547, %v360_v5  }
 0xc65   : > { %v2969_v58 = vpop.xlane.xlu0 %2968 }
 0xc66   : > { %v2970_v57 = vrot.slane %v2969_v58, 4 }
 0xc68   : > { %v2971_v19 = vadd.f32 %v2970_v57, %v2969_v58 }
 0xc6a   : > { %v2972_v36 = vrot.slane %v2971_v19, 2 }
 0xc6c   : > { %v2973_v38 = vadd.f32 %v2972_v36, %v2971_v19 }
 0xc6d   : > { %v1721_v49 = vpop.permute.xlu0 %1720 }
 0xc6e   : > { %v1723_v20 = vadd.f32 %v1721_v49, %v1716_v62  ;;  %v1724_v48 = vadd.f32 %v1721_v49, %v1717_v25  ;;  %v2974_v56 = vrot.slane %v2973_v38, 1 }
 0xc70   : > { %v1727_v14 = vcombine.low %v1723_v20, %v1724_v48  ;;  %v2975_v54 = vadd.f32 %v2974_v56, %v2973_v38 }
 0xc72   : > { %1729 = vst [vmem:[%s274_s23] sm:$0xff] %v1727_v14  ;;  %3277 = vpush %v2975_v54 }
 0xca3   : > { %s3278_s29 = spop %3277 }
 0xca4   : > { %s2977_s8 = smul.f32 0.0009765625, %s3278_s29  ;;  %s3929_s29 = scalar_lea.vmem %s3928_s22, 512 }
 0xca5   : > { %p3931_p1 = scmp.lt.s32.totalorder %s3929_s29, %s3923_s20 }
 0xca6   : > { %s2978_s9 = sadd.f32 1e-05, %s2977_s8 }
 0xca7   : > { %p3932_p2 = por %p3931_p1, %p3930_p0 }
 0xca8   : > { %v2979_v34 = vstv %s2978_s9 }
 0xca9   : > { %3905 = vrsqrt.f32 %v2979_v34  ;;  %p3933_p3 = pnand %p3932_p2, %p3926_p13 }
 0xcb6   : > { %v3906_v17 = vpop.eup %3905 }
 0xcb7   : > { %3279 = vpush %v3906_v17 }
 0xce8   : > { %s3280_s13 = spop %3279 }
 0xce9   : > { %v2982_v30 = vstv %s3280_s13 }
 0xcea   : > { %v2983_v35 = vmul.f32 %v2982_v30, %v2961_v6  ;;  %v2984_v52 = vmul.f32 %v2982_v30, %v2962_v63 }
 0xcec   : > { %v2985_v39 = vmul.f32 %v2983_v35, %v1714_v22  ;;  %v2986_v23 = vmul.f32 %v2984_v52, %v1714_v22 }
 0xcee   : > { %v2987_v8 = vadd.f32 %v2985_v39, %v1721_v49  ;;  %v2988_v31 = vadd.f32 %v2986_v23, %v1721_v49 }
 0xcf0   : > { %v2991_v0 = vcombine.low %v2987_v8, %v2988_v31 }
 0xcf2   : > { %3131 = vst [vmem:[%s274_s23 + $0x8] sm:$0xff] %v2991_v0 }
 0xcf3   : > { %3936 = shalt.err (!%p3933_p3)
}
 0xcf4   : > { %s3937_s21 = scalar_lea.hbm %s6000_s18, 256  ;;  %s3941_s9 = scalar_lea.hbm %s6053_s7, 512 }
 0xcf5   : > { %p3938_p4 = scmp.ne.s32.totalorder %s6000_s18, %s3937_s21  ;;  %p3942_p9 = scmp.lt.s32.totalorder %s6000_s18, %s6053_s7 }
 0xcf6   : > { %p3943_p10 = scmp.lt.s32.totalorder %s3941_s9, %s3937_s21 }
 0xcf7   : > { %p3939_p7 = pnand %p3938_p4, %p4067_p5 }
 0xcf8   : > { %p3944_p11 = por %p3943_p10, %p3942_p9 }
 0xcf9   : > { %p3940_p8 = pneg %p3939_p7 }
 0xcfb   : > { %p3945_p12 = pnand %p3944_p11, %p3940_p8 }
 0xcfd   : > { %3948 = shalt.err (!%p3945_p12)
}
 0xcfe   : > { %s3987_s16 = smov 128   ;;  %s3988_s17 = smov 8  }
 0xcff   : > { %3281 = dma.vmem_to_hbm [thread:$0]  (%p4067_p5), %s6002_s15, 256, %s6000_s18, %s6006_s19, %s3987_s16, %s3987_s16, %s3988_s17  }
 0xd00 PF: > { %p3287_p13 = scmp.ge.s32.totalorder %s3983_s27, 2  ;;  %s3025_s20 = sand.u32 1, %s3971_s24  }
 0xd01   : > { %s3026_s28 = scalar_lea.sflag [#allocation3], %s3025_s20 }
 0xd02   : > { %p3284_p0 = pnand %p3287_p13, %p4071_p6 }
 0xd04   : > { %p3285_p1 = pneg %p3284_p0 }
 0xd06   : > { %3966 = dma.done.wait (%p3285_p1), %s3026_s28, 256  }
 0xd07   : > { %3968 = vsyncadd (%p3285_p1), %s3026_s28, 4294967040  ;;  %p17_p2 = scmp.ge.s32.totalorder %s4054_s30, 4   ;;  %s6263_s24 = smov %s3975_s25 }
 0xd08   : > { %s6264_s25 = smov %s3979_s26  ;;  %s6265_s26 = smov %s4065_s10 }
 0xd09   : > { %s6266_s27 = smov %s4054_s30  ;;  %19 = sbr.rel (!%p17_p2) target bundleno = 3 (0x3), region = 85 }
 0xd0e   :  { %3031 = vsyncpa [#allocation3], 1 }
 0xd0f   :  { %3033 = vsyncpa [#allocation3 + $0x1], 1 }

</bundles_post_ra>
